<compile_context>
chip_gen: v6e
topology: v6e:2x2x1
jax: 0.10.0
libtpu: 0.0.40
codegen_flags: <defaults>
</compile_context>

<pallas_src>
import functools

import jax
import jax.numpy as jnp
from jax.experimental import pallas as pl
from jax.experimental.pallas import tpu as pltpu

# logical sizes (PyTorch module) and lane-padded sizes used inside the kernel
_C1, _C1P = 100, 128      # conv0 / conv1 output channels
_C2, _C2P = 200, 256      # conv2 / conv3 output channels == LSTM input size
_H, _HP = 200, 256        # LSTM hidden size (4H: 800 -> 1024, gate blocks at 0/256/512/768)
_TB_MAX = 128             # batch tile (MXU M fill); grid handles any batch size


def _round_up(n, m):
    return ((n + m - 1) // m) * m


# --------------------------------------------------------------------------------------
# Fused kernel: conv stack -> bidirectional LSTM (last position) -> MLP head
# Activations are time-major (L, TB, C): halo/taps/pool are leading-axis ops (no relayouts).
# --------------------------------------------------------------------------------------
def _cnn_lstm_kernel(xc_ref,                                   # (L, TB, 20) im2col'ed input
                     w0_ref, b0_ref,                           # (20, 128) bf16, (1, 128) f32
                     w1_ref, b1_ref,                           # (640, 128) bf16, (1, 128) f32
                     w2_ref, b2_ref,                           # (640, 256) bf16, (1, 256) f32
                     w3_ref, b3_ref,                           # (1280, 256) bf16 (BN folded)
                     wih_f_ref, whh_f_ref, bf_ref,             # (256,1024) bf16 x2, (1,1024) f32
                     wih_b_ref, bb_ref,                        # reverse dir: first step only
                     lin_w_ref, lin_b_ref,                     # (512, 128) bf16, (1, 128) f32
                     out_w_ref, out_b_ref,                     # (128, 128) bf16, (1, 128) f32
                     o_ref,                                    # (TB, 128) -- column 0 is the output
                     gx_ref,                                   # VMEM scratch (T, TB, 1024) f32
                     *, TB, L):
    f32 = jnp.float32
    bf16 = jnp.bfloat16
    Hp = _HP

    def conv5(a, w_ref, b_ref):
        """'same' Conv1d(k=5) + bias + ReLU.  One K-concatenated MXU matmul for all 5 taps."""
        Lc, Bq, Cin = a.shape
        Cout = w_ref.shape[1]
        halo = jnp.zeros((2, Bq, Cin), f32)
        ap = jnp.concatenate([halo, a, halo], axis=0)           # leading-axis halo: cheap
        slab = jnp.concatenate([ap[k:k + Lc] for k in range(5)], axis=-1)  # (Lc, Bq, 5*Cin)
        acc = jnp.dot(slab.reshape(Lc * Bq, 5 * Cin).astype(bf16), w_ref[...],
                      preferred_element_type=f32)
        return jnp.maximum(acc + b_ref[...], 0.0).reshape(Lc, Bq, Cout)

    def pool2(a):
        """MaxPool1d(2, stride=2) along time (leading axis): reshape + elementwise max."""
        Lc, Bq, C = a.shape
        r = a.reshape(Lc // 2, 2, Bq, C)
        return jnp.maximum(r[:, 0], r[:, 1])

    # ---- conv stack (Dropout layers are identity in eval mode) -------------------------
    a0 = jnp.maximum(
        jnp.dot(xc_ref[...].reshape(L * TB, 20).astype(bf16), w0_ref[...],
                preferred_element_type=f32) + b0_ref[...], 0.0).reshape(L, TB, _C1P)
    a1 = pool2(conv5(a0, w1_ref, b1_ref))                       # conv1 + ReLU, pool
    a2 = pool2(conv5(a1, w2_ref, b2_ref))                       # conv2 + ReLU, pool
    a3 = conv5(a2, w3_ref, b3_ref)                              # conv3 (+folded BN) + ReLU

    T = L // 4
    Cl = a3.shape[2]

    # ---- bidirectional LSTM; only output[:, -1, :] is consumed --------------------------
    # Hoisted input projection: one (T*TB, C) @ (C, 4H) matmul, stashed in VMEM scratch.
    gx = jnp.dot(a3.reshape(T * TB, Cl).astype(bf16), wih_f_ref[...],
                 preferred_element_type=f32) + bf_ref[...]
    gx_ref[...] = gx.reshape(T, TB, 4 * Hp)

    # Reverse direction at the last position == ONE reverse-cell step on x[T-1] from zeros
    # (h0 = 0, so the W_hh_reverse term vanishes).  Computed before the loop so a3 can die.
    gb = jnp.dot(a3[T - 1].astype(bf16), wih_b_ref[...], preferred_element_type=f32) + bb_ref[...]
    ib = jax.nn.sigmoid(gb[:, 0 * Hp:1 * Hp])                   # PyTorch gate order: i, f, g, o
    gg = jnp.tanh(gb[:, 2 * Hp:3 * Hp])
    ob = jax.nn.sigmoid(gb[:, 3 * Hp:4 * Hp])
    h_bwd = ob * jnp.tanh(ib * gg)

    # Forward recurrence: fori_loop bounds the live set to (h, c); only h @ Whh per step.
    # TODO(synk): on v6e/v7x Whh could be staged once via pltpu.matmul_push_rhs/acc_lhs/pop.
    def step(t, carry):
        h, c = carry
        gates = gx_ref[t] + jnp.dot(h.astype(bf16), whh_f_ref[...],
                                    preferred_element_type=f32)
        i = jax.nn.sigmoid(gates[:, 0 * Hp:1 * Hp])
        f = jax.nn.sigmoid(gates[:, 1 * Hp:2 * Hp])
        g = jnp.tanh(gates[:, 2 * Hp:3 * Hp])
        o = jax.nn.sigmoid(gates[:, 3 * Hp:4 * Hp])
        c = f * c + i * g
        h = o * jnp.tanh(c)
        return (h, c)

    zeros = jnp.zeros((TB, Hp), f32)
    h_fwd, _ = jax.lax.fori_loop(0, T, step, (zeros, zeros))

    # ---- head: Linear(400->100) + ReLU (+ identity dropout) + Linear(100->1) -----------
    hcat = jnp.concatenate([h_fwd, h_bwd], axis=-1)             # (TB, 512), gate-aligned concat
    h1 = jnp.maximum(
        jnp.dot(hcat.astype(bf16), lin_w_ref[...], preferred_element_type=f32)
        + lin_b_ref[...], 0.0)
    o_ref[...] = (jnp.dot(h1.astype(bf16), out_w_ref[...], preferred_element_type=f32)
                  + out_b_ref[...])


# --------------------------------------------------------------------------------------
# One-time parameter algebra (run ONCE, outside jit): layout transposes, BN folding,
# lane padding, K-concatenation of conv taps, bf16 cast of matmul weights.
# --------------------------------------------------------------------------------------
def _pad2(a, rows, cols):
    return jnp.pad(a, ((0, rows - a.shape[0]), (0, cols - a.shape[1])))


def _conv_taps(w_torch, cin_pad, cout_pad):
    """(Cout, Cin, 5) PyTorch layout -> (5*Cin_pad, Cout_pad); row index = k*Cin_pad + c."""
    cout, cin, k = w_torch.shape
    w = jnp.transpose(w_torch, (2, 1, 0))
    w = jnp.pad(w, ((0, 0), (0, cin_pad - cin), (0, cout_pad - cout)))
    return w.reshape(k * cin_pad, cout_pad)


def _pad_gates(a, rows_pad):
    """(rows, 4*_H) -> (rows_pad, 4*_HP); each i/f/g/o gate block padded independently."""
    rows = a.shape[0]
    blocks = [jnp.pad(a[:, g * _H:(g + 1) * _H],
                      ((0, rows_pad - rows), (0, _HP - _H))) for g in range(4)]
    return jnp.concatenate(blocks, axis=1)


def prepare_weights(p):
    f32, bf16 = jnp.float32, jnp.bfloat16

    # conv0 as im2col: rows ordered (tap k, cin) -> (20, 128)
    w0 = _pad2(jnp.transpose(p["conv0_w"], (2, 1, 0)).reshape(5 * 4, _C1), 5 * 4, _C1P)
    b0 = _pad2(p["conv0_b"].reshape(1, _C1), 1, _C1P)

    w1 = _conv_taps(p["conv1_w"], _C1P, _C1P)
    b1 = _pad2(p["conv1_b"].reshape(1, _C1), 1, _C1P)
    w2 = _conv_taps(p["conv2_w"], _C1P, _C2P)
    b2 = _pad2(p["conv2_b"].reshape(1, _C2), 1, _C2P)

    # fold eval-mode BatchNorm1d(200) into conv3's weights / bias
    scale = p["bn_gamma"] / jnp.sqrt(p["bn_var"] + 1e-5)
    w3 = _conv_taps(p["conv3_w"] * scale[:, None, None], _C2P, _C2P)
    b3 = _pad2(((p["conv3_b"] - p["bn_mean"]) * scale + p["bn_beta"]).reshape(1, _C2), 1, _C2P)

    wih_f = _pad_gates(p["wih_f"], _C2P)
    whh_f = _pad_gates(p["whh_f"], _HP)
    b_f = _pad_gates(p["b_f"], 1)
    wih_b = _pad_gates(p["wih_b"], _C2P)
    b_b = _pad_gates(p["b_b"], 1)
    # p["whh_b"] is intentionally unused: the reverse direction at the last time step is its
    # first step from zero state, so the recurrent term vanishes (model reads output[:,-1,:]).

    # head: Linear(2*200 -> 100); rows 0..199 act on h_fwd, rows 256..455 on h_bwd
    lin_w = jnp.zeros((2 * _HP, _C1P), f32)
    lin_w = lin_w.at[0:_H, 0:_C1].set(p["lin_w"][0:_H])
    lin_w = lin_w.at[_HP:_HP + _H, 0:_C1].set(p["lin_w"][_H:2 * _H])
    lin_b = _pad2(p["lin_b"], 1, _C1P)
    out_w = jnp.zeros((_C1P, 128), f32).at[0:_C1, 0:1].set(p["out_w"])
    out_b = jnp.zeros((1, 128), f32).at[:, 0:1].set(p["out_b"])

    bf = lambda a: a.astype(bf16)   # matmul operands in bf16; biases stay f32 (added post-MXU)
    weights = (bf(w0), b0, bf(w1), b1, bf(w2), b2, bf(w3), b3,
               bf(wih_f), bf(whh_f), b_f, bf(wih_b), b_b,
               bf(lin_w), lin_b, bf(out_w), out_b)
    return tuple(jax.device_put(w) for w in weights)


# --------------------------------------------------------------------------------------
# Forward wrapper: batch-tiled grid, weights VMEM-resident across tiles.
# --------------------------------------------------------------------------------------
def _resident_spec(arr):
    nd = arr.ndim
    return pl.BlockSpec(arr.shape, lambda i, _nd=nd: (0,) * _nd)   # constant index map


def cnn_lstm_forward(weights, x):
    """x: (B, seq_len, 4) float32 -> (B, 1); matches CNN_LSTM.forward in eval mode."""
    B, L, cin = x.shape
    assert cin == 4 and L % 4 == 0, "seq_len must be a multiple of 4 (two MaxPool1d(2,2) stages)"
    x = x.astype(jnp.float32)

    TB = min(_TB_MAX, _round_up(B, 8))          # batch tile (multiple of 8)
    Bp = _round_up(B, TB)                       # pad batch so every tile is full
    T = L // 4

    # time-major im2col for conv0: (B, L, 4) -> (L, Bp, 20); padded batch columns are zero.
    xt = jnp.transpose(x, (1, 0, 2))                              # (L, B, 4)
    xt = jnp.pad(xt, ((2, 2), (0, Bp - B), (0, 0)))               # conv halo + batch pad
    xcol = jnp.concatenate([xt[k:k + L] for k in range(5)], axis=-1)  # (L, Bp, 20)

    kernel = functools.partial(_cnn_lstm_kernel, TB=TB, L=L)
    in_specs = [pl.BlockSpec((L, TB, 20), lambda i: (0, i, 0))]   # activation tile
    in_specs += [_resident_spec(w) for w in weights]              # weights resident across tiles

    out = pl.pallas_call(
        kernel,
        out_shape=jax.ShapeDtypeStruct((Bp, 128), jnp.float32),
        grid=(Bp // TB,),
        in_specs=in_specs,
        out_specs=pl.BlockSpec((TB, 128), lambda i: (i, 0)),
        scratch_shapes=[pltpu.VMEM((T, TB, 4 * _HP), jnp.float32)],
        compiler_params=pltpu.CompilerParams(
            dimension_semantics=("parallel",),                    # megacore sharding on v7x
            vmem_limit_bytes=48 * 1024 * 1024),                   # fits v7x's 64 MiB VMEM
    )(xcol, *weights)
    return out[:B, :1]                    # drop batch padding; padded lanes are zero anyway


# --------------------------------------------------------------------------------------
# Deterministic synthetic parameters (PyTorch layouts / conventions)
# --------------------------------------------------------------------------------------
def init_params(key):
    keys = jax.random.split(key, 22)

    def nrm(k, shape, scale=0.05):
        return scale * jax.random.normal(k, shape, jnp.float32)

    H = _H
    return {
        # convs in PyTorch layout (Cout, Cin, K)
        "conv0_w": nrm(keys[0], (100, 4, 5)),   "conv0_b": nrm(keys[1], (100,)),
        "conv1_w": nrm(keys[2], (100, 100, 5)), "conv1_b": nrm(keys[3], (100,)),
        "conv2_w": nrm(keys[4], (200, 100, 5)), "conv2_b": nrm(keys[5], (200,)),
        "conv3_w": nrm(keys[6], (200, 200, 5)), "conv3_b": nrm(keys[7], (200,)),
        # BatchNorm1d(200) eval-mode parameters / running stats
        "bn_gamma": 1.0 + nrm(keys[8], (200,)),
        "bn_beta":  nrm(keys[9], (200,)),
        "bn_mean":  nrm(keys[10], (200,)),
        "bn_var":   1.0 + 0.1 * jax.random.uniform(keys[11], (200,), jnp.float32),
        # LSTM(200, 200, bidirectional): weights stored transposed (in, 4H);
        # biases are b_ih + b_hh combined, shape (1, 4H). Gate order i, f, g, o (PyTorch).
        "wih_f": nrm(keys[12], (200, 4 * H)), "whh_f": nrm(keys[13], (H, 4 * H)),
        "b_f":   nrm(keys[14], (1, 4 * H)),
        "wih_b": nrm(keys[15], (200, 4 * H)), "whh_b": nrm(keys[16], (H, 4 * H)),
        "b_b":   nrm(keys[17], (1, 4 * H)),
        # Linear(400, 100) and Linear(100, 1), stored as (in, out)
        "lin_w": nrm(keys[18], (400, 100)), "lin_b": nrm(keys[19], (1, 100)),
        "out_w": nrm(keys[20], (100, 1)),   "out_b": nrm(keys[21], (1, 1)),
    }


if __name__ == "__main__":
    key = jax.random.PRNGKey(0)
    k_params, k_x = jax.random.split(key)

    B, seq_len = 2, 16          # small shapes; module default seq_len=44 also works
    params = init_params(k_params)
    weights = prepare_weights(params)          # one-time prep, outside jit
    x = jax.random.normal(k_x, (B, seq_len, 4), jnp.float32)

    fwd = jax.jit(cnn_lstm_forward)
    y = fwd(weights, x)
    jax.block_until_ready(y)

    assert y.shape == (B, 1) and y.dtype == jnp.float32
    assert bool(jnp.all(jnp.isfinite(y)))
    print("KERNEL_OK")
</pallas_src>

<mosaic_0001>
module attributes {stable_mosaic.version = 11 : i64} {
  func.func @_cnn_lstm_kernel(%arg0: i32, %arg1: memref<16x8x20xf32, #tpu.memory_space<vmem>>, %arg2: memref<20x128xbf16, #tpu.memory_space<vmem>>, %arg3: memref<1x128xf32, #tpu.memory_space<vmem>>, %arg4: memref<640x128xbf16, #tpu.memory_space<vmem>>, %arg5: memref<1x128xf32, #tpu.memory_space<vmem>>, %arg6: memref<640x256xbf16, #tpu.memory_space<vmem>>, %arg7: memref<1x256xf32, #tpu.memory_space<vmem>>, %arg8: memref<1280x256xbf16, #tpu.memory_space<vmem>>, %arg9: memref<1x256xf32, #tpu.memory_space<vmem>>, %arg10: memref<256x1024xbf16, #tpu.memory_space<vmem>>, %arg11: memref<256x1024xbf16, #tpu.memory_space<vmem>>, %arg12: memref<1x1024xf32, #tpu.memory_space<vmem>>, %arg13: memref<256x1024xbf16, #tpu.memory_space<vmem>>, %arg14: memref<1x1024xf32, #tpu.memory_space<vmem>>, %arg15: memref<512x128xbf16, #tpu.memory_space<vmem>>, %arg16: memref<1x128xf32, #tpu.memory_space<vmem>>, %arg17: memref<128x128xbf16, #tpu.memory_space<vmem>>, %arg18: memref<1x128xf32, #tpu.memory_space<vmem>>, %arg19: memref<8x128xf32, #tpu.memory_space<vmem>>, %arg20: memref<4x8x1024xf32, #tpu.memory_space<vmem>>) attributes {dimension_semantics = [#tpu.dimension_semantics<parallel>], iteration_bounds = array<i64: 1>, scalar_prefetch = 0 : i64, scratch_operands = 1 : i64, tpu.core_type = #tpu.core_type<tc>, window_params = [{transform_indices = @transform_0, window_bounds = array<i64: 16, 8, 20>}, {pipeline_mode = #tpu.pipeline_mode<synchronous>, transform_indices = @transform_1, window_bounds = array<i64: 20, 128>}, {pipeline_mode = #tpu.pipeline_mode<synchronous>, transform_indices = @transform_2, window_bounds = array<i64: 1, 128>}, {pipeline_mode = #tpu.pipeline_mode<synchronous>, transform_indices = @transform_3, window_bounds = array<i64: 640, 128>}, {pipeline_mode = #tpu.pipeline_mode<synchronous>, transform_indices = @transform_4, window_bounds = array<i64: 1, 128>}, {pipeline_mode = #tpu.pipeline_mode<synchronous>, transform_indices = @transform_5, window_bounds = array<i64: 640, 256>}, {pipeline_mode = #tpu.pipeline_mode<synchronous>, transform_indices = @transform_6, window_bounds = array<i64: 1, 256>}, {pipeline_mode = #tpu.pipeline_mode<synchronous>, transform_indices = @transform_7, window_bounds = array<i64: 1280, 256>}, {pipeline_mode = #tpu.pipeline_mode<synchronous>, transform_indices = @transform_8, window_bounds = array<i64: 1, 256>}, {pipeline_mode = #tpu.pipeline_mode<synchronous>, transform_indices = @transform_9, window_bounds = array<i64: 256, 1024>}, {pipeline_mode = #tpu.pipeline_mode<synchronous>, transform_indices = @transform_10, window_bounds = array<i64: 256, 1024>}, {pipeline_mode = #tpu.pipeline_mode<synchronous>, transform_indices = @transform_11, window_bounds = array<i64: 1, 1024>}, {pipeline_mode = #tpu.pipeline_mode<synchronous>, transform_indices = @transform_12, window_bounds = array<i64: 256, 1024>}, {pipeline_mode = #tpu.pipeline_mode<synchronous>, transform_indices = @transform_13, window_bounds = array<i64: 1, 1024>}, {pipeline_mode = #tpu.pipeline_mode<synchronous>, transform_indices = @transform_14, window_bounds = array<i64: 512, 128>}, {pipeline_mode = #tpu.pipeline_mode<synchronous>, transform_indices = @transform_15, window_bounds = array<i64: 1, 128>}, {pipeline_mode = #tpu.pipeline_mode<synchronous>, transform_indices = @transform_16, window_bounds = array<i64: 128, 128>}, {pipeline_mode = #tpu.pipeline_mode<synchronous>, transform_indices = @transform_17, window_bounds = array<i64: 1, 128>}, {transform_indices = @transform_18, window_bounds = array<i64: 8, 128>}]} {
    %c0 = arith.constant 0 : index
    %c0_0 = arith.constant 0 : index
    %c0_1 = arith.constant 0 : index
    %0 = vector.load %arg1[%c0, %c0_0, %c0_1] : memref<16x8x20xf32, #tpu.memory_space<vmem>>, vector<16x8x20xf32>
    %1 = vector.shape_cast %0 : vector<16x8x20xf32> to vector<128x20xf32>
    %2 = arith.truncf %1 : vector<128x20xf32> to vector<128x20xbf16>
    %c0_2 = arith.constant 0 : index
    %c0_3 = arith.constant 0 : index
    %3 = vector.load %arg2[%c0_2, %c0_3] : memref<20x128xbf16, #tpu.memory_space<vmem>>, vector<20x128xbf16>
    %cst = arith.constant dense<0.000000e+00> : vector<128x128xf32>
    %4 = tpu.matmul %2, %3, %cst {dimension_numbers = #tpu.dot_dimension_numbers<[1], [0], [0], [1], [0, 0, 1, 1], [], []>} : vector<128x20xbf16>, vector<20x128xbf16>, vector<128x128xf32> -> vector<128x128xf32>
    %c0_4 = arith.constant 0 : index
    %c0_5 = arith.constant 0 : index
    %5 = vector.load %arg3[%c0_4, %c0_5] : memref<1x128xf32, #tpu.memory_space<vmem>>, vector<1x128xf32>
    %6 = vector.broadcast %5 : vector<1x128xf32> to vector<128x128xf32>
    %7 = arith.addf %4, %6 : vector<128x128xf32>
    %cst_6 = arith.constant 0.000000e+00 : f32
    %8 = vector.broadcast %cst_6 : f32 to vector<128x128xf32>
    %9 = arith.maximumf %7, %8 : vector<128x128xf32>
    %10 = vector.shape_cast %9 : vector<128x128xf32> to vector<16x8x128xf32>
    %cst_7 = arith.constant 0.000000e+00 : f32
    %11 = vector.broadcast %cst_7 : f32 to vector<2x8x128xf32>
    %12 = tpu.concatenate %11, %10, %11 in 0 : vector<2x8x128xf32>, vector<16x8x128xf32>, vector<2x8x128xf32> -> vector<20x8x128xf32>
    %13 = vector.extract_strided_slice %12 {offsets = [0, 0, 0], sizes = [16, 8, 128], strides = [1, 1, 1]} : vector<20x8x128xf32> to vector<16x8x128xf32>
    %14 = vector.extract_strided_slice %12 {offsets = [1, 0, 0], sizes = [16, 8, 128], strides = [1, 1, 1]} : vector<20x8x128xf32> to vector<16x8x128xf32>
    %15 = vector.extract_strided_slice %12 {offsets = [2, 0, 0], sizes = [16, 8, 128], strides = [1, 1, 1]} : vector<20x8x128xf32> to vector<16x8x128xf32>
    %16 = vector.extract_strided_slice %12 {offsets = [3, 0, 0], sizes = [16, 8, 128], strides = [1, 1, 1]} : vector<20x8x128xf32> to vector<16x8x128xf32>
    %17 = vector.extract_strided_slice %12 {offsets = [4, 0, 0], sizes = [16, 8, 128], strides = [1, 1, 1]} : vector<20x8x128xf32> to vector<16x8x128xf32>
    %18 = tpu.concatenate %13, %14, %15, %16, %17 in 2 : vector<16x8x128xf32>, vector<16x8x128xf32>, vector<16x8x128xf32>, vector<16x8x128xf32>, vector<16x8x128xf32> -> vector<16x8x640xf32>
    %19 = vector.shape_cast %18 : vector<16x8x640xf32> to vector<128x640xf32>
    %20 = arith.truncf %19 : vector<128x640xf32> to vector<128x640xbf16>
    %c0_8 = arith.constant 0 : index
    %c0_9 = arith.constant 0 : index
    %21 = vector.load %arg4[%c0_8, %c0_9] : memref<640x128xbf16, #tpu.memory_space<vmem>>, vector<640x128xbf16>
    %cst_10 = arith.constant dense<0.000000e+00> : vector<128x128xf32>
    %22 = tpu.matmul %20, %21, %cst_10 {dimension_numbers = #tpu.dot_dimension_numbers<[1], [0], [0], [1], [0, 0, 1, 1], [], []>} : vector<128x640xbf16>, vector<640x128xbf16>, vector<128x128xf32> -> vector<128x128xf32>
    %c0_11 = arith.constant 0 : index
    %c0_12 = arith.constant 0 : index
    %23 = vector.load %arg5[%c0_11, %c0_12] : memref<1x128xf32, #tpu.memory_space<vmem>>, vector<1x128xf32>
    %24 = vector.broadcast %23 : vector<1x128xf32> to vector<128x128xf32>
    %25 = arith.addf %22, %24 : vector<128x128xf32>
    %cst_13 = arith.constant 0.000000e+00 : f32
    %26 = vector.broadcast %cst_13 : f32 to vector<128x128xf32>
    %27 = arith.maximumf %25, %26 : vector<128x128xf32>
    %28 = vector.shape_cast %27 : vector<128x128xf32> to vector<16x8x128xf32>
    %29 = vector.shape_cast %28 : vector<16x8x128xf32> to vector<8x2x8x128xf32>
    %30 = vector.extract_strided_slice %29 {offsets = [0, 0, 0, 0], sizes = [8, 1, 8, 128], strides = [1, 1, 1, 1]} : vector<8x2x8x128xf32> to vector<8x1x8x128xf32>
    %31 = vector.shape_cast %30 : vector<8x1x8x128xf32> to vector<8x8x128xf32>
    %32 = vector.extract_strided_slice %29 {offsets = [0, 1, 0, 0], sizes = [8, 1, 8, 128], strides = [1, 1, 1, 1]} : vector<8x2x8x128xf32> to vector<8x1x8x128xf32>
    %33 = vector.shape_cast %32 : vector<8x1x8x128xf32> to vector<8x8x128xf32>
    %34 = arith.maximumf %31, %33 : vector<8x8x128xf32>
    %cst_14 = arith.constant 0.000000e+00 : f32
    %35 = vector.broadcast %cst_14 : f32 to vector<2x8x128xf32>
    %36 = tpu.concatenate %35, %34, %35 in 0 : vector<2x8x128xf32>, vector<8x8x128xf32>, vector<2x8x128xf32> -> vector<12x8x128xf32>
    %37 = vector.extract_strided_slice %36 {offsets = [0, 0, 0], sizes = [8, 8, 128], strides = [1, 1, 1]} : vector<12x8x128xf32> to vector<8x8x128xf32>
    %38 = vector.extract_strided_slice %36 {offsets = [1, 0, 0], sizes = [8, 8, 128], strides = [1, 1, 1]} : vector<12x8x128xf32> to vector<8x8x128xf32>
    %39 = vector.extract_strided_slice %36 {offsets = [2, 0, 0], sizes = [8, 8, 128], strides = [1, 1, 1]} : vector<12x8x128xf32> to vector<8x8x128xf32>
    %40 = vector.extract_strided_slice %36 {offsets = [3, 0, 0], sizes = [8, 8, 128], strides = [1, 1, 1]} : vector<12x8x128xf32> to vector<8x8x128xf32>
    %41 = vector.extract_strided_slice %36 {offsets = [4, 0, 0], sizes = [8, 8, 128], strides = [1, 1, 1]} : vector<12x8x128xf32> to vector<8x8x128xf32>
    %42 = tpu.concatenate %37, %38, %39, %40, %41 in 2 : vector<8x8x128xf32>, vector<8x8x128xf32>, vector<8x8x128xf32>, vector<8x8x128xf32>, vector<8x8x128xf32> -> vector<8x8x640xf32>
    %43 = vector.shape_cast %42 : vector<8x8x640xf32> to vector<64x640xf32>
    %44 = arith.truncf %43 : vector<64x640xf32> to vector<64x640xbf16>
    %c0_15 = arith.constant 0 : index
    %c0_16 = arith.constant 0 : index
    %45 = vector.load %arg6[%c0_15, %c0_16] : memref<640x256xbf16, #tpu.memory_space<vmem>>, vector<640x256xbf16>
    %cst_17 = arith.constant dense<0.000000e+00> : vector<64x256xf32>
    %46 = tpu.matmul %44, %45, %cst_17 {dimension_numbers = #tpu.dot_dimension_numbers<[1], [0], [0], [1], [0, 0, 1, 1], [], []>} : vector<64x640xbf16>, vector<640x256xbf16>, vector<64x256xf32> -> vector<64x256xf32>
    %c0_18 = arith.constant 0 : index
    %c0_19 = arith.constant 0 : index
    %47 = vector.load %arg7[%c0_18, %c0_19] : memref<1x256xf32, #tpu.memory_space<vmem>>, vector<1x256xf32>
    %48 = vector.broadcast %47 : vector<1x256xf32> to vector<64x256xf32>
    %49 = arith.addf %46, %48 : vector<64x256xf32>
    %cst_20 = arith.constant 0.000000e+00 : f32
    %50 = vector.broadcast %cst_20 : f32 to vector<64x256xf32>
    %51 = arith.maximumf %49, %50 : vector<64x256xf32>
    %52 = vector.shape_cast %51 : vector<64x256xf32> to vector<8x8x256xf32>
    %53 = vector.shape_cast %52 : vector<8x8x256xf32> to vector<4x2x8x256xf32>
    %54 = vector.extract_strided_slice %53 {offsets = [0, 0, 0, 0], sizes = [4, 1, 8, 256], strides = [1, 1, 1, 1]} : vector<4x2x8x256xf32> to vector<4x1x8x256xf32>
    %55 = vector.shape_cast %54 : vector<4x1x8x256xf32> to vector<4x8x256xf32>
    %56 = vector.extract_strided_slice %53 {offsets = [0, 1, 0, 0], sizes = [4, 1, 8, 256], strides = [1, 1, 1, 1]} : vector<4x2x8x256xf32> to vector<4x1x8x256xf32>
    %57 = vector.shape_cast %56 : vector<4x1x8x256xf32> to vector<4x8x256xf32>
    %58 = arith.maximumf %55, %57 : vector<4x8x256xf32>
    %cst_21 = arith.constant 0.000000e+00 : f32
    %59 = vector.broadcast %cst_21 : f32 to vector<2x8x256xf32>
    %60 = tpu.concatenate %59, %58, %59 in 0 : vector<2x8x256xf32>, vector<4x8x256xf32>, vector<2x8x256xf32> -> vector<8x8x256xf32>
    %61 = vector.extract_strided_slice %60 {offsets = [0, 0, 0], sizes = [4, 8, 256], strides = [1, 1, 1]} : vector<8x8x256xf32> to vector<4x8x256xf32>
    %62 = vector.extract_strided_slice %60 {offsets = [1, 0, 0], sizes = [4, 8, 256], strides = [1, 1, 1]} : vector<8x8x256xf32> to vector<4x8x256xf32>
    %63 = vector.extract_strided_slice %60 {offsets = [2, 0, 0], sizes = [4, 8, 256], strides = [1, 1, 1]} : vector<8x8x256xf32> to vector<4x8x256xf32>
    %64 = vector.extract_strided_slice %60 {offsets = [3, 0, 0], sizes = [4, 8, 256], strides = [1, 1, 1]} : vector<8x8x256xf32> to vector<4x8x256xf32>
    %65 = vector.extract_strided_slice %60 {offsets = [4, 0, 0], sizes = [4, 8, 256], strides = [1, 1, 1]} : vector<8x8x256xf32> to vector<4x8x256xf32>
    %66 = tpu.concatenate %61, %62, %63, %64, %65 in 2 : vector<4x8x256xf32>, vector<4x8x256xf32>, vector<4x8x256xf32>, vector<4x8x256xf32>, vector<4x8x256xf32> -> vector<4x8x1280xf32>
    %67 = vector.shape_cast %66 : vector<4x8x1280xf32> to vector<32x1280xf32>
    %68 = arith.truncf %67 : vector<32x1280xf32> to vector<32x1280xbf16>
    %c0_22 = arith.constant 0 : index
    %c0_23 = arith.constant 0 : index
    %69 = vector.load %arg8[%c0_22, %c0_23] : memref<1280x256xbf16, #tpu.memory_space<vmem>>, vector<1280x256xbf16>
    %cst_24 = arith.constant dense<0.000000e+00> : vector<32x256xf32>
    %70 = tpu.matmul %68, %69, %cst_24 {dimension_numbers = #tpu.dot_dimension_numbers<[1], [0], [0], [1], [0, 0, 1, 1], [], []>} : vector<32x1280xbf16>, vector<1280x256xbf16>, vector<32x256xf32> -> vector<32x256xf32>
    %c0_25 = arith.constant 0 : index
    %c0_26 = arith.constant 0 : index
    %71 = vector.load %arg9[%c0_25, %c0_26] : memref<1x256xf32, #tpu.memory_space<vmem>>, vector<1x256xf32>
    %72 = vector.broadcast %71 : vector<1x256xf32> to vector<32x256xf32>
    %73 = arith.addf %70, %72 : vector<32x256xf32>
    %cst_27 = arith.constant 0.000000e+00 : f32
    %74 = vector.broadcast %cst_27 : f32 to vector<32x256xf32>
    %75 = arith.maximumf %73, %74 : vector<32x256xf32>
    %76 = vector.shape_cast %75 : vector<32x256xf32> to vector<4x8x256xf32>
    %77 = vector.shape_cast %76 : vector<4x8x256xf32> to vector<32x256xf32>
    %78 = arith.truncf %77 : vector<32x256xf32> to vector<32x256xbf16>
    %c0_28 = arith.constant 0 : index
    %c0_29 = arith.constant 0 : index
    %79 = vector.load %arg10[%c0_28, %c0_29] : memref<256x1024xbf16, #tpu.memory_space<vmem>>, vector<256x1024xbf16>
    %cst_30 = arith.constant dense<0.000000e+00> : vector<32x1024xf32>
    %80 = tpu.matmul %78, %79, %cst_30 {dimension_numbers = #tpu.dot_dimension_numbers<[1], [0], [0], [1], [0, 0, 1, 1], [], []>} : vector<32x256xbf16>, vector<256x1024xbf16>, vector<32x1024xf32> -> vector<32x1024xf32>
    %c0_31 = arith.constant 0 : index
    %c0_32 = arith.constant 0 : index
    %81 = vector.load %arg12[%c0_31, %c0_32] : memref<1x1024xf32, #tpu.memory_space<vmem>>, vector<1x1024xf32>
    %82 = vector.broadcast %81 : vector<1x1024xf32> to vector<32x1024xf32>
    %83 = arith.addf %80, %82 : vector<32x1024xf32>
    %84 = vector.shape_cast %83 : vector<32x1024xf32> to vector<4x8x1024xf32>
    %c0_33 = arith.constant 0 : index
    %c0_34 = arith.constant 0 : index
    %c0_35 = arith.constant 0 : index
    %85 = vector.load %arg20[%c0_33, %c0_34, %c0_35] : memref<4x8x1024xf32, #tpu.memory_space<vmem>>, vector<4x8x1024xf32>
    tpu.vector_store %arg20[%c0_33, %c0_34, %c0_35], %84 {strides = array<i32>} : memref<4x8x1024xf32, #tpu.memory_space<vmem>>, vector<4x8x1024xf32>,
    %86 = vector.extract_strided_slice %76 {offsets = [3, 0, 0], sizes = [1, 8, 256], strides = [1, 1, 1]} : vector<4x8x256xf32> to vector<1x8x256xf32>
    %87 = vector.shape_cast %86 : vector<1x8x256xf32> to vector<8x256xf32>
    %88 = arith.truncf %87 : vector<8x256xf32> to vector<8x256xbf16>
    %c0_36 = arith.constant 0 : index
    %c0_37 = arith.constant 0 : index
    %89 = vector.load %arg13[%c0_36, %c0_37] : memref<256x1024xbf16, #tpu.memory_space<vmem>>, vector<256x1024xbf16>
    %cst_38 = arith.constant dense<0.000000e+00> : vector<8x1024xf32>
    %90 = tpu.matmul %88, %89, %cst_38 {dimension_numbers = #tpu.dot_dimension_numbers<[1], [0], [0], [1], [0, 0, 1, 1], [], []>} : vector<8x256xbf16>, vector<256x1024xbf16>, vector<8x1024xf32> -> vector<8x1024xf32>
    %c0_39 = arith.constant 0 : index
    %c0_40 = arith.constant 0 : index
    %91 = vector.load %arg14[%c0_39, %c0_40] : memref<1x1024xf32, #tpu.memory_space<vmem>>, vector<1x1024xf32>
    %92 = vector.broadcast %91 : vector<1x1024xf32> to vector<8x1024xf32>
    %93 = arith.addf %90, %92 : vector<8x1024xf32>
    %94 = vector.extract_strided_slice %93 {offsets = [0, 0], sizes = [8, 256], strides = [1, 1]} : vector<8x1024xf32> to vector<8x256xf32>
    %95 = arith.negf %94 : vector<8x256xf32>
    %96 = math.exp %95 : vector<8x256xf32>
    %cst_41 = arith.constant 1.000000e+00 : f32
    %97 = vector.broadcast %cst_41 : f32 to vector<8x256xf32>
    %98 = arith.addf %97, %96 : vector<8x256xf32>
    %99 = arith.divf %97, %98 : vector<8x256xf32>
    %100 = vector.extract_strided_slice %93 {offsets = [0, 512], sizes = [8, 256], strides = [1, 1]} : vector<8x1024xf32> to vector<8x256xf32>
    %101 = math.tanh %100 : vector<8x256xf32>
    %102 = vector.extract_strided_slice %93 {offsets = [0, 768], sizes = [8, 256], strides = [1, 1]} : vector<8x1024xf32> to vector<8x256xf32>
    %103 = arith.negf %102 : vector<8x256xf32>
    %104 = math.exp %103 : vector<8x256xf32>
    %cst_42 = arith.constant 1.000000e+00 : f32
    %105 = vector.broadcast %cst_42 : f32 to vector<8x256xf32>
    %106 = arith.addf %105, %104 : vector<8x256xf32>
    %107 = arith.divf %105, %106 : vector<8x256xf32>
    %108 = arith.mulf %99, %101 : vector<8x256xf32>
    %109 = math.tanh %108 : vector<8x256xf32>
    %110 = arith.mulf %107, %109 : vector<8x256xf32>
    %cst_43 = arith.constant 0.000000e+00 : f32
    %111 = vector.broadcast %cst_43 : f32 to vector<8x256xf32>
    %c0_i32 = arith.constant 0 : i32
    %c4_i32 = arith.constant 4 : i32
    %112 = arith.addi %c0_i32, %c4_i32 : i32
    %c1_i32 = arith.constant 1 : i32
    %113:2 = scf.for %arg21 = %c0_i32 to %112 step %c1_i32 iter_args(%arg22 = %111, %arg23 = %111) -> (vector<8x256xf32>, vector<8x256xf32>)  : i32 {
      %130 = arith.index_cast %arg21 : i32 to index
      %c0_58 = arith.constant 0 : index
      %c0_59 = arith.constant 0 : index
      %131 = vector.load %arg20[%130, %c0_58, %c0_59] : memref<4x8x1024xf32, #tpu.memory_space<vmem>>, vector<1x8x1024xf32>
      %132 = vector.shape_cast %131 : vector<1x8x1024xf32> to vector<8x1024xf32>
      %133 = arith.truncf %arg22 : vector<8x256xf32> to vector<8x256xbf16>
      %c0_60 = arith.constant 0 : index
      %c0_61 = arith.constant 0 : index
      %134 = vector.load %arg11[%c0_60, %c0_61] : memref<256x1024xbf16, #tpu.memory_space<vmem>>, vector<256x1024xbf16>
      %cst_62 = arith.constant dense<0.000000e+00> : vector<8x1024xf32>
      %135 = tpu.matmul %133, %134, %cst_62 {dimension_numbers = #tpu.dot_dimension_numbers<[1], [0], [0], [1], [0, 0, 1, 1], [], []>} : vector<8x256xbf16>, vector<256x1024xbf16>, vector<8x1024xf32> -> vector<8x1024xf32>
      %136 = arith.addf %132, %135 : vector<8x1024xf32>
      %137 = vector.extract_strided_slice %136 {offsets = [0, 0], sizes = [8, 256], strides = [1, 1]} : vector<8x1024xf32> to vector<8x256xf32>
      %138 = arith.negf %137 : vector<8x256xf32>
      %139 = math.exp %138 : vector<8x256xf32>
      %cst_63 = arith.constant 1.000000e+00 : f32
      %140 = vector.broadcast %cst_63 : f32 to vector<8x256xf32>
      %141 = arith.addf %140, %139 : vector<8x256xf32>
      %142 = arith.divf %140, %141 : vector<8x256xf32>
      %143 = vector.extract_strided_slice %136 {offsets = [0, 256], sizes = [8, 256], strides = [1, 1]} : vector<8x1024xf32> to vector<8x256xf32>
      %144 = arith.negf %143 : vector<8x256xf32>
      %145 = math.exp %144 : vector<8x256xf32>
      %cst_64 = arith.constant 1.000000e+00 : f32
      %146 = vector.broadcast %cst_64 : f32 to vector<8x256xf32>
      %147 = arith.addf %146, %145 : vector<8x256xf32>
      %148 = arith.divf %146, %147 : vector<8x256xf32>
      %149 = vector.extract_strided_slice %136 {offsets = [0, 512], sizes = [8, 256], strides = [1, 1]} : vector<8x1024xf32> to vector<8x256xf32>
      %150 = math.tanh %149 : vector<8x256xf32>
      %151 = vector.extract_strided_slice %136 {offsets = [0, 768], sizes = [8, 256], strides = [1, 1]} : vector<8x1024xf32> to vector<8x256xf32>
      %152 = arith.negf %151 : vector<8x256xf32>
      %153 = math.exp %152 : vector<8x256xf32>
      %cst_65 = arith.constant 1.000000e+00 : f32
      %154 = vector.broadcast %cst_65 : f32 to vector<8x256xf32>
      %155 = arith.addf %154, %153 : vector<8x256xf32>
      %156 = arith.divf %154, %155 : vector<8x256xf32>
      %157 = arith.mulf %148, %arg23 : vector<8x256xf32>
      %158 = arith.mulf %142, %150 : vector<8x256xf32>
      %159 = arith.addf %157, %158 : vector<8x256xf32>
      %160 = math.tanh %159 : vector<8x256xf32>
      %161 = arith.mulf %156, %160 : vector<8x256xf32>
      scf.yield %161, %159 : vector<8x256xf32>, vector<8x256xf32>
    }
    %c4_i32_44 = arith.constant 4 : i32
    %114 = tpu.concatenate %113#0, %110 in 1 : vector<8x256xf32>, vector<8x256xf32> -> vector<8x512xf32>
    %115 = arith.truncf %114 : vector<8x512xf32> to vector<8x512xbf16>
    %c0_45 = arith.constant 0 : index
    %c0_46 = arith.constant 0 : index
    %116 = vector.load %arg15[%c0_45, %c0_46] : memref<512x128xbf16, #tpu.memory_space<vmem>>, vector<512x128xbf16>
    %cst_47 = arith.constant dense<0.000000e+00> : vector<8x128xf32>
    %117 = tpu.matmul %115, %116, %cst_47 {dimension_numbers = #tpu.dot_dimension_numbers<[1], [0], [0], [1], [0, 0, 1, 1], [], []>} : vector<8x512xbf16>, vector<512x128xbf16>, vector<8x128xf32> -> vector<8x128xf32>
    %c0_48 = arith.constant 0 : index
    %c0_49 = arith.constant 0 : index
    %118 = vector.load %arg16[%c0_48, %c0_49] : memref<1x128xf32, #tpu.memory_space<vmem>>, vector<1x128xf32>
    %119 = vector.broadcast %118 : vector<1x128xf32> to vector<8x128xf32>
    %120 = arith.addf %117, %119 : vector<8x128xf32>
    %cst_50 = arith.constant 0.000000e+00 : f32
    %121 = vector.broadcast %cst_50 : f32 to vector<8x128xf32>
    %122 = arith.maximumf %120, %121 : vector<8x128xf32>
    %123 = arith.truncf %122 : vector<8x128xf32> to vector<8x128xbf16>
    %c0_51 = arith.constant 0 : index
    %c0_52 = arith.constant 0 : index
    %124 = vector.load %arg17[%c0_51, %c0_52] : memref<128x128xbf16, #tpu.memory_space<vmem>>, vector<128x128xbf16>
    %cst_53 = arith.constant dense<0.000000e+00> : vector<8x128xf32>
    %125 = tpu.matmul %123, %124, %cst_53 {dimension_numbers = #tpu.dot_dimension_numbers<[1], [0], [0], [1], [0, 0, 1, 1], [], []>} : vector<8x128xbf16>, vector<128x128xbf16>, vector<8x128xf32> -> vector<8x128xf32>
    %c0_54 = arith.constant 0 : index
    %c0_55 = arith.constant 0 : index
    %126 = vector.load %arg18[%c0_54, %c0_55] : memref<1x128xf32, #tpu.memory_space<vmem>>, vector<1x128xf32>
    %127 = vector.broadcast %126 : vector<1x128xf32> to vector<8x128xf32>
    %128 = arith.addf %125, %127 : vector<8x128xf32>
    %c0_56 = arith.constant 0 : index
    %c0_57 = arith.constant 0 : index
    %129 = vector.load %arg19[%c0_56, %c0_57] : memref<8x128xf32, #tpu.memory_space<vmem>>, vector<8x128xf32>
    tpu.vector_store %arg19[%c0_56, %c0_57], %128 {strides = array<i32>} : memref<8x128xf32, #tpu.memory_space<vmem>>, vector<8x128xf32>,
    return
  }
  func.func @transform_0(%arg0: i32) -> (i32, i32, i32) {
    %c0_i32 = arith.constant 0 : i32
    %c0_i32_0 = arith.constant 0 : i32
    %c0_i32_1 = arith.constant 0 : i32
    return %c0_i32, %arg0, %c0_i32_0 : i32, i32, i32
  }
  func.func @transform_1(%arg0: i32) -> (i32, i32) {
    %c0_i32 = arith.constant 0 : i32
    %c0_i32_0 = arith.constant 0 : i32
    %c0_i32_1 = arith.constant 0 : i32
    return %c0_i32, %c0_i32_0 : i32, i32
  }
  func.func @transform_2(%arg0: i32) -> (i32, i32) {
    %c0_i32 = arith.constant 0 : i32
    %c0_i32_0 = arith.constant 0 : i32
    %c0_i32_1 = arith.constant 0 : i32
    return %c0_i32, %c0_i32_0 : i32, i32
  }
  func.func @transform_3(%arg0: i32) -> (i32, i32) {
    %c0_i32 = arith.constant 0 : i32
    %c0_i32_0 = arith.constant 0 : i32
    %c0_i32_1 = arith.constant 0 : i32
    return %c0_i32, %c0_i32_0 : i32, i32
  }
  func.func @transform_4(%arg0: i32) -> (i32, i32) {
    %c0_i32 = arith.constant 0 : i32
    %c0_i32_0 = arith.constant 0 : i32
    %c0_i32_1 = arith.constant 0 : i32
    return %c0_i32, %c0_i32_0 : i32, i32
  }
  func.func @transform_5(%arg0: i32) -> (i32, i32) {
    %c0_i32 = arith.constant 0 : i32
    %c0_i32_0 = arith.constant 0 : i32
    %c0_i32_1 = arith.constant 0 : i32
    return %c0_i32, %c0_i32_0 : i32, i32
  }
  func.func @transform_6(%arg0: i32) -> (i32, i32) {
    %c0_i32 = arith.constant 0 : i32
    %c0_i32_0 = arith.constant 0 : i32
    %c0_i32_1 = arith.constant 0 : i32
    return %c0_i32, %c0_i32_0 : i32, i32
  }
  func.func @transform_7(%arg0: i32) -> (i32, i32) {
    %c0_i32 = arith.constant 0 : i32
    %c0_i32_0 = arith.constant 0 : i32
    %c0_i32_1 = arith.constant 0 : i32
    return %c0_i32, %c0_i32_0 : i32, i32
  }
  func.func @transform_8(%arg0: i32) -> (i32, i32) {
    %c0_i32 = arith.constant 0 : i32
    %c0_i32_0 = arith.constant 0 : i32
    %c0_i32_1 = arith.constant 0 : i32
    return %c0_i32, %c0_i32_0 : i32, i32
  }
  func.func @transform_9(%arg0: i32) -> (i32, i32) {
    %c0_i32 = arith.constant 0 : i32
    %c0_i32_0 = arith.constant 0 : i32
    %c0_i32_1 = arith.constant 0 : i32
    return %c0_i32, %c0_i32_0 : i32, i32
  }
  func.func @transform_10(%arg0: i32) -> (i32, i32) {
    %c0_i32 = arith.constant 0 : i32
    %c0_i32_0 = arith.constant 0 : i32
    %c0_i32_1 = arith.constant 0 : i32
    return %c0_i32, %c0_i32_0 : i32, i32
  }
  func.func @transform_11(%arg0: i32) -> (i32, i32) {
    %c0_i32 = arith.constant 0 : i32
    %c0_i32_0 = arith.constant 0 : i32
    %c0_i32_1 = arith.constant 0 : i32
    return %c0_i32, %c0_i32_0 : i32, i32
  }
  func.func @transform_12(%arg0: i32) -> (i32, i32) {
    %c0_i32 = arith.constant 0 : i32
    %c0_i32_0 = arith.constant 0 : i32
    %c0_i32_1 = arith.constant 0 : i32
    return %c0_i32, %c0_i32_0 : i32, i32
  }
  func.func @transform_13(%arg0: i32) -> (i32, i32) {
    %c0_i32 = arith.constant 0 : i32
    %c0_i32_0 = arith.constant 0 : i32
    %c0_i32_1 = arith.constant 0 : i32
    return %c0_i32, %c0_i32_0 : i32, i32
  }
  func.func @transform_14(%arg0: i32) -> (i32, i32) {
    %c0_i32 = arith.constant 0 : i32
    %c0_i32_0 = arith.constant 0 : i32
    %c0_i32_1 = arith.constant 0 : i32
    return %c0_i32, %c0_i32_0 : i32, i32
  }
  func.func @transform_15(%arg0: i32) -> (i32, i32) {
    %c0_i32 = arith.constant 0 : i32
    %c0_i32_0 = arith.constant 0 : i32
    %c0_i32_1 = arith.constant 0 : i32
    return %c0_i32, %c0_i32_0 : i32, i32
  }
  func.func @transform_16(%arg0: i32) -> (i32, i32) {
    %c0_i32 = arith.constant 0 : i32
    %c0_i32_0 = arith.constant 0 : i32
    %c0_i32_1 = arith.constant 0 : i32
    return %c0_i32, %c0_i32_0 : i32, i32
  }
  func.func @transform_17(%arg0: i32) -> (i32, i32) {
    %c0_i32 = arith.constant 0 : i32
    %c0_i32_0 = arith.constant 0 : i32
    %c0_i32_1 = arith.constant 0 : i32
    return %c0_i32, %c0_i32_0 : i32, i32
  }
  func.func @transform_18(%arg0: i32) -> (i32, i32) {
    %c0_i32 = arith.constant 0 : i32
    %c0_i32_0 = arith.constant 0 : i32
    return %arg0, %c0_i32 : i32, i32
  }
}

</mosaic_0001>

<bundles_post_ra>
// kernel: cnn_lstm_forward.1
= control target key start
LH: loop header
LB: loop body
LE: loop exit
PB: predicated region body
PF: predicated region fallthrough
CT: control target
= control target key end

     0   :  { %s9199_s0 = inlined_call_operand.vmem [shape: f32[16,8,20], index: 0, kind: input, shape index: {}]   ;;  %s9200_s1 = inlined_call_operand.vmem [shape: bf16[20,128], index: 1, kind: input, shape index: {}]   ;;  %s9201_s2 = inlined_call_operand.vmem [shape: f32[1,128], index: 2, kind: input, shape index: {}]   ;;  %s9202_s3 = inlined_call_operand.hbm [shape: bf16[640,128], index: 3, kind: input, shape index: {}]   ;;  %s9203_s4 = inlined_call_operand.vmem [shape: f32[1,128], index: 4, kind: input, shape index: {}]   ;;  %s9204_s5 = inlined_call_operand.hbm [shape: bf16[640,256], index: 5, kind: input, shape index: {}]   ;;  %s9205_s6 = inlined_call_operand.vmem [shape: f32[1,256], index: 6, kind: input, shape index: {}]   ;;  %s9206_s7 = inlined_call_operand.vmem [shape: bf16[1280,256], index: 7, kind: input, shape index: {}]   ;;  %s9207_s8 = inlined_call_operand.vmem [shape: f32[1,256], index: 8, kind: input, shape index: {}]   ;;  %s9208_s9 = inlined_call_operand.hbm [shape: bf16[256,1024], index: 9, kind: input, shape index: {}]   ;;  %s9209_s10 = inlined_call_operand.hbm [shape: bf16[256,1024], index: 10, kind: input, shape index: {}]   ;;  %s9210_s11 = inlined_call_operand.vmem [shape: f32[1,1024], index: 11, kind: input, shape index: {}]   ;;  %s9211_s12 = inlined_call_operand.hbm [shape: bf16[256,1024], index: 12, kind: input, shape index: {}]   ;;  %s9212_s13 = inlined_call_operand.vmem [shape: f32[1,1024], index: 13, kind: input, shape index: {}]   ;;  %s9213_s14 = inlined_call_operand.hbm [shape: bf16[512,128], index: 14, kind: input, shape index: {}]   ;;  %s9214_s15 = inlined_call_operand.vmem [shape: f32[1,128], index: 15, kind: input, shape index: {}]   ;;  %s9215_s16 = inlined_call_operand.vmem [shape: bf16[128,128], index: 16, kind: input, shape index: {}]   ;;  %s9216_s17 = inlined_call_operand.vmem [shape: f32[1,128], index: 17, kind: input, shape index: {}]   ;;  %s9217_s18 = inlined_call_operand.vmem [shape: f32[8,128], index: 18, kind: output, shape index: {}]  }
   0x1   :  { %9225 = sst [smem:[#allocation23_spill]] %s9199_s0 }
   0x2   :  { %9226 = sst [smem:[#allocation24_spill]] %s9200_s1 }
   0x3   :  { %9227 = sst [smem:[#allocation25_spill]] %s9201_s2 }
   0x4   :  { %23 = vsyncpa [#allocation4], 0 }
   0x5   :  { %24 = vsyncpa [#allocation6], 0 }
   0x6   :  { %25 = vsyncpa [#allocation9], 0 }
   0x7   :  { %26 = vsyncpa [#allocation12], 0  ;;  %s8009_s27 = smov [#allocation5]  }
   0x8   :  { %s52_s28 = sshll.u32 %s8009_s27, 4  ;;  %s53_s28 = int_to_ptr.vmem [resolvable:$true] %s52_s28 }
   0x9   :  { %s7849_s29 = scalar_lea.vmem %s53_s28, 10240  ;;  %p7854_p1 = scmp.lt.s32.totalorder %s53_s28, %s53_s28 }
   0xa   :  { %p7850_p0 = scmp.ne.s32.totalorder %s53_s28, %s7849_s29  ;;  %p7855_p2 = scmp.lt.s32.totalorder %s7849_s29, %s7849_s29 }
   0xc   :  { %p7856_p3 = por %p7855_p2, %p7854_p1 }
   0xe   :  { %p7857_p4 = pnand %p7856_p3, %p7850_p0 }
  0x10   :  { %7860 = shalt.err (!%p7857_p4)
}
  0x11   :  { %s8010_s30 = smov 128   ;;  %s8011_s0 = smov 8  }
  0x12   :  { %58 = dma.hbm_to_vmem [thread:$0]  %s9204_s5, 10240, %s53_s28, [#allocation6], %s8010_s30, %s8010_s30, %s8011_s0  }
  0x13   :  { %s8012_s20 = smov [#allocation8]   ;;  %s8013_s22 = smov [#allocation3]  }
  0x14   :  { %s82_s21 = sshll.u32 %s8012_s20, 4  ;;  %s38_s2 = sshll.u32 %s8013_s22, 4  ;;  %s83_s21 = int_to_ptr.vmem [resolvable:$true] %s82_s21  ;;  %s39_s2 = int_to_ptr.vmem [resolvable:$true] %s38_s2 }
  0x15   :  { %s7869_s23 = scalar_lea.vmem %s83_s21, 16384  ;;  %p7874_p6 = scmp.lt.s32.totalorder %s83_s21, %s83_s21 }
  0x16   :  { %p7870_p5 = scmp.ne.s32.totalorder %s83_s21, %s7869_s23  ;;  %p7875_p7 = scmp.lt.s32.totalorder %s7869_s23, %s7869_s23 }
  0x18   :  { %p7876_p8 = por %p7875_p7, %p7874_p6 }
  0x1a   :  { %p7877_p9 = pnand %p7876_p8, %p7870_p5 }
  0x1c   :  { %7880 = shalt.err (!%p7877_p9)
}
  0x1d   :  { %s8014_s24 = smov 512   ;;  %s8015_s25 = smov 32  }
  0x1e   :  { %88 = dma.hbm_to_vmem [thread:$0]  %s9209_s10, 16384, %s83_s21, [#allocation9], %s8014_s24, %s8014_s24, %s8015_s25  }
  0x1f   :  { %s7889_s5 = scalar_lea.vmem %s39_s2, 5120  ;;  %p7894_p11 = scmp.lt.s32.totalorder %s39_s2, %s39_s2 }
  0x20   :  { %p7890_p10 = scmp.ne.s32.totalorder %s39_s2, %s7889_s5  ;;  %p7895_p12 = scmp.lt.s32.totalorder %s7889_s5, %s7889_s5 }
  0x22   :  { %p7896_p13 = por %p7895_p12, %p7894_p11 }
  0x24   :  { %p7897_p0 = pnand %p7896_p13, %p7890_p10 }
  0x26   :  { %7900 = shalt.err (!%p7897_p0)
}
  0x27   :  { %s8016_s28 = smov 64   ;;  %s8017_s29 = smov 4  }
  0x28   :  { %44 = dma.hbm_to_vmem [thread:$0]  %s9202_s3, 5120, %s39_s2, [#allocation4], %s8016_s28, %s8016_s28, %s8017_s29  }
  0x29   :  { %s8018_s19 = smov [#allocation7]   ;;  %s8019_s10 = smov [#allocation10]  }
  0x2a   :  { %s70_s1 = sshll.u32 %s8018_s19, 4  ;;  %s96_s20 = sshll.u32 %s8019_s10, 4  ;;  %s71_s1 = int_to_ptr.vmem [resolvable:$true] %s70_s1  ;;  %s97_s20 = int_to_ptr.vmem [resolvable:$true] %s96_s20 }
  0x2b   :  { %s7909_s21 = scalar_lea.vmem %s71_s1, 16384  ;;  %p7914_p2 = scmp.lt.s32.totalorder %s71_s1, %s71_s1 }
  0x2c   :  { %p7910_p1 = scmp.ne.s32.totalorder %s71_s1, %s7909_s21  ;;  %p7915_p3 = scmp.lt.s32.totalorder %s7909_s21, %s7909_s21 }
  0x2e   :  { %p7916_p4 = por %p7915_p3, %p7914_p2 }
  0x30   :  { %p7917_p5 = pnand %p7916_p4, %p7910_p1 }
  0x32   :  { %7920 = shalt.err (!%p7917_p5)
}
  0x33   :  { %76 = dma.hbm_to_vmem [thread:$0]  %s9208_s9, 16384, %s71_s1, [#allocation6], %s8014_s24, %s8014_s24, %s8015_s25  }
  0x34   :  { %s7929_s3 = scalar_lea.vmem %s97_s20, 16384  ;;  %p7934_p7 = scmp.lt.s32.totalorder %s97_s20, %s97_s20 }
  0x35   :  { %p7930_p6 = scmp.ne.s32.totalorder %s97_s20, %s7929_s3  ;;  %p7935_p8 = scmp.lt.s32.totalorder %s7929_s3, %s7929_s3 }
  0x37   :  { %p7936_p9 = por %p7935_p8, %p7934_p7 }
  0x39   :  { %p7937_p10 = pnand %p7936_p9, %p7930_p6 }
  0x3b   :  { %7940 = shalt.err (!%p7937_p10)
}
  0x3c   :  { %102 = dma.hbm_to_vmem [thread:$0]  %s9211_s12, 16384, %s97_s20, [#allocation9], %s8014_s24, %s8014_s24, %s8015_s25  }
  0x3d   :  { %s8020_s27 = smov [#allocation11]  }
  0x3e   :  { %s110_s5 = sshll.u32 %s8020_s27, 4  ;;  %s111_s5 = int_to_ptr.vmem [resolvable:$true] %s110_s5 }
  0x3f   :  { %s7949_s30 = scalar_lea.vmem %s111_s5, 4096  ;;  %p7954_p12 = scmp.lt.s32.totalorder %s111_s5, %s111_s5 }
  0x40   :  { %p7950_p11 = scmp.ne.s32.totalorder %s111_s5, %s7949_s30  ;;  %p7955_p13 = scmp.lt.s32.totalorder %s7949_s30, %s7949_s30 }
  0x42   :  { %p7956_p0 = por %p7955_p13, %p7954_p12 }
  0x44   :  { %p7957_p1 = pnand %p7956_p0, %p7950_p11 }
  0x46   :  { %7960 = shalt.err (!%p7957_p1)
}
  0x47   :  { %116 = dma.hbm_to_vmem [thread:$0]  %s9213_s14, 4096, %s111_s5, [#allocation12], %s8016_s28, %s8016_s28, %s8017_s29  }
  0x48   :  { %7981 = dma.done.wait [#allocation4], 5120  }
  0x49   :  { %7982 = vsyncadd [#allocation4], 4294962176 }
  0x4a   :  { %7983 = dma.done.wait [#allocation6], 26624  }
  0x4b   :  { %7984 = vsyncadd [#allocation6], 4294940672 }
  0x4c   :  { %7985 = dma.done.wait [#allocation9], 32768  }
  0x4d   :  { %7986 = vsyncadd [#allocation9], 4294934528 }
  0x4e   :  { %7987 = dma.done.wait [#allocation12], 4096  }
  0x4f   :  { %7988 = vsyncadd [#allocation12], 4294963200  ;;  %vm210_vm0 = vcmask 1041408   ;;  %s9228_s25 = sld [smem:[#allocation24_spill]]  ;;  %vm185_vm1 = vcmask 162816   ;;  %v7345_v12 = vld [vmem:[#allocation3 + $0x78] sm:$0xff]  }
  0x50   :  { %s9229_s14 = sld [smem:[#allocation23_spill]]  ;;  %v7346_v13 = vld [vmem:[#allocation3 + $0x38] sm:$0xff]   ;;  %7017 = vmatprep.subr.bf16.mxu1 %v7345_v12  ;;  %v7347_v16 = vld [vmem:[#allocation3 + $0x70] sm:$0xff]   ;;  %v7351_v22 = vld [vmem:[#allocation3 + $0x68] sm:$0xff]  }
  0x51   :  { %7018 = vmatpush3.bf16.msra.mxu1 %v7346_v13  ;;  %v7348_v19 = vld [vmem:[#allocation3 + $0x30] sm:$0xff]   ;;  %v7349_v20 = vld [vmem:[#allocation3 + $0xf8] sm:$0xff]   ;;  %v7352_v24 = vld [vmem:[#allocation3 + $0x28] sm:$0xff]   ;;  %s9230_s9 = sld [smem:[#allocation25_spill]]  ;;  %v9220_v13 = vmov 0.0|0.0  }
  0x52   :  { %7019 = vmatprep.subr.bf16.mxu1 %v7347_v16  ;;  %v7350_v21 = vld [vmem:[#allocation3 + $0xb8] sm:$0xff]   ;;  %v7353_v26 = vld [vmem:[#allocation3 + $0xf0] sm:$0xff]   ;;  %v7355_v30 = vld [vmem:[#allocation3 + $0x60] sm:$0xff]  }
  0x53   :  { %v7354_v27 = vld [vmem:[#allocation3 + $0xb0] sm:$0xff]   ;;  %v7356_v33 = vld [vmem:[#allocation3 + $0x20] sm:$0xff]   ;;  %v7357_v34 = vld [vmem:[#allocation3 + $0xe8] sm:$0xff]  }
  0x54   :  { %v7358_v35 = vld [vmem:[#allocation3 + $0xa8] sm:$0xff]   ;;  %v7359_v36 = vld [vmem:[#allocation3 + $0x58] sm:$0xff]   ;;  %v7361_v40 = vld [vmem:[#allocation3 + $0xe0] sm:$0xff]  }
  0x55   :  { %v7343_v0 = vld [vmem:[%s9228_s25 + $0x8] ss:$0 sps:$4 sm:$0x33]   ;;  %v7344_v1 = vld [vmem:[%s9228_s25] sm:$0xff]   ;;  %7020 = vmatpush3.bf16.msra.mxu1 %v7348_v19  ;;  %v7360_v38 = vld [vmem:[#allocation3 + $0x18] sm:$0xff]  }
  0x56   :  { %v142_v2 = vld [vmem:[%s9229_s14] sm:$0xff]  ;;  %7286 = vmatprep.subr.msk.bf16.mxu0 %vm210_vm0, %v7343_v0  ;;  %v212_v3 = vsel %vm210_vm0, %v7343_v0, 0  ;;  %v143_v4 = vld [vmem:[%s9229_s14 + $0x8] sm:$0xff]  ;;  %v144_v6 = vld [vmem:[%s9229_s14 + $0x10] sm:$0xff]  ;;  %7021 = vmatprep.subr.bf16.mxu1 %v7351_v22 }
  0x57   :  { %7215 = vmatpush3.bf16.msra.mxu0 %v212_v3  ;;  %v158_v5 = vpack.c.bf16 %v143_v4, %v142_v2  ;;  %v145_v7 = vld [vmem:[%s9229_s14 + $0x18] sm:$0xff]  ;;  %v146_v8 = vld [vmem:[%s9229_s14 + $0x20] sm:$0xff]  ;;  %v147_v9 = vld [vmem:[%s9229_s14 + $0x28] sm:$0xff] }
  0x58   :  { %7216 = vmatprep.subr.bf16.mxu0 %v7344_v1  ;;  %v159_v10 = vpack.c.bf16 %v145_v7, %v144_v6  ;;  %v160_v11 = vpack.c.bf16 %v147_v9, %v146_v8  ;;  %v148_v14 = vld [vmem:[%s9229_s14 + $0x30] sm:$0xff]  ;;  %v149_v15 = vld [vmem:[%s9229_s14 + $0x38] sm:$0xff]  ;;  %v150_v17 = vld [vmem:[%s9229_s14 + $0x40] sm:$0xff] }
  0x59   :  { %7218 = vmatprep.mubr.msk.bf16.mxu0 %vm185_vm1, %v158_v5  ;;  %v151_v18 = vld [vmem:[%s9229_s14 + $0x48] sm:$0xff]  ;;  %v161_v23 = vpack.c.bf16 %v149_v15, %v148_v14  ;;  %v152_v28 = vld [vmem:[%s9229_s14 + $0x50] sm:$0xff]  ;;  %v153_v29 = vld [vmem:[%s9229_s14 + $0x58] sm:$0xff]  ;;  %7022 = vmatpush3.bf16.msra.mxu1 %v7352_v24  ;;  %v9222_v5 = vmov 0.0  }
  0x5a   :  { %v162_v25 = vpack.c.bf16 %v151_v18, %v150_v17  ;;  %v154_v31 = vld [vmem:[%s9229_s14 + $0x60] sm:$0xff]  ;;  %v155_v32 = vld [vmem:[%s9229_s14 + $0x68] sm:$0xff]  ;;  %7023 = vmatprep.subr.bf16.mxu1 %v7355_v30  ;;  %v163_v37 = vpack.c.bf16 %v153_v29, %v152_v28  ;;  %v156_v42 = vld [vmem:[%s9229_s14 + $0x70] sm:$0xff] }
  0x5b   :  { %7217 = vmatpush3.bf16.msra.mxu0 %v7344_v1  ;;  %v164_v39 = vpack.c.bf16 %v155_v32, %v154_v31  ;;  %v7362_v41 = vld [vmem:[#allocation3 + $0xa0] sm:$0xff]   ;;  %v157_v43 = vld [vmem:[%s9229_s14 + $0x78] sm:$0xff]  ;;  %v7363_v44 = vld [vmem:[#allocation3 + $0x50] sm:$0xff]  }
  0x5c   :  { %7081 = vmatprep.subr.bf16.mxu0 %v7349_v20  ;;  %v7364_v45 = vld [vmem:[#allocation3 + $0x10] sm:$0xff]   ;;  %v7365_v46 = vld [vmem:[#allocation3 + $0xd8] sm:$0xff]   ;;  %v165_v48 = vpack.c.bf16 %v157_v43, %v156_v42  ;;  %v7367_v49 = vld [vmem:[#allocation3 + $0x48] sm:$0xff]  }
  0x5d   :  { %7024 = vmatpush3.bf16.msra.mxu1 %v7356_v33  ;;  %v7366_v47 = vld [vmem:[#allocation3 + $0x98] sm:$0xff]   ;;  %v7369_v50 = vld [vmem:[#allocation3 + $0xd0] sm:$0xff]   ;;  %v7368_v51 = vld [vmem:[#allocation3 + $0x8] sm:$0xff]  }
  0x5e   :  { %7219 = vmatmul.mubr.msk.bf16.vlgmr.msra.gmra.mxu0 %vm185_vm1, %v159_v10  ;;  %7025 = vmatprep.subr.bf16.mxu1 %v7359_v36  ;;  %v7370_v52 = vld [vmem:[#allocation3 + $0x90] sm:$0xff]   ;;  %v7371_v53 = vld [vmem:[#allocation3 + $0x40] sm:$0xff]   ;;  %v7373_v54 = vld [vmem:[#allocation3 + $0xc8] sm:$0xff]  }
  0x5f   :  { %7222 = vmatprep.mubr.msk.bf16.mxu0 %vm185_vm1, %v160_v11  ;;  %7082 = vmatpush3.bf16.msra.mxu0 %v7350_v21  ;;  %v7372_v55 = vld [vmem:[#allocation3] sm:$0xff]   ;;  %v7374_v56 = vld [vmem:[#allocation3 + $0x88] sm:$0xff]   ;;  %v7375_v59 = vld [vmem:[#allocation3 + $0x138] sm:$0xff]  }
  0x60   :  { %7083 = vmatprep.subr.bf16.mxu0 %v7353_v26  ;;  %v7376_v57 = vld [vmem:[#allocation3 + $0xc0] sm:$0xff]   ;;  %v7378_v8 = vld [vmem:[#allocation3 + $0x130] sm:$0xff]   ;;  %v7379_v19 = vld [vmem:[#allocation3 + $0x128] sm:$0xff]  }
  0x61   :  { %7026 = vmatpush3.bf16.msra.mxu1 %v7360_v38  ;;  %v7377_v58 = vld [vmem:[#allocation3 + $0x80] sm:$0xff]   ;;  %v7381_v32 = vld [vmem:[#allocation3 + $0x118] sm:$0xff]   ;;  %v7382_v36 = vld [vmem:[#allocation3 + $0x110] sm:$0xff]  }
  0x62   :  { %7027 = vmatprep.subr.bf16.mxu1 %v7363_v44  ;;  %v8218_v61 = vld [vmem:[%s9230_s9] ss:$0 sm:$0xff]  ;;  %v7383_v43 = vld [vmem:[#allocation3 + $0x108] sm:$0xff]  }
  0x63   :  { %7084 = vmatpush3.bf16.msra.mxu0 %v7354_v27  ;;  %v7380_v27 = vld [vmem:[#allocation3 + $0x120] sm:$0xff]  }
  0x64   :  { %7085 = vmatprep.subr.bf16.mxu0 %v7357_v34 }
  0x65   :  { %7028 = vmatpush3.bf16.msra.mxu1 %v7364_v45 }
  0x66   :  { %7223 = vmatmul.mubr.msk.bf16.gmra.mxu0 %vm185_vm1, %v161_v23  ;;  %7029 = vmatprep.subr.bf16.mxu1 %v7367_v49 }
  0x67   :  { %7226 = vmatprep.mubr.msk.bf16.mxu0 %vm185_vm1, %v162_v25  ;;  %7086 = vmatpush3.bf16.msra.mxu0 %v7358_v35 }
  0x68   :  { %7087 = vmatprep.subr.bf16.mxu0 %v7361_v40 }
  0x69   :  { %7030 = vmatpush3.bf16.msra.mxu1 %v7368_v51 }
  0x6a   :  { %7031 = vmatprep.subr.bf16.mxu1 %v7371_v53 }
  0x6b   :  { %7088 = vmatpush3.bf16.msra.mxu0 %v7362_v41 }
  0x6c   :  { %7089 = vmatprep.subr.bf16.mxu0 %v7365_v46 }
  0x6d   :  { %7032 = vmatpush3.bf16.msra.mxu1 %v7372_v55 }
  0x6e   :  { %7227 = vmatmul.mubr.msk.bf16.gmra.mxu0 %vm185_vm1, %v163_v37  ;;  %7234 = vmatprep.subr.bf16.mxu1 %v7375_v59 }
  0x6f   :  { %7230 = vmatprep.mubr.msk.bf16.mxu0 %vm185_vm1, %v164_v39  ;;  %7090 = vmatpush3.bf16.msra.mxu0 %v7366_v47 }
  0x70   :  { %7091 = vmatprep.subr.bf16.mxu0 %v7369_v50 }
  0x73   :  { %7092 = vmatpush3.bf16.msra.mxu0 %v7370_v52 }
  0x74   :  { %7093 = vmatprep.subr.bf16.mxu0 %v7373_v54 }
  0x76   :  { %7231 = vmatmul.mubr.msk.bf16.gmra.mxu0 %vm185_vm1, %v165_v48  ;;  %v7384_v48 = vld [vmem:[#allocation3 + $0x100] sm:$0xff]  }
  0x77   :  { %7094 = vmatpush3.bf16.msra.mxu0 %v7374_v56 }
  0x78   :  { %7095 = vmatprep.subr.bf16.mxu0 %v7376_v57 }
  0x7b   :  { %7096 = vmatpush3.bf16.msra.mxu0 %v7377_v58 }
 0x11e   :  { %v7220_v60 = vpop.f32.mrf.mxu0 }
 0x11f   :  { %v257_v1 = vadd.f32 %v7220_v60, %v8218_v61 }
 0x120   :  { %v248_v62 = vpop.f32.mrf.mxu0 }
 0x121   :  { %v249_v63 = vadd.f32 %v8218_v61, %v248_v62  ;;  %v313_v9 = vmax.f32 %v257_v1, 0.0 }
 0x122   :  { %v7221_v0 = vpop.f32.mrf.mxu0 }
 0x123   :  { %v311_v2 = vmax.f32 %v249_v63, 0.0  ;;  %v260_v10 = vadd.f32 %v7221_v0, %v8218_v61 }
 0x124   :  { %v251_v3 = vpop.f32.mrf.mxu0 }
 0x125   :  { %v252_v4 = vadd.f32 %v8218_v61, %v251_v3  ;;  %v328_v6 = vpack.c.bf16 %v311_v2, %v9222_v5  ;;  %v314_v20 = vmax.f32 %v260_v10, 0.0  ;;  %v7390_v10 = vld [vmem:[#allocation5 + $0x64] ss:$8 sps:$4 sm:$0xff]  }
 0x126   :  { %v7224_v7 = vpop.f32.mrf.mxu0 }
 0x127   :  { %v312_v11 = vmax.f32 %v252_v4, 0.0  ;;  %704 = vmatprep.mubr.bf16.mxu1 %v328_v6  ;;  %v8227_v15 = vadd.f32 %v7224_v7, %v8218_v61  ;;  %v8232_v31 = vpack.c.bf16 %v314_v20, %v313_v9 }
 0x128   :  { %v264_v12 = vpop.f32.mrf.mxu0  ;;  %705 = vmatmul.mubr.bf16.vlgmr.msra.gmra.mxu1 %v9220_v13 }
 0x129   :  { %v329_v14 = vpack.c.bf16 %v312_v11, %v311_v2  ;;  %v265_v16 = vadd.f32 %v8218_v61, %v264_v12  ;;  %7235 = vmatpush3.bf16.msra.mxu1 %v7375_v59  ;;  %v330_v17 = vpack.c.bf16 %v313_v9, %v312_v11  ;;  %v317_v23 = vmax.f32 %v8227_v15, 0.0  ;;  %v7385_v9 = vld [vmem:[#allocation5 + $0x70] ss:$8 sps:$4 sm:$0xff]   ;;  %v7388_v11 = vld [vmem:[#allocation5 + $0x60] ss:$8 sps:$4 sm:$0xff]  }
 0x12a   :  { %v7225_v18 = vpop.f32.mrf.mxu0  ;;  %7236 = vmatprep.subr.bf16.mxu1 %v7378_v8  ;;  %v7393_v12 = vld [vmem:[#allocation5 + $0x54] ss:$8 sps:$4 sm:$0xff]   ;;  %v7391_v15 = vld [vmem:[#allocation5 + $0x50] ss:$8 sps:$4 sm:$0xff]  }
 0x12b   :  { %v315_v21 = vmax.f32 %v265_v16, 0.0  ;;  %712 = vmatprep.mubr.bf16.mxu1 %v330_v17  ;;  %801 = vmatprep.mubr.bf16.mxu0 %v330_v17  ;;  %v276_v35 = vadd.f32 %v7225_v18, %v8218_v61  ;;  %v7394_v16 = vld [vmem:[#allocation5 + $0x170] ss:$8 sps:$4 sm:$0xff]   ;;  %v7399_v17 = vld [vmem:[#allocation5 + $0x44] ss:$8 sps:$4 sm:$0xff]  }
 0x12c   :  { %v267_v22 = vpop.f32.mrf.mxu0  ;;  %802 = vmatmul.mubr.bf16.vlgmr.msra.gmra.mxu0 %v329_v14  ;;  %v7402_v18 = vld [vmem:[#allocation5 + $0x164] ss:$8 sps:$4 sm:$0xff]  }
 0x12d   :  { %v332_v24 = vpack.c.bf16 %v315_v21, %v314_v20  ;;  %v268_v25 = vadd.f32 %v8218_v61, %v267_v22  ;;  %7237 = vmatpush3.bf16.msra.mxu1 %v7378_v8  ;;  %v318_v39 = vmax.f32 %v276_v35, 0.0  ;;  %v7400_v20 = vld [vmem:[#allocation5 + $0x160] ss:$8 sps:$4 sm:$0xff]   ;;  %v7408_v22 = vld [vmem:[#allocation5 + $0x154] ss:$8 sps:$4 sm:$0xff]  }
 0x12e   :  { %v7228_v26 = vpop.f32.mrf.mxu0  ;;  %7238 = vmatprep.subr.bf16.mxu1 %v7379_v19  ;;  %v7421_v35 = vld [vmem:[#allocation5] ss:$8 sps:$4 sm:$0xff]  }
 0x12f   :  { %v316_v28 = vmax.f32 %v268_v25, 0.0  ;;  %809 = vmatprep.mubr.bf16.mxu0 %v332_v24  ;;  %v289_v40 = vadd.f32 %v7228_v26, %v8218_v61  ;;  %v335_v51 = vpack.c.bf16 %v318_v39, %v317_v23  ;;  %v7411_v25 = vld [vmem:[#allocation5 + $0x24] ss:$8 sps:$4 sm:$0xff]  }
 0x130   :  { %v280_v29 = vpop.f32.mrf.mxu0  ;;  %713 = vmatmul.mubr.bf16.gmra.mxu1 %v329_v14  ;;  %v7396_v14 = vld [vmem:[#allocation5 + $0x174] ss:$8 sps:$4 sm:$0xff]   ;;  %v7414_v26 = vld [vmem:[#allocation5 + $0x144] ss:$8 sps:$4 sm:$0xff]  }
 0x131   :  { %720 = vmatprep.mubr.bf16.mxu1 %v332_v24  ;;  %v334_v30 = vpack.c.bf16 %v317_v23, %v316_v28  ;;  %7239 = vmatpush3.bf16.msra.mxu1 %v7379_v19  ;;  %v281_v33 = vadd.f32 %v8218_v61, %v280_v29  ;;  %v333_v42 = vpack.c.bf16 %v316_v28, %v315_v21  ;;  %v321_v46 = vmax.f32 %v289_v40, 0.0  ;;  %v7397_v19 = vld [vmem:[#allocation5 + $0x40] ss:$8 sps:$4 sm:$0xff]   ;;  %v7405_v21 = vld [vmem:[#allocation5 + $0x34] ss:$8 sps:$4 sm:$0xff]  }
 0x132   :  { %7240 = vmatprep.subr.bf16.mxu1 %v7380_v27  ;;  %v7229_v34 = vpop.f32.mrf.mxu0  ;;  %v7403_v23 = vld [vmem:[#allocation5 + $0x30] ss:$8 sps:$4 sm:$0xff]   ;;  %v7412_v28 = vld [vmem:[#allocation5 + $0x140] ss:$8 sps:$4 sm:$0xff]   ;;  %v7417_v29 = vld [vmem:[#allocation5 + $0x14] ss:$8 sps:$4 sm:$0xff]  }
 0x133   :  { %v319_v37 = vmax.f32 %v281_v33, 0.0  ;;  %v292_v53 = vadd.f32 %v7229_v34, %v8218_v61  ;;  %v7406_v24 = vld [vmem:[#allocation5 + $0x150] ss:$8 sps:$4 sm:$0xff]   ;;  %v7423_v33 = vld [vmem:[#allocation5 + $0x4] ss:$8 sps:$4 sm:$0xff]  }
 0x134   :  { %810 = vmatmul.mubr.bf16.gmra.mxu0 %v8232_v31  ;;  %v283_v38 = vpop.f32.mrf.mxu0  ;;  %v7426_v34 = vld [vmem:[#allocation5 + $0x124] ss:$8 sps:$4 sm:$0xff]   ;;  %v7430_v40 = vld [vmem:[#allocation5 + $0x110] ss:$8 sps:$4 sm:$0xff]  }
 0x135   :  { %817 = vmatprep.mubr.bf16.mxu0 %v334_v30  ;;  %7241 = vmatpush3.bf16.msra.mxu1 %v7380_v27  ;;  %v284_v41 = vadd.f32 %v8218_v61, %v283_v38  ;;  %v336_v44 = vpack.c.bf16 %v319_v37, %v318_v39  ;;  %v322_v56 = vmax.f32 %v292_v53, 0.0  ;;  %v7409_v27 = vld [vmem:[#allocation5 + $0x20] ss:$8 sps:$4 sm:$0xff]   ;;  %v7432_v38 = vld [vmem:[#allocation5 + $0x114] ss:$8 sps:$4 sm:$0xff]  }
 0x136   :  { %7242 = vmatprep.subr.bf16.mxu1 %v7381_v32  ;;  %v7232_v45 = vpop.f32.mrf.mxu0  ;;  %v7427_v39 = vld [vmem:[#allocation5 + $0xf0] ss:$8 sps:$4 sm:$0xff]   ;;  %v7453_v53 = vld [vmem:[#allocation5 + $0xb4] ss:$8 sps:$4 sm:$0xff]  }
 0x137   :  { %v320_v47 = vmax.f32 %v284_v41, 0.0  ;;  %v305_v58 = vadd.f32 %v7232_v45, %v8218_v61  ;;  %v339_v2 = vpack.c.bf16 %v322_v56, %v321_v46  ;;  %v7435_v41 = vld [vmem:[#allocation5 + $0xe4] ss:$8 sps:$4 sm:$0xff]   ;;  %v7441_v45 = vld [vmem:[#allocation5 + $0xd4] ss:$8 sps:$4 sm:$0xff]  }
 0x138   :  { %721 = vmatmul.mubr.bf16.gmra.mxu1 %v8232_v31  ;;  %v296_v49 = vpop.f32.mrf.mxu0 }
 0x139   :  { %728 = vmatprep.mubr.bf16.mxu1 %v334_v30  ;;  %7243 = vmatpush3.bf16.msra.mxu1 %v7381_v32  ;;  %v338_v50 = vpack.c.bf16 %v321_v46, %v320_v47  ;;  %v297_v54 = vadd.f32 %v8218_v61, %v296_v49  ;;  %v337_v60 = vpack.c.bf16 %v320_v47, %v319_v37  ;;  %v325_v63 = vmax.f32 %v305_v58, 0.0  ;;  %v7420_v30 = vld [vmem:[#allocation5 + $0x134] ss:$8 sps:$4 sm:$0xff]   ;;  %v7418_v32 = vld [vmem:[#allocation5 + $0x130] ss:$8 sps:$4 sm:$0xff]  }
 0x13a   :  { %7244 = vmatprep.subr.bf16.mxu1 %v7382_v36  ;;  %v7233_v52 = vpop.f32.mrf.mxu0  ;;  %v7429_v37 = vld [vmem:[#allocation5 + $0xf4] ss:$8 sps:$4 sm:$0xff]   ;;  %v7439_v47 = vld [vmem:[#allocation5 + $0xd0] ss:$8 sps:$4 sm:$0xff]   ;;  %v7447_v49 = vld [vmem:[#allocation5 + $0xc4] ss:$8 sps:$4 sm:$0xff]  }
 0x13b   :  { %v323_v57 = vmax.f32 %v297_v54, 0.0  ;;  %v308_v3 = vadd.f32 %v7233_v52, %v8218_v61  ;;  %v7444_v46 = vld [vmem:[#allocation5 + $0x1f4] ss:$8 sps:$4 sm:$0xff]   ;;  %v7448_v52 = vld [vmem:[#allocation5 + $0x1e0] ss:$8 sps:$4 sm:$0xff]  }
 0x13c   :  { %818 = vmatmul.mubr.bf16.gmra.mxu0 %v333_v42  ;;  %v299_v55 = vpop.f32.mrf.mxu0  ;;  %v7456_v54 = vld [vmem:[#allocation5 + $0x1d4] ss:$8 sps:$4 sm:$0xff]   ;;  %v7462_v58 = vld [vmem:[#allocation5 + $0x1c4] ss:$8 sps:$4 sm:$0xff]  }
 0x13d   :  { %825 = vmatprep.mubr.bf16.mxu0 %v336_v44  ;;  %7245 = vmatpush3.bf16.msra.mxu1 %v7382_v36  ;;  %v300_v59 = vadd.f32 %v8218_v61, %v299_v55  ;;  %v340_v62 = vpack.c.bf16 %v323_v57, %v322_v56  ;;  %v326_v4 = vmax.f32 %v308_v3, 0.0  ;;  %v7387_v61 = vld [vmem:[#allocation5 + $0x74] ss:$8 sps:$4 sm:$0xff]   ;;  %v7424_v36 = vld [vmem:[#allocation5 + $0x120] ss:$8 sps:$4 sm:$0xff]  }
 0x13e   :  { %7246 = vmatprep.subr.bf16.mxu1 %v7383_v43  ;;  %1488 = vmatprep.subr.bf16.mxu0 %v7387_v61  ;;  %v7451_v55 = vld [vmem:[#allocation5 + $0xb0] ss:$8 sps:$4 sm:$0xff]   ;;  %v7474_v3 = vld [vmem:[#allocation5 + $0x1a4] ss:$8 sps:$4 sm:$0xff]  }
 0x13f   :  { %v324_v0 = vmax.f32 %v300_v59, 0.0  ;;  %v344_v7 = vpack.c.bf16 %v9222_v5, %v326_v4  ;;  %v343_v8 = vpack.c.bf16 %v326_v4, %v325_v63  ;;  %1489 = vmatpush1.bf16.msra.mxu0 %v7385_v9  ;;  %v7454_v56 = vld [vmem:[#allocation5 + $0x1d0] ss:$8 sps:$4 sm:$0xff]   ;;  %v7457_v59 = vld [vmem:[#allocation5 + $0xa0] ss:$8 sps:$4 sm:$0xff]  }
 0x140   :  { %729 = vmatmul.mubr.bf16.gmra.mxu1 %v333_v42  ;;  %1490 = vmatprep.subr.bf16.mxu0 %v7390_v10  ;;  %v7469_v4 = vld [vmem:[#allocation5 + $0x80] ss:$8 sps:$4 sm:$0xff]   ;;  %v7478_v61 = vld [vmem:[#allocation5 + $0x190] ss:$8 sps:$4 sm:$0xff]   ;;  %v7486_v9 = vld [vmem:[#allocation5 + $0x184] ss:$8 sps:$4 sm:$0xff]  }
 0x141   :  { %736 = vmatprep.mubr.bf16.mxu1 %v336_v44  ;;  %7247 = vmatpush3.bf16.msra.mxu1 %v7383_v43  ;;  %v342_v1 = vpack.c.bf16 %v325_v63, %v324_v0  ;;  %v341_v6 = vpack.c.bf16 %v324_v0, %v323_v57  ;;  %v7433_v43 = vld [vmem:[#allocation5 + $0xe0] ss:$8 sps:$4 sm:$0xff]   ;;  %v7459_v57 = vld [vmem:[#allocation5 + $0xa4] ss:$8 sps:$4 sm:$0xff]   ;;  %v7468_v63 = vld [vmem:[#allocation5 + $0x1b4] ss:$8 sps:$4 sm:$0xff]  }
 0x142   :  { %7248 = vmatprep.subr.bf16.mxu1 %v7384_v48  ;;  %v7436_v44 = vld [vmem:[#allocation5 + $0x100] ss:$8 sps:$4 sm:$0xff]   ;;  %v7463_v0 = vld [vmem:[#allocation5 + $0x90] ss:$8 sps:$4 sm:$0xff]  }
 0x143   :  { %1491 = vmatpush1.bf16.msra.mxu0 %v7388_v11  ;;  %v7484_v10 = vld [vmem:[#allocation5 + $0x180] ss:$8 sps:$4 sm:$0xff]  }
 0x144   :  { %826 = vmatmul.mubr.bf16.gmra.mxu0 %v335_v51  ;;  %1492 = vmatprep.subr.bf16.mxu0 %v7393_v12 }
 0x145   :  { %833 = vmatprep.mubr.bf16.mxu0 %v338_v50  ;;  %7249 = vmatpush3.bf16.msra.mxu1 %v7384_v48  ;;  %v7442_v48 = vld [vmem:[#allocation5 + $0x1f0] ss:$8 sps:$4 sm:$0xff]  }
 0x146   :  { %1561 = vmatprep.subr.bf16.mxu1 %v7396_v14 }
 0x147   :  { %1493 = vmatpush1.bf16.msra.mxu0 %v7391_v15 }
 0x148   :  { %737 = vmatmul.mubr.bf16.gmra.mxu1 %v335_v51  ;;  %1494 = vmatprep.subr.bf16.mxu0 %v7399_v17 }
 0x149   :  { %744 = vmatprep.mubr.bf16.mxu1 %v338_v50  ;;  %v7450_v50 = vld [vmem:[#allocation5 + $0x1e4] ss:$8 sps:$4 sm:$0xff]  }
 0x14b   :  { %1495 = vmatpush1.bf16.msra.mxu0 %v7397_v19 }
 0x14c   :  { %834 = vmatmul.mubr.bf16.gmra.mxu0 %v337_v60  ;;  %1496 = vmatprep.subr.bf16.mxu0 %v7405_v21 }
 0x14d   :  { %841 = vmatprep.mubr.bf16.mxu0 %v340_v62 }
 0x14f   :  { %1497 = vmatpush1.bf16.msra.mxu0 %v7403_v23 }
 0x150   :  { %745 = vmatmul.mubr.bf16.gmra.mxu1 %v337_v60  ;;  %1498 = vmatprep.subr.bf16.mxu0 %v7411_v25 }
 0x151   :  { %752 = vmatprep.mubr.bf16.mxu1 %v340_v62  ;;  %v7465_v62 = vld [vmem:[#allocation5 + $0x94] ss:$8 sps:$4 sm:$0xff]  }
 0x153   :  { %1499 = vmatpush1.bf16.msra.mxu0 %v7409_v27 }
 0x154   :  { %842 = vmatmul.mubr.bf16.gmra.mxu0 %v339_v2  ;;  %1500 = vmatprep.subr.bf16.mxu0 %v7417_v29 }
 0x155   :  { %849 = vmatprep.mubr.bf16.mxu0 %v342_v1 }
 0x158   :  { %753 = vmatmul.mubr.bf16.gmra.mxu1 %v339_v2 }
 0x159   :  { %760 = vmatprep.mubr.bf16.mxu1 %v342_v1  ;;  %v7466_v1 = vld [vmem:[#allocation5 + $0x1b0] ss:$8 sps:$4 sm:$0xff]  }
 0x15c   :  { %850 = vmatmul.mubr.bf16.gmra.mxu0 %v341_v6 }
 0x15d   :  { %857 = vmatprep.mubr.bf16.mxu0 %v344_v7  ;;  %v7477_v7 = vld [vmem:[#allocation5 + $0x274] ss:$8 sps:$4 sm:$0xff]  }
 0x160   :  { %761 = vmatmul.mubr.bf16.gmra.mxu1 %v341_v6 }
 0x161   :  { %7250 = vmatprep.mubr.bf16.mxu1 %v8232_v31  ;;  %v7415_v31 = vld [vmem:[#allocation5 + $0x10] ss:$8 sps:$4 sm:$0xff]  }
 0x162   :  { %1501 = vmatpush1.bf16.msra.mxu0 %v7415_v31 }
 0x163   :  { %1502 = vmatprep.subr.bf16.mxu0 %v7423_v33 }
 0x164   :  { %858 = vmatmul.mubr.bf16.gmra.mxu0 %v343_v8 }
 0x166   :  { %1503 = vmatpush1.bf16.msra.mxu0 %v7421_v35 }
 0x167   :  { %1504 = vmatprep.subr.bf16.mxu0 %v7429_v37 }
 0x168   :  { %7251 = vmatmul.mubr.bf16.vlgmr.msra.gmra.mxu1 %v333_v42  ;;  %v7438_v42 = vld [vmem:[#allocation5 + $0x104] ss:$8 sps:$4 sm:$0xff]  }
 0x169   :  { %7254 = vmatprep.mubr.bf16.mxu1 %v335_v51  ;;  %1562 = vmatpush1.bf16.msra.mxu1 %v7394_v16  ;;  %v7445_v51 = vld [vmem:[#allocation5 + $0xc0] ss:$8 sps:$4 sm:$0xff]  }
 0x16a   :  { %1563 = vmatprep.subr.bf16.mxu1 %v7402_v18  ;;  %1505 = vmatpush2.bf16.msra.mxu0 %v7427_v39 }
 0x16b   :  { %1506 = vmatprep.subr.bf16.mxu0 %v7435_v41 }
 0x16d   :  { %1564 = vmatpush1.bf16.msra.mxu1 %v7400_v20 }
 0x16e   :  { %1565 = vmatprep.subr.bf16.mxu1 %v7408_v22  ;;  %1507 = vmatpush2.bf16.msra.mxu0 %v7433_v43 }
 0x16f   :  { %1508 = vmatprep.subr.bf16.mxu0 %v7441_v45 }
 0x170   :  { %7255 = vmatmul.mubr.bf16.gmra.mxu1 %v337_v60  ;;  %v7460_v60 = vld [vmem:[#allocation5 + $0x1c0] ss:$8 sps:$4 sm:$0xff]  }
 0x171   :  { %7258 = vmatprep.mubr.bf16.mxu1 %v339_v2  ;;  %1566 = vmatpush1.bf16.msra.mxu1 %v7406_v24  ;;  %v7471_v2 = vld [vmem:[#allocation5 + $0x84] ss:$8 sps:$4 sm:$0xff]  }
 0x172   :  { %1567 = vmatprep.subr.bf16.mxu1 %v7414_v26  ;;  %1509 = vmatpush2.bf16.msra.mxu0 %v7439_v47 }
 0x173   :  { %1510 = vmatprep.subr.bf16.mxu0 %v7447_v49 }
 0x175   :  { %1568 = vmatpush1.bf16.msra.mxu1 %v7412_v28 }
 0x176   :  { %1569 = vmatprep.subr.bf16.mxu1 %v7420_v30  ;;  %1511 = vmatpush2.bf16.msra.mxu0 %v7445_v51 }
 0x177   :  { %1512 = vmatprep.subr.bf16.mxu0 %v7453_v53 }
 0x178   :  { %7259 = vmatmul.mubr.bf16.gmra.mxu1 %v341_v6  ;;  %v7472_v6 = vld [vmem:[#allocation5 + $0x1a0] ss:$8 sps:$4 sm:$0xff]  }
 0x179   :  { %7262 = vmatprep.mubr.bf16.mxu1 %v343_v8  ;;  %1570 = vmatpush1.bf16.msra.mxu1 %v7418_v32  ;;  %v7480_v8 = vld [vmem:[#allocation5 + $0x194] ss:$8 sps:$4 sm:$0xff]  }
 0x17a   :  { %1571 = vmatprep.subr.bf16.mxu1 %v7426_v34  ;;  %1513 = vmatpush2.bf16.msra.mxu0 %v7451_v55 }
 0x17b   :  { %1514 = vmatprep.subr.bf16.mxu0 %v7459_v57 }
 0x17d   :  { %1572 = vmatpush1.bf16.msra.mxu1 %v7424_v36 }
 0x17e   :  { %1573 = vmatprep.subr.bf16.mxu1 %v7432_v38  ;;  %1515 = vmatpush2.bf16.msra.mxu0 %v7457_v59 }
 0x17f   :  { %1516 = vmatprep.subr.bf16.mxu0 %v7465_v62 }
 0x180   :  { %7263 = vmatmul.mubr.bf16.gmra.mxu1 %v9220_v13 }
 0x181   :  { %1574 = vmatpush1.bf16.msra.mxu1 %v7430_v40 }
 0x182   :  { %1575 = vmatprep.subr.bf16.mxu1 %v7438_v42  ;;  %1517 = vmatpush2.bf16.msra.mxu0 %v7463_v0 }
 0x183   :  { %1518 = vmatprep.subr.bf16.mxu0 %v7471_v2 }
 0x185   :  { %1576 = vmatpush1.bf16.msra.mxu1 %v7436_v44 }
 0x186   :  { %1577 = vmatprep.subr.bf16.mxu1 %v7444_v46  ;;  %1519 = vmatpush2.bf16.msra.mxu0 %v7469_v4 }
 0x187   :  { %1634 = vmatprep.subr.bf16.mxu0 %v7477_v7 }
 0x189   :  { %1578 = vmatpush2.bf16.msra.mxu1 %v7442_v48  ;;  %v7549_v48 = vld [vmem:[%s9206_s7 + $0x174] ss:$8 sps:$4 sm:$0xff]  }
 0x18a   :  { %1579 = vmatprep.subr.bf16.mxu1 %v7450_v50 }
 0x18d   :  { %1580 = vmatpush2.bf16.msra.mxu1 %v7448_v52 }
 0x18e   :  { %1581 = vmatprep.subr.bf16.mxu1 %v7456_v54 }
 0x191   :  { %1582 = vmatpush2.bf16.msra.mxu1 %v7454_v56 }
 0x192   :  { %1583 = vmatprep.subr.bf16.mxu1 %v7462_v58 }
 0x195   :  { %1584 = vmatpush2.bf16.msra.mxu1 %v7460_v60 }
 0x196   :  { %1585 = vmatprep.subr.bf16.mxu1 %v7468_v63 }
 0x199   :  { %1586 = vmatpush2.bf16.msra.mxu1 %v7466_v1 }
 0x19a   :  { %1587 = vmatprep.subr.bf16.mxu1 %v7474_v3 }
 0x19d   :  { %1588 = vmatpush2.bf16.msra.mxu1 %v7472_v6 }
 0x19e   :  { %1589 = vmatprep.subr.bf16.mxu1 %v7480_v8 }
 0x1a1   :  { %1590 = vmatpush2.bf16.msra.mxu1 %v7478_v61 }
 0x1a2   :  { %1591 = vmatprep.subr.bf16.mxu1 %v7486_v9 }
 0x1a5   :  { %1592 = vmatpush2.bf16.msra.mxu1 %v7484_v10  ;;  %v8336_v10 = vld [vmem:[%s9203_s4] ss:$0 sm:$0xff] }
 0x1a6   :  { %2766 = vmatprep.subr.bf16.mxu1 %v7549_v48 }
 0x1e8   :  { %v7033_v11 = vpop.f32.mrf.mxu1 }
 0x1ea   :  { %v7034_v12 = vpop.f32.mrf.mxu1 }
 0x1eb   :  { %v7035_v8 = vadd.f32 %v7034_v12, %v7033_v11 }
 0x1ec   :  { %v7036_v14 = vpop.f32.mrf.mxu1  ;;  %v7097_v15 = vpop.f32.mrf.mxu0 }
 0x1ee   :  { %v7037_v16 = vpop.f32.mrf.mxu1  ;;  %v7098_v17 = vpop.f32.mrf.mxu0 }
 0x1ef   :  { %v7038_v48 = vadd.f32 %v7037_v16, %v7036_v14  ;;  %v7099_v5 = vadd.f32 %v7098_v17, %v7097_v15 }
 0x1f0   :  { %v7039_v18 = vpop.f32.mrf.mxu1  ;;  %v7100_v19 = vpop.f32.mrf.mxu0 }
 0x1f2   :  { %v7040_v20 = vpop.f32.mrf.mxu1  ;;  %v7101_v21 = vpop.f32.mrf.mxu0 }
 0x1f3   :  { %v7041_v61 = vadd.f32 %v7040_v20, %v7039_v18  ;;  %v710_v18 = vadd.f32 %v7038_v48, %v8336_v10 }
 0x1f4   :  { %v7042_v22 = vpop.f32.mrf.mxu1  ;;  %v7103_v23 = vpop.f32.mrf.mxu0 }
 0x1f5   :  { %v715_v11 = vadd.f32 %v7041_v61, %v8336_v10 }
 0x1f6   :  { %v7043_v24 = vpop.f32.mrf.mxu1  ;;  %v7104_v25 = vpop.f32.mrf.mxu0 }
 0x1f7   :  { %v7044_v9 = vadd.f32 %v7043_v24, %v7042_v22 }
 0x1f8   :  { %v8248_v26 = vpop.f32.mrf.mxu1  ;;  %v7106_v27 = vpop.f32.mrf.mxu0 }
 0x1f9   :  { %v718_v12 = vadd.f32 %v7044_v9, %v8336_v10 }
 0x1fa   :  { %v8250_v28 = vpop.f32.mrf.mxu1  ;;  %v7107_v29 = vpop.f32.mrf.mxu0 }
 0x1fc   :  { %v8252_v30 = vpop.f32.mrf.mxu1  ;;  %v8254_v31 = vpop.f32.mrf.mxu0 }
 0x1fe   :  { %v8256_v32 = vpop.f32.mrf.mxu1  ;;  %v8258_v33 = vpop.f32.mrf.mxu0 }
 0x200   :  { %v8260_v34 = vpop.f32.mrf.mxu1  ;;  %v8262_v35 = vpop.f32.mrf.mxu0 }
 0x202   :  { %v8264_v36 = vpop.f32.mrf.mxu1  ;;  %v8266_v37 = vpop.f32.mrf.mxu0 }
 0x204   :  { %v8268_v38 = vpop.f32.mrf.mxu1  ;;  %v8270_v39 = vpop.f32.mrf.mxu0 }
 0x206   :  { %v8272_v40 = vpop.f32.mrf.mxu1  ;;  %v8274_v41 = vpop.f32.mrf.mxu0 }
 0x208   :  { %v8276_v42 = vpop.f32.mrf.mxu1  ;;  %v8278_v43 = vpop.f32.mrf.mxu0 }
 0x20a   :  { %v8280_v44 = vpop.f32.mrf.mxu1  ;;  %v8282_v45 = vpop.f32.mrf.mxu0 }
 0x20c   :  { %v8284_v46 = vpop.f32.mrf.mxu1  ;;  %v8286_v47 = vpop.f32.mrf.mxu0 }
 0x20e   :  { %v8291_v49 = vpop.f32.mrf.mxu1  ;;  %v8293_v50 = vpop.f32.mrf.mxu0 }
 0x210   :  { %v8295_v51 = vpop.f32.mrf.mxu1  ;;  %v8297_v52 = vpop.f32.mrf.mxu0 }
 0x212   :  { %v8299_v53 = vpop.f32.mrf.mxu1  ;;  %v8301_v54 = vpop.f32.mrf.mxu0 }
 0x214   :  { %v8303_v55 = vpop.f32.mrf.mxu1  ;;  %v8305_v56 = vpop.f32.mrf.mxu0 }
 0x216   :  { %v8307_v57 = vpop.f32.mrf.mxu1  ;;  %v8309_v58 = vpop.f32.mrf.mxu0 }
 0x218   :  { %v8311_v59 = vpop.f32.mrf.mxu1  ;;  %v8313_v60 = vpop.f32.mrf.mxu0 }
 0x21a   :  { %v8315_v62 = vpop.f32.mrf.mxu1  ;;  %v8317_v63 = vpop.f32.mrf.mxu0 }
 0x21c   :  { %v8319_v0 = vpop.f32.mrf.mxu1  ;;  %v8323_v2 = vpop.f32.mrf.mxu0 }
 0x21d   :  { %9231 = vst [vmem:[#allocation17_spill] sm:$0xff] %v8319_v0  ;;  %9233 = vst [vmem:[#allocation19_spill] sm:$0xff] %v8323_v2  ;;  %v7105_v2 = vadd.f32 %v7104_v25, %v7103_v23  ;;  %v7102_v0 = vadd.f32 %v7101_v21, %v7100_v19  ;;  %v7047_v19 = vadd.f32 %v8250_v28, %v8248_v26 }
 0x21e   :  { %v8321_v1 = vpop.f32.mrf.mxu1  ;;  %v8329_v6 = vpop.f32.mrf.mxu0 }
 0x21f   :  { %9232 = vst [vmem:[#allocation18_spill] sm:$0xff] %v8321_v1  ;;  %9235 = vst [vmem:[#allocation21_spill] sm:$0xff] %v8329_v6  ;;  %v7108_v1 = vadd.f32 %v7107_v29, %v7106_v27  ;;  %v812_v22 = vadd.f32 %v7105_v2, %v715_v11  ;;  %v807_v17 = vadd.f32 %v7102_v0, %v710_v18 }
 0x220   :  { %v8325_v3 = vpop.f32.mrf.mxu1  ;;  %v7050_v27 = vadd.f32 %v8256_v32, %v8252_v30  ;;  %v723_v26 = vadd.f32 %v7047_v19, %v8336_v10  ;;  %v7056_v32 = vadd.f32 %v8272_v40, %v8268_v38  ;;  %v7117_v40 = vadd.f32 %v8274_v41, %v8270_v39 }
 0x221   :  { %v815_v16 = vadd.f32 %v7108_v1, %v718_v12  ;;  %v7114_v1 = vadd.f32 %v8266_v37, %v8262_v35  ;;  %v7053_v35 = vadd.f32 %v8264_v36, %v8260_v34  ;;  %v7059_v37 = vadd.f32 %v8280_v44, %v8276_v42  ;;  %v7483_v44 = vld [vmem:[#allocation5 + $0x264] ss:$8 sps:$4 sm:$0xff]  }
 0x222   :  { %v8327_v4 = vpop.f32.mrf.mxu1  ;;  %v726_v9 = vadd.f32 %v7050_v27, %v8336_v10  ;;  %v7062_v34 = vadd.f32 %v8291_v49, %v8284_v46  ;;  %v7123_v36 = vadd.f32 %v8293_v50, %v8286_v47  ;;  %v7126_v39 = vadd.f32 %v8301_v54, %v8297_v52 }
 0x223   :  { %9234 = vst [vmem:[#allocation20_spill] sm:$0xff] %v8327_v4  ;;  %v8340_v4 = vpop.f32.mrf.mxu0  ;;  %v731_v19 = vadd.f32 %v7053_v35, %v8336_v10  ;;  %v7068_v41 = vadd.f32 %v8307_v57, %v8303_v55  ;;  %v9238_v49 = vmov 0.0|0.0   ;;  %v7129_v27 = vadd.f32 %v8309_v58, %v8305_v56  ;;  %v7489_v55 = vld [vmem:[#allocation5 + $0x254] ss:$8 sps:$4 sm:$0xff]  }
 0x224   :  { %v8331_v7 = vpop.f32.mrf.mxu1  ;;  %v823_v18 = vadd.f32 %v7114_v1, %v726_v9 }
 0x225   :  { %9236 = vst [vmem:[#allocation22_spill] sm:$0xff] %v8331_v7  ;;  %v707_v7 = vadd.f32 %v7035_v8, %v8336_v10  ;;  %v8346_v24 = vpop.f32.mrf.mxu0  ;;  %v7111_v8 = vadd.f32 %v8258_v33, %v8254_v31  ;;  %v750_v1 = vadd.f32 %v7068_v41, %v8336_v10  ;;  %v7495_v41 = vld [vmem:[#allocation5 + $0x234] ss:$8 sps:$4 sm:$0xff]  }
 0x226   :  { %v8338_v13 = vpop.f32.mrf.mxu1 }
 0x227   :  { %v804_v14 = vadd.f32 %v7099_v5, %v707_v7  ;;  %v8356_v7 = vpop.f32.mrf.mxu0  ;;  %v820_v48 = vadd.f32 %v7111_v8, %v723_v26  ;;  %v7071_v8 = vadd.f32 %v8315_v62, %v8311_v59  ;;  %v7132_v26 = vadd.f32 %v8317_v63, %v8313_v60  ;;  %v7487_v62 = vld [vmem:[#allocation5 + $0x250] ss:$8 sps:$4 sm:$0xff]   ;;  %v9241_v60 = vld [vmem:[#allocation17_spill] sm:$0xff]  ;;  %v9242_v63 = vld [vmem:[#allocation18_spill] sm:$0xff] }
 0x228   :  { %v7252_v6 = vpop.f32.mrf.mxu1  ;;  %v7074_v35 = vadd.f32 %v9242_v63, %v9241_v60  ;;  %v7499_v63 = vld [vmem:[#allocation5 + $0x210] ss:$8 sps:$4 sm:$0xff]  }
 0x229   :  { %v909_v21 = vadd.f32 %v7252_v6, %v812_v22  ;;  %v7140_v11 = vpop.f32.mrf.mxu0 }
 0x22a   :  { %v900_v20 = vpop.f32.mrf.mxu1  ;;  %v9239_v56 = vld [vmem:[#allocation20_spill] sm:$0xff] }
 0x22b   :  { %v901_v23 = vadd.f32 %v900_v20, %v804_v14  ;;  %v965_v28 = vmax.f32 %v909_v21, 0.0  ;;  %v7120_v20 = vadd.f32 %v8282_v45, %v8278_v43  ;;  %v9237_v14 = vmov 0.0   ;;  %v7142_v46 = vpop.f32.mrf.mxu0 }
 0x22c   :  { %v7253_v15 = vpop.f32.mrf.mxu1  ;;  %v7065_v43 = vadd.f32 %v8299_v53, %v8295_v51  ;;  %v739_v21 = vadd.f32 %v7059_v37, %v8336_v10  ;;  %v7481_v53 = vld [vmem:[#allocation5 + $0x260] ss:$8 sps:$4 sm:$0xff]   ;;  %v7077_v58 = vadd.f32 %v9239_v56, %v8325_v3  ;;  %v9243_v3 = vld [vmem:[#allocation19_spill] sm:$0xff] }
 0x22d   :  { %v912_v25 = vadd.f32 %v7253_v15, %v815_v16  ;;  %v963_v6 = vmax.f32 %v901_v23, 0.0  ;;  %v7475_v15 = vld [vmem:[#allocation5 + $0x270] ss:$8 sps:$4 sm:$0xff]   ;;  %v9240_v9 = vld [vmem:[#allocation22_spill] sm:$0xff]  ;;  %v9244_v37 = vld [vmem:[#allocation21_spill] sm:$0xff] }
 0x22e   :  { %v903_v29 = vpop.f32.mrf.mxu1  ;;  %v836_v52 = vadd.f32 %v7123_v36, %v739_v21  ;;  %v747_v57 = vadd.f32 %v7065_v43, %v8336_v10 }
 0x22f   :  { %v966_v2 = vmax.f32 %v912_v25, 0.0  ;;  %v904_v5 = vadd.f32 %v903_v29, %v807_v17  ;;  %v734_v17 = vadd.f32 %v7056_v32, %v8336_v10  ;;  %v742_v25 = vadd.f32 %v7062_v34, %v8336_v10 }
 0x230   :  { %v7256_v0 = vpop.f32.mrf.mxu1  ;;  %v828_v29 = vadd.f32 %v7117_v40, %v731_v19  ;;  %v763_v34 = vadd.f32 %v7077_v58, %v8336_v10  ;;  %v7553_v19 = vld [vmem:[%s9206_s7 + $0x160] ss:$8 sps:$4 sm:$0xff]  }
 0x231   :  { %v964_v61 = vmax.f32 %v904_v5, 0.0  ;;  %v980_v31 = vmax.f32 %v965_v28, %v966_v2  ;;  %v831_v23 = vadd.f32 %v7120_v20, %v734_v17  ;;  %v7143_v28 = vpop.f32.mrf.mxu0  ;;  %v844_v20 = vadd.f32 %v7129_v27, %v747_v57  ;;  %v7559_v57 = vld [vmem:[%s9206_s7 + $0x150] ss:$8 sps:$4 sm:$0xff]  }
 0x232   :  { %v916_v30 = vpop.f32.mrf.mxu1  ;;  %v925_v32 = vadd.f32 %v7256_v0, %v828_v29  ;;  %v7492_v0 = vld [vmem:[#allocation5 + $0x244] ss:$8 sps:$4 sm:$0xff]  }
 0x233   :  { %v979_v33 = vmax.f32 %v963_v6, %v964_v61  ;;  %v917_v22 = vadd.f32 %v916_v30, %v820_v48  ;;  %v839_v61 = vadd.f32 %v7126_v39, %v742_v25  ;;  %v7080_v30 = vadd.f32 %v8338_v13, %v9240_v9  ;;  %v7547_v48 = vld [vmem:[%s9206_s7 + $0x170] ss:$8 sps:$4 sm:$0xff]  }
 0x234   :  { %v7257_v12 = vpop.f32.mrf.mxu1  ;;  %v969_v17 = vmax.f32 %v925_v32, 0.0  ;;  %v7501_v32 = vld [vmem:[#allocation5 + $0x214] ss:$8 sps:$4 sm:$0xff]  }
 0x235   :  { %v987_v16 = vpack.c.bf16 %v979_v33, %v9237_v14  ;;  %v8369_v38 = vpack.c.bf16 %v980_v31, %v979_v33  ;;  %v967_v50 = vmax.f32 %v917_v22, 0.0  ;;  %v928_v2 = vadd.f32 %v7257_v12, %v831_v23 }
 0x236   :  { %v919_v42 = vpop.f32.mrf.mxu1  ;;  %v7135_v12 = vadd.f32 %v9244_v37, %v9243_v3  ;;  %v755_v22 = vadd.f32 %v7071_v8, %v8336_v10  ;;  %v7504_v3 = vld [vmem:[#allocation5 + $0x204] ss:$8 sps:$4 sm:$0xff]  }
 0x237   :  { %v920_v45 = vadd.f32 %v919_v42, %v823_v18  ;;  %1520 = vmatprep.mubr.bf16.mxu0 %v987_v16  ;;  %v7141_v18 = vadd.f32 %v7140_v11, %v8356_v7  ;;  %v7144_v16 = vadd.f32 %v7143_v28, %v7142_v46  ;;  %v7138_v7 = vadd.f32 %v8346_v24, %v8340_v4  ;;  %v7490_v42 = vld [vmem:[#allocation5 + $0x240] ss:$8 sps:$4 sm:$0xff]  }
 0x238   :  { %v8386_v47 = vpop.f32.mrf.mxu1  ;;  %1521 = vmatmul.mubr.bf16.vlgmr.msra.gmra.mxu0 %v9238_v49  ;;  %v847_v11 = vadd.f32 %v7132_v26, %v750_v1  ;;  %v758_v4 = vadd.f32 %v7074_v35, %v8336_v10  ;;  %v852_v21 = vadd.f32 %v7135_v12, %v755_v22  ;;  %v7498_v1 = vld [vmem:[#allocation5 + $0x224] ss:$8 sps:$4 sm:$0xff]   ;;  %v7496_v28 = vld [vmem:[#allocation5 + $0x220] ss:$8 sps:$4 sm:$0xff]   ;;  %v7565_v12 = vld [vmem:[%s9206_s7 + $0x130] ss:$8 sps:$4 sm:$0xff]  }
 0x239   :  { %v968_v51 = vmax.f32 %v920_v45, 0.0  ;;  %1635 = vmatpush1.bf16.msra.mxu0 %v7475_v15  ;;  %v970_v15 = vmax.f32 %v928_v2, 0.0  ;;  %v860_v24 = vadd.f32 %v7141_v18, %v763_v34  ;;  %v7502_v18 = vld [vmem:[#allocation5 + $0x200] ss:$8 sps:$4 sm:$0xff]   ;;  %v7510_v22 = vld [vmem:[%s9206_s7 + $0x64] ss:$8 sps:$4 sm:$0xff]  }
 0x23a   :  { %v932_v54 = vpop.f32.mrf.mxu1  ;;  %1636 = vmatprep.subr.bf16.mxu0 %v7483_v44  ;;  %v766_v44 = vadd.f32 %v7080_v30, %v8336_v10  ;;  %v855_v29 = vadd.f32 %v7138_v7, %v758_v4  ;;  %v7516_v34 = vld [vmem:[%s9206_s7 + $0x44] ss:$8 sps:$4 sm:$0xff]   ;;  %v7514_v7 = vld [vmem:[%s9206_s7 + $0x40] ss:$8 sps:$4 sm:$0xff]   ;;  %v7531_v4 = vld [vmem:[%s9206_s7 + $0xf4] ss:$8 sps:$4 sm:$0xff]  }
 0x23b   :  { %v8395_v5 = vmax.f32 %v967_v50, %v968_v51  ;;  %v933_v33 = vadd.f32 %v932_v54, %v836_v52  ;;  %v982_v46 = vmax.f32 %v969_v17, %v970_v15  ;;  %v7513_v15 = vld [vmem:[%s9206_s7 + $0x54] ss:$8 sps:$4 sm:$0xff]  }
 0x23c   :  { %v7261_v6 = vpop.f32.mrf.mxu1  ;;  %v863_v51 = vadd.f32 %v7144_v16, %v766_v44  ;;  %v7508_v16 = vld [vmem:[%s9206_s7 + $0x60] ss:$8 sps:$4 sm:$0xff]   ;;  %v7525_v17 = vld [vmem:[%s9206_s7 + $0x14] ss:$8 sps:$4 sm:$0xff]  }
 0x23d   :  { %1637 = vmatpush1.bf16.msra.mxu0 %v7481_v53  ;;  %v989_v59 = vpack.c.bf16 %v8395_v5, %v980_v31  ;;  %v7555_v31 = vld [vmem:[%s9206_s7 + $0x164] ss:$8 sps:$4 sm:$0xff]   ;;  %v971_v43 = vmax.f32 %v933_v33, 0.0  ;;  %v944_v50 = vadd.f32 %v7261_v6, %v847_v11  ;;  %v941_v53 = vadd.f32 %v8386_v47, %v844_v20  ;;  %v7567_v33 = vld [vmem:[%s9206_s7 + $0x134] ss:$8 sps:$4 sm:$0xff]  }
 0x23e   :  { %v935_v13 = vpop.f32.mrf.mxu1  ;;  %1638 = vmatprep.subr.bf16.mxu0 %v7489_v55  ;;  %v7493_v55 = vld [vmem:[#allocation5 + $0x230] ss:$8 sps:$4 sm:$0xff]   ;;  %v990_v2 = vpack.c.bf16 %v982_v46, %v8395_v5  ;;  %v7564_v47 = vld [vmem:[%s9206_s7 + $0x144] ss:$8 sps:$4 sm:$0xff]   ;;  %v7562_v5 = vld [vmem:[%s9206_s7 + $0x140] ss:$8 sps:$4 sm:$0xff]  }
 0x23f   :  { %v936_v40 = vadd.f32 %v935_v13, %v839_v61  ;;  %1530 = vmatprep.mubr.bf16.mxu0 %v989_v59  ;;  %1593 = vmatprep.mubr.bf16.mxu1 %v989_v59  ;;  %v974_v26 = vmax.f32 %v944_v50, 0.0  ;;  %v973_v6 = vmax.f32 %v941_v53, 0.0  ;;  %v8023_v20 = vmov 0   ;;  %v7507_v13 = vld [vmem:[%s9206_s7 + $0x74] ss:$8 sps:$4 sm:$0xff]  }
 0x240   :  { %v7264_v36 = vpop.f32.mrf.mxu1  ;;  %1531 = vmatmul.mubr.bf16.gmra.mxu0 %v8369_v38  ;;  %1594 = vmatmul.mubr.bf16.vlgmr.msra.gmra.mxu1 %v8369_v38  ;;  %v7561_v38 = vld [vmem:[%s9206_s7 + $0x154] ss:$8 sps:$4 sm:$0xff]   ;;  %v7520_v44 = vld [vmem:[%s9206_s7 + $0x20] ss:$8 sps:$4 sm:$0xff]   ;;  %v7535_v50 = vld [vmem:[%s9206_s7 + $0xd0] ss:$8 sps:$4 sm:$0xff]  }
 0x241   :  { %v972_v45 = vmax.f32 %v936_v40, 0.0  ;;  %1639 = vmatpush1.bf16.msra.mxu0 %v7487_v62  ;;  %2767 = vmatpush1.bf16.msra.mxu1 %v7547_v48  ;;  %v957_v25 = vadd.f32 %v7264_v36, %v860_v24  ;;  %v984_v59 = vmax.f32 %v973_v6, %v974_v26  ;;  %v7511_v40 = vld [vmem:[%s9206_s7 + $0x50] ss:$8 sps:$4 sm:$0xff]   ;;  %v7519_v11 = vld [vmem:[%s9206_s7 + $0x34] ss:$8 sps:$4 sm:$0xff]  }
 0x242   :  { %v948_v39 = vpop.f32.mrf.mxu1  ;;  %1640 = vmatprep.subr.bf16.mxu0 %v7492_v0  ;;  %2768 = vmatprep.subr.bf16.mxu1 %v7555_v31  ;;  %v7505_v0 = vld [vmem:[%s9206_s7 + $0x70] ss:$8 sps:$4 sm:$0xff]   ;;  %v7556_v6 = vld [vmem:[%s9206_s7 + $0x80] ss:$8 sps:$4 sm:$0xff]  }
 0x243   :  { %v983_v23 = vmax.f32 %v971_v43, %v972_v45  ;;  %v949_v10 = vadd.f32 %v948_v39, %v852_v21  ;;  %v977_v61 = vmax.f32 %v957_v25, 0.0  ;;  %v7517_v36 = vld [vmem:[%s9206_s7 + $0x30] ss:$8 sps:$4 sm:$0xff]   ;;  %v7528_v45 = vld [vmem:[%s9206_s7 + $0x4] ss:$8 sps:$4 sm:$0xff]  }
 0x244   :  { %v7265_v27 = vpop.f32.mrf.mxu1  ;;  %v7523_v43 = vld [vmem:[%s9206_s7 + $0x10] ss:$8 sps:$4 sm:$0xff]   ;;  %v7534_v21 = vld [vmem:[%s9206_s7 + $0xe4] ss:$8 sps:$4 sm:$0xff]   ;;  %v7532_v39 = vld [vmem:[%s9206_s7 + $0xe0] ss:$8 sps:$4 sm:$0xff]  }
 0x245   :  { %v960_v52 = vadd.f32 %v7265_v27, %v863_v51  ;;  %1641 = vmatpush1.bf16.msra.mxu0 %v7490_v42  ;;  %v991_v54 = vpack.c.bf16 %v983_v23, %v982_v46  ;;  %2769 = vmatpush1.bf16.msra.mxu1 %v7553_v19  ;;  %v975_v9 = vmax.f32 %v949_v10, 0.0  ;;  %v992_v35 = vpack.c.bf16 %v984_v59, %v983_v23  ;;  %v7522_v42 = vld [vmem:[%s9206_s7 + $0x24] ss:$8 sps:$4 sm:$0xff]   ;;  %v7526_v19 = vld [vmem:[%s9206_s7] ss:$8 sps:$4 sm:$0xff]  }
 0x246   :  { %v951_v8 = vpop.f32.mrf.mxu1  ;;  %1642 = vmatprep.subr.bf16.mxu0 %v7495_v41  ;;  %2770 = vmatprep.subr.bf16.mxu1 %v7561_v38  ;;  %v7529_v24 = vld [vmem:[%s9206_s7 + $0xf0] ss:$8 sps:$4 sm:$0xff]   ;;  %v7573_v41 = vld [vmem:[%s9206_s7 + $0x124] ss:$8 sps:$4 sm:$0xff]   ;;  %v7537_v38 = vld [vmem:[%s9206_s7 + $0xd4] ss:$8 sps:$4 sm:$0xff]  }
 0x247   :  { %v978_v56 = vmax.f32 %v960_v52, 0.0  ;;  %v952_v58 = vadd.f32 %v951_v8, %v855_v29  ;;  %1540 = vmatprep.mubr.bf16.mxu0 %v991_v54  ;;  %1603 = vmatprep.mubr.bf16.mxu1 %v991_v54  ;;  %v7571_v46 = vld [vmem:[%s9206_s7 + $0x120] ss:$8 sps:$4 sm:$0xff]   ;;  %v7579_v23 = vld [vmem:[%s9206_s7 + $0x114] ss:$8 sps:$4 sm:$0xff]  }
 0x248   :  { %1541 = vmatmul.mubr.bf16.gmra.mxu0 %v990_v2  ;;  %1604 = vmatmul.mubr.bf16.gmra.mxu1 %v990_v2  ;;  %v7540_v51 = vld [vmem:[%s9206_s7 + $0xc4] ss:$8 sps:$4 sm:$0xff]   ;;  %v7577_v53 = vld [vmem:[%s9206_s7 + $0x110] ss:$8 sps:$4 sm:$0xff]   ;;  %v7538_v25 = vld [vmem:[%s9206_s7 + $0xc0] ss:$8 sps:$4 sm:$0xff]  }
 0x249   :  { %v976_v30 = vmax.f32 %v952_v58, 0.0  ;;  %1643 = vmatpush1.bf16.msra.mxu0 %v7493_v55  ;;  %2771 = vmatpush1.bf16.msra.mxu1 %v7559_v57  ;;  %v986_v62 = vmax.f32 %v977_v61, %v978_v56  ;;  %v7585_v27 = vld [vmem:[%s9206_s7 + $0x104] ss:$8 sps:$4 sm:$0xff]   ;;  %v7543_v29 = vld [vmem:[%s9206_s7 + $0xb4] ss:$8 sps:$4 sm:$0xff]  }
 0x24a   :  { %1644 = vmatprep.subr.bf16.mxu0 %v7498_v1  ;;  %2772 = vmatprep.subr.bf16.mxu1 %v7564_v47  ;;  %v7583_v10 = vld [vmem:[%s9206_s7 + $0x100] ss:$8 sps:$4 sm:$0xff]   ;;  %v7541_v52 = vld [vmem:[%s9206_s7 + $0xb0] ss:$8 sps:$4 sm:$0xff]   ;;  %v7591_v54 = vld [vmem:[%s9206_s7 + $0x1f4] ss:$8 sps:$4 sm:$0xff]  }
 0x24b   :  { %v985_v48 = vmax.f32 %v975_v9, %v976_v30  ;;  %v995_v37 = vpack.c.bf16 %v9237_v14, %v986_v62  ;;  %v7546_v55 = vld [vmem:[%s9206_s7 + $0xa4] ss:$8 sps:$4 sm:$0xff]   ;;  %v7589_v57 = vld [vmem:[%s9206_s7 + $0x1f0] ss:$8 sps:$4 sm:$0xff]   ;;  %v7544_v8 = vld [vmem:[%s9206_s7 + $0xa0] ss:$8 sps:$4 sm:$0xff]  }
 0x24c   :  { %v7552_v1 = vld [vmem:[%s9206_s7 + $0x94] ss:$8 sps:$4 sm:$0xff]   ;;  %v7595_v47 = vld [vmem:[%s9206_s7 + $0x1e0] ss:$8 sps:$4 sm:$0xff]   ;;  %v7550_v26 = vld [vmem:[%s9206_s7 + $0x90] ss:$8 sps:$4 sm:$0xff]  }
 0x24d   :  { %1645 = vmatpush1.bf16.msra.mxu0 %v7496_v28  ;;  %v993_v60 = vpack.c.bf16 %v985_v48, %v984_v59  ;;  %2773 = vmatpush1.bf16.msra.mxu1 %v7562_v5  ;;  %v994_v31 = vpack.c.bf16 %v986_v62, %v985_v48  ;;  %v7603_v56 = vld [vmem:[%s9206_s7 + $0x1d4] ss:$8 sps:$4 sm:$0xff]   ;;  %v7558_v58 = vld [vmem:[%s9206_s7 + $0x84] ss:$8 sps:$4 sm:$0xff]   ;;  %v7601_v28 = vld [vmem:[%s9206_s7 + $0x1d0] ss:$8 sps:$4 sm:$0xff]  }
 0x24e   :  { %1646 = vmatprep.subr.bf16.mxu0 %v7501_v32  ;;  %2774 = vmatprep.subr.bf16.mxu1 %v7567_v33  ;;  %v7609_v61 = vld [vmem:[%s9206_s7 + $0x1c4] ss:$8 sps:$4 sm:$0xff]   ;;  %v7570_v9 = vld [vmem:[%s9206_s7 + $0x274] ss:$8 sps:$4 sm:$0xff]   ;;  %v7607_v30 = vld [vmem:[%s9206_s7 + $0x1c0] ss:$8 sps:$4 sm:$0xff]  }
 0x24f   :  { %1550 = vmatprep.mubr.bf16.mxu0 %v993_v60  ;;  %1613 = vmatprep.mubr.bf16.mxu1 %v993_v60  ;;  %v7568_v5 = vld [vmem:[%s9206_s7 + $0x270] ss:$8 sps:$4 sm:$0xff]   ;;  %v7615_v32 = vld [vmem:[%s9206_s7 + $0x1b4] ss:$8 sps:$4 sm:$0xff]   ;;  %v7576_v33 = vld [vmem:[%s9206_s7 + $0x264] ss:$8 sps:$4 sm:$0xff]  }
 0x250   :  { %1551 = vmatmul.mubr.bf16.gmra.mxu0 %v992_v35  ;;  %1614 = vmatmul.mubr.bf16.gmra.mxu1 %v992_v35  ;;  %v7613_v59 = vld [vmem:[%s9206_s7 + $0x1b0] ss:$8 sps:$4 sm:$0xff]   ;;  %v7574_v62 = vld [vmem:[%s9206_s7 + $0x260] ss:$8 sps:$4 sm:$0xff]   ;;  %v7621_v48 = vld [vmem:[%s9206_s7 + $0x1a4] ss:$8 sps:$4 sm:$0xff]  }
 0x251   :  { %1647 = vmatpush1.bf16.msra.mxu0 %v7499_v63  ;;  %1623 = vmatprep.mubr.bf16.mxu1 %v995_v37  ;;  %v7582_v60 = vld [vmem:[%s9206_s7 + $0x254] ss:$8 sps:$4 sm:$0xff]   ;;  %v7619_v63 = vld [vmem:[%s9206_s7 + $0x1a0] ss:$8 sps:$4 sm:$0xff]   ;;  %v7588_v37 = vld [vmem:[%s9206_s7 + $0x244] ss:$8 sps:$4 sm:$0xff]  }
 0x252   :  { %1648 = vmatprep.subr.bf16.mxu0 %v7504_v3  ;;  %1666 = vmatprep.mubr.bf16.mxu0 %v8023_v20  ;;  %v7627_v3 = vld [vmem:[%s9206_s7 + $0x194] ss:$8 sps:$4 sm:$0xff]  }
 0x253   :  { %2775 = vmatpush1.bf16.msra.mxu1 %v7565_v12  ;;  %v7625_v12 = vld [vmem:[%s9206_s7 + $0x190] ss:$8 sps:$4 sm:$0xff]  }
 0x254   :  { %2776 = vmatprep.subr.bf16.mxu1 %v7573_v41  ;;  %v7643_v41 = vld [vmem:[%s9206_s7 + $0x2a0] ss:$8 sps:$4 sm:$0xff]  }
 0x255   :  { %1649 = vmatpush1.bf16.msra.mxu0 %v7502_v18  ;;  %v7586_v18 = vld [vmem:[%s9206_s7 + $0x240] ss:$8 sps:$4 sm:$0xff]  }
 0x256   :  { %2713 = vmatprep.subr.bf16.mxu0 %v7507_v13  ;;  %v7594_v13 = vld [vmem:[%s9206_s7 + $0x234] ss:$8 sps:$4 sm:$0xff]  }
 0x257   :  { %2777 = vmatpush1.bf16.msra.mxu1 %v7571_v46  ;;  %v7649_v46 = vld [vmem:[%s9206_s7 + $0x290] ss:$8 sps:$4 sm:$0xff]  }
 0x258   :  { %1624 = vmatmul.mubr.bf16.gmra.mxu1 %v994_v31  ;;  %1667 = vmatmul.mubr.bf16.vlgmr.msra.gmra.mxu0 %v990_v2  ;;  %v7597_v2 = vld [vmem:[%s9206_s7 + $0x1e4] ss:$8 sps:$4 sm:$0xff]  }
 0x259   :  { %1676 = vmatprep.mubr.bf16.mxu0 %v8023_v20  ;;  %2714 = vmatpush1.bf16.msra.mxu0 %v7505_v0  ;;  %v7631_v0 = vld [vmem:[%s9206_s7 + $0x180] ss:$8 sps:$4 sm:$0xff]  }
 0x25a   :  { %2715 = vmatprep.subr.bf16.mxu0 %v7510_v22  ;;  %2778 = vmatprep.subr.bf16.mxu1 %v7579_v23  ;;  %v7642_v22 = vld [vmem:[%s9206_s7 + $0x374] ss:$8 sps:$4 sm:$0xff]   ;;  %v7655_v23 = vld [vmem:[%s9206_s7 + $0x280] ss:$8 sps:$4 sm:$0xff]  }
 0x25b   :  { %2779 = vmatpush1.bf16.msra.mxu1 %v7577_v53 }
 0x25c   :  { %2780 = vmatprep.subr.bf16.mxu1 %v7585_v27 }
 0x25d   :  { %2716 = vmatpush1.bf16.msra.mxu0 %v7508_v16  ;;  %v7600_v16 = vld [vmem:[%s9206_s7 + $0x224] ss:$8 sps:$4 sm:$0xff]  }
 0x25e   :  { %2717 = vmatprep.subr.bf16.mxu0 %v7513_v15  ;;  %v7598_v15 = vld [vmem:[%s9206_s7 + $0x220] ss:$8 sps:$4 sm:$0xff]  }
 0x25f   :  { %2781 = vmatpush1.bf16.msra.mxu1 %v7583_v10 }
 0x260   :  { %1677 = vmatmul.mubr.bf16.gmra.mxu0 %v992_v35  ;;  %2782 = vmatprep.subr.bf16.mxu1 %v7591_v54  ;;  %v7580_v35 = vld [vmem:[%s9206_s7 + $0x250] ss:$8 sps:$4 sm:$0xff]  }
 0x261   :  { %1686 = vmatprep.mubr.bf16.mxu0 %v8023_v20  ;;  %2718 = vmatpush1.bf16.msra.mxu0 %v7511_v40  ;;  %v7606_v40 = vld [vmem:[%s9206_s7 + $0x214] ss:$8 sps:$4 sm:$0xff]  }
 0x262   :  { %2719 = vmatprep.subr.bf16.mxu0 %v7516_v34  ;;  %v7604_v34 = vld [vmem:[%s9206_s7 + $0x210] ss:$8 sps:$4 sm:$0xff]  }
 0x263   :  { %2783 = vmatpush2.bf16.msra.mxu1 %v7589_v57 }
 0x264   :  { %2784 = vmatprep.subr.bf16.mxu1 %v7597_v2 }
 0x265   :  { %2720 = vmatpush1.bf16.msra.mxu0 %v7514_v7  ;;  %v7612_v7 = vld [vmem:[%s9206_s7 + $0x204] ss:$8 sps:$4 sm:$0xff]  }
 0x266   :  { %2721 = vmatprep.subr.bf16.mxu0 %v7519_v11  ;;  %v7610_v11 = vld [vmem:[%s9206_s7 + $0x200] ss:$8 sps:$4 sm:$0xff]  }
 0x267   :  { %2785 = vmatpush2.bf16.msra.mxu1 %v7595_v47  ;;  %v1078_v47 = vlaneseq }
 0x268   :  { %1687 = vmatmul.mubr.bf16.gmra.mxu0 %v994_v31  ;;  %2786 = vmatprep.subr.bf16.mxu1 %v7603_v56  ;;  %v7592_v31 = vld [vmem:[%s9206_s7 + $0x230] ss:$8 sps:$4 sm:$0xff]  }
 0x269   :  { %1696 = vmatprep.mubr.bf16.mxu0 %v8023_v20  ;;  %2722 = vmatpush1.bf16.msra.mxu0 %v7517_v36  ;;  %v7633_v20 = vld [vmem:[%s9206_s7 + $0x184] ss:$8 sps:$4 sm:$0xff]   ;;  %v7618_v36 = vld [vmem:[%s9206_s7 + $0x2f4] ss:$8 sps:$4 sm:$0xff]  }
 0x26a   :  { %2723 = vmatprep.subr.bf16.mxu0 %v7522_v42  ;;  %v7616_v42 = vld [vmem:[%s9206_s7 + $0x2f0] ss:$8 sps:$4 sm:$0xff]  }
 0x26b   :  { %2787 = vmatpush2.bf16.msra.mxu1 %v7601_v28 }
 0x26c   :  { %2788 = vmatprep.subr.bf16.mxu1 %v7609_v61 }
 0x26d   :  { %2724 = vmatpush1.bf16.msra.mxu0 %v7520_v44  ;;  %v7624_v44 = vld [vmem:[%s9206_s7 + $0x2e4] ss:$8 sps:$4 sm:$0xff]  }
 0x26e   :  { %2725 = vmatprep.subr.bf16.mxu0 %v7525_v17  ;;  %v7622_v17 = vld [vmem:[%s9206_s7 + $0x2e0] ss:$8 sps:$4 sm:$0xff]  }
 0x26f   :  { %2789 = vmatpush2.bf16.msra.mxu1 %v7607_v30 }
 0x270   :  { %1697 = vmatmul.mubr.bf16.gmra.mxu0 %v9238_v49  ;;  %2790 = vmatprep.subr.bf16.mxu1 %v7615_v32 }
 0x271   :  { %2726 = vmatpush1.bf16.msra.mxu0 %v7523_v43  ;;  %2745 = vmatprep.mubr.bf16.mxu0 %v9238_v49  ;;  %v7630_v43 = vld [vmem:[%s9206_s7 + $0x2d4] ss:$8 sps:$4 sm:$0xff]  }
 0x272   :  { %2727 = vmatprep.subr.bf16.mxu0 %v7528_v45  ;;  %v7628_v45 = vld [vmem:[%s9206_s7 + $0x2d0] ss:$8 sps:$4 sm:$0xff]  }
 0x273   :  { %2791 = vmatpush2.bf16.msra.mxu1 %v7613_v59 }
 0x274   :  { %2792 = vmatprep.subr.bf16.mxu1 %v7621_v48 }
 0x275   :  { %2728 = vmatpush1.bf16.msra.mxu0 %v7526_v19  ;;  %v7636_v19 = vld [vmem:[%s9206_s7 + $0x2c4] ss:$8 sps:$4 sm:$0xff]  }
 0x276   :  { %2729 = vmatprep.subr.bf16.mxu0 %v7531_v4  ;;  %v7634_v4 = vld [vmem:[%s9206_s7 + $0x2c0] ss:$8 sps:$4 sm:$0xff]  }
 0x277   :  { %2793 = vmatpush2.bf16.msra.mxu1 %v7619_v63 }
 0x278   :  { %2794 = vmatprep.subr.bf16.mxu1 %v7627_v3 }
 0x279   :  { %2730 = vmatpush2.bf16.msra.mxu0 %v7529_v24  ;;  %v7639_v24 = vld [vmem:[%s9206_s7 + $0x2b4] ss:$8 sps:$4 sm:$0xff]  }
 0x27a   :  { %2731 = vmatprep.subr.bf16.mxu0 %v7534_v21  ;;  %v7637_v21 = vld [vmem:[%s9206_s7 + $0x2b0] ss:$8 sps:$4 sm:$0xff]  }
 0x27b   :  { %2795 = vmatpush2.bf16.msra.mxu1 %v7625_v12 }
 0x27c   :  { %2796 = vmatprep.subr.bf16.mxu1 %v7633_v20 }
 0x27d   :  { %2732 = vmatpush2.bf16.msra.mxu0 %v7532_v39  ;;  %v7645_v39 = vld [vmem:[%s9206_s7 + $0x2a4] ss:$8 sps:$4 sm:$0xff]  }
 0x27e   :  { %2733 = vmatprep.subr.bf16.mxu0 %v7537_v38  ;;  %v7651_v38 = vld [vmem:[%s9206_s7 + $0x294] ss:$8 sps:$4 sm:$0xff]  }
 0x27f   :  { %2797 = vmatpush2.bf16.msra.mxu1 %v7631_v0 }
 0x280   :  { %2872 = vmatprep.subr.bf16.mxu1 %v7642_v22 }
 0x281   :  { %2734 = vmatpush2.bf16.msra.mxu0 %v7535_v50  ;;  %v7657_v50 = vld [vmem:[%s9206_s7 + $0x284] ss:$8 sps:$4 sm:$0xff]  }
 0x282   :  { %2735 = vmatprep.subr.bf16.mxu0 %v7540_v51  ;;  %v7666_v51 = vld [vmem:[%s9206_s7 + $0x474] ss:$8 sps:$4 sm:$0xff]  }
 0x285   :  { %2736 = vmatpush2.bf16.msra.mxu0 %v7538_v25 }
 0x286   :  { %2737 = vmatprep.subr.bf16.mxu0 %v7543_v29 }
 0x289   :  { %2738 = vmatpush2.bf16.msra.mxu0 %v7541_v52 }
 0x28a   :  { %2739 = vmatprep.subr.bf16.mxu0 %v7546_v55 }
 0x28d   :  { %2740 = vmatpush2.bf16.msra.mxu0 %v7544_v8 }
 0x28e   :  { %2741 = vmatprep.subr.bf16.mxu0 %v7552_v1 }
 0x291   :  { %2742 = vmatpush2.bf16.msra.mxu0 %v7550_v26 }
 0x292   :  { %2743 = vmatprep.subr.bf16.mxu0 %v7558_v58 }
 0x295   :  { %2744 = vmatpush2.bf16.msra.mxu0 %v7556_v6  ;;  %v8719_v6 = vshrl.u32 %v1078_v47, 7 }
 0x296   :  { %2819 = vmatprep.subr.bf16.mxu0 %v7570_v9 }
 0x297   :  { %v8734_v59 = vsub.s32 1, %v8719_v6 }
 0x298   :  { %2746 = vmatmul.mubr.bf16.vlgmr.msra.gmra.mxu0 %v9238_v49 }
 0x299   :  { %2820 = vmatpush1.bf16.msra.mxu0 %v7568_v5  ;;  %v8726_v5 = vsub.s32 0, %v8719_v6 }
 0x29a   :  { %2821 = vmatprep.subr.bf16.mxu0 %v7576_v33  ;;  %v1076_v33 = vld [vmem:[%s9205_s6] sm:$0x3] }
 0x29d   :  { %2822 = vmatpush1.bf16.msra.mxu0 %v7574_v62 }
 0x29e   :  { %2823 = vmatprep.subr.bf16.mxu0 %v7582_v60  ;;  %v8739_v60 = vrot.slane %v1076_v33, %v8726_v5 }
 0x2a1   :  { %2824 = vmatpush1.bf16.msra.mxu0 %v7580_v35  ;;  %v8744_v35 = vrot.slane %v1076_v33, %v8734_v59 }
 0x2a2   :  { %2825 = vmatprep.subr.bf16.mxu0 %v7588_v37 }
 0x2a5   :  { %2826 = vmatpush1.bf16.msra.mxu0 %v7586_v18 }
 0x2a6   :  { %2827 = vmatprep.subr.bf16.mxu0 %v7594_v13 }
 0x2a9   :  { %2828 = vmatpush1.bf16.msra.mxu0 %v7592_v31 }
 0x2aa   :  { %2829 = vmatprep.subr.bf16.mxu0 %v7600_v16 }
 0x2ad   :  { %2830 = vmatpush1.bf16.msra.mxu0 %v7598_v15 }
 0x2ae   :  { %2831 = vmatprep.subr.bf16.mxu0 %v7606_v40 }
 0x2b1   :  { %2832 = vmatpush1.bf16.msra.mxu0 %v7604_v34 }
 0x2b2   :  { %2833 = vmatprep.subr.bf16.mxu0 %v7612_v7 }
 0x2b5   :  { %2834 = vmatpush1.bf16.msra.mxu0 %v7610_v11 }
 0x2b6   :  { %2835 = vmatprep.subr.bf16.mxu0 %v7618_v36 }
 0x2b9   :  { %2836 = vmatpush2.bf16.msra.mxu0 %v7616_v42 }
 0x2ba   :  { %2837 = vmatprep.subr.bf16.mxu0 %v7624_v44 }
 0x2bd   :  { %2838 = vmatpush2.bf16.msra.mxu0 %v7622_v17 }
 0x2be   :  { %2839 = vmatprep.subr.bf16.mxu0 %v7630_v43 }
 0x2c1   :  { %2840 = vmatpush2.bf16.msra.mxu0 %v7628_v45 }
 0x2c2   :  { %2841 = vmatprep.subr.bf16.mxu0 %v7636_v19 }
 0x2c5   :  { %2842 = vmatpush2.bf16.msra.mxu0 %v7634_v4 }
 0x2c6   :  { %2843 = vmatprep.subr.bf16.mxu0 %v7639_v24 }
 0x2c9   :  { %2844 = vmatpush2.bf16.msra.mxu0 %v7637_v21 }
 0x2ca   :  { %2845 = vmatprep.subr.bf16.mxu0 %v7645_v39 }
 0x2cd   :  { %2846 = vmatpush2.bf16.msra.mxu0 %v7643_v41 }
 0x2ce   :  { %2847 = vmatprep.subr.bf16.mxu0 %v7651_v38 }
 0x2d1   :  { %2848 = vmatpush2.bf16.msra.mxu0 %v7649_v46 }
 0x2d2   :  { %2849 = vmatprep.subr.bf16.mxu0 %v7657_v50 }
 0x2d5   :  { %2850 = vmatpush2.bf16.msra.mxu0 %v7655_v23 }
 0x2d6   :  { %2925 = vmatprep.subr.bf16.mxu0 %v7666_v51 }
 0x2f8   :  { %v1522_v53 = vpop.f32.mrf.mxu0 }
 0x2f9   :  { %v1523_v12 = vadd.f32 %v1522_v53, %v8739_v60 }
 0x2fa   :  { %v1524_v25 = vpop.f32.mrf.mxu0 }
 0x2fb   :  { %v1525_v20 = vadd.f32 %v1524_v25, %v8744_v35 }
 0x2fc   :  { %v1526_v27 = vpop.f32.mrf.mxu0 }
 0x2fd   :  { %v1527_v13 = vadd.f32 %v1526_v27, %v8739_v60 }
 0x2fe   :  { %v1528_v29 = vpop.f32.mrf.mxu0 }
 0x2ff   :  { %v1529_v16 = vadd.f32 %v1528_v29, %v8744_v35 }
 0x300   :  { %v1532_v10 = vpop.f32.mrf.mxu0  ;;  %v1595_v52 = vpop.f32.mrf.mxu1 }
 0x301   :  { %v1596_v0 = vadd.f32 %v1595_v52, %v1523_v12  ;;  %v1533_v19 = vadd.f32 %v1532_v10, %v8739_v60 }
 0x302   :  { %v1534_v54 = vpop.f32.mrf.mxu0  ;;  %v1597_v55 = vpop.f32.mrf.mxu1 }
 0x303   :  { %v1598_v15 = vadd.f32 %v1597_v55, %v1525_v20  ;;  %v1535_v21 = vadd.f32 %v1534_v54, %v8744_v35 }
 0x304   :  { %v1536_v57 = vpop.f32.mrf.mxu0  ;;  %v1599_v8 = vpop.f32.mrf.mxu1 }
 0x305   :  { %v1600_v40 = vadd.f32 %v1599_v8, %v1527_v13  ;;  %v1537_v39 = vadd.f32 %v1536_v57, %v8739_v60  ;;  %v7640_v57 = vld [vmem:[%s9206_s7 + $0x370] ss:$8 sps:$4 sm:$0xff]  }
 0x306   :  { %v1538_v2 = vpop.f32.mrf.mxu0  ;;  %v1601_v1 = vpop.f32.mrf.mxu1 }
 0x307   :  { %v1602_v11 = vadd.f32 %v1601_v1, %v1529_v16  ;;  %v1539_v53 = vadd.f32 %v1538_v2, %v8744_v35  ;;  %v7648_v2 = vld [vmem:[%s9206_s7 + $0x364] ss:$8 sps:$4 sm:$0xff]   ;;  %v7646_v16 = vld [vmem:[%s9206_s7 + $0x360] ss:$8 sps:$4 sm:$0xff]  }
 0x308   :  { %v8715_v26 = vpop.f32.mrf.mxu0  ;;  %v1605_v56 = vpop.f32.mrf.mxu1 }
 0x309   :  { %v1606_v46 = vadd.f32 %v1605_v56, %v1533_v19 }
 0x30a   :  { %v8717_v58 = vpop.f32.mrf.mxu0  ;;  %v1607_v28 = vpop.f32.mrf.mxu1 }
 0x30b   :  { %v1608_v25 = vadd.f32 %v1607_v28, %v1535_v21  ;;  %v1545_v20 = vadd.f32 %v8717_v58, %v8744_v35 }
 0x30c   :  { %v8721_v61 = vpop.f32.mrf.mxu0  ;;  %v1609_v9 = vpop.f32.mrf.mxu1 }
 0x30d   :  { %v1610_v27 = vadd.f32 %v1609_v9, %v1537_v39  ;;  %v1547_v13 = vadd.f32 %v8721_v61, %v8739_v60 }
 0x30e   :  { %v8723_v30 = vpop.f32.mrf.mxu0  ;;  %v1611_v62 = vpop.f32.mrf.mxu1 }
 0x30f   :  { %v1612_v10 = vadd.f32 %v1611_v62, %v1539_v53  ;;  %v1543_v62 = vadd.f32 %v8715_v26, %v8739_v60  ;;  %v1549_v58 = vadd.f32 %v8723_v30, %v8744_v35  ;;  %v7660_v30 = vld [vmem:[%s9206_s7 + $0x344] ss:$8 sps:$4 sm:$0xff]  }
 0x310   :  { %v8728_v32 = vpop.f32.mrf.mxu0  ;;  %v1615_v3 = vpop.f32.mrf.mxu1 }
 0x312   :  { %v8736_v48 = vpop.f32.mrf.mxu0  ;;  %v1617_v31 = vpop.f32.mrf.mxu1 }
 0x313   :  { %v1618_v61 = vadd.f32 %v1617_v31, %v1545_v20 }
 0x314   :  { %v8741_v63 = vpop.f32.mrf.mxu0  ;;  %v1619_v44 = vpop.f32.mrf.mxu1 }
 0x316   :  { %v8746_v37 = vpop.f32.mrf.mxu0  ;;  %v1621_v50 = vpop.f32.mrf.mxu1 }
 0x318   :  { %v1668_v18 = vpop.f32.mrf.mxu0  ;;  %v1625_v47 = vpop.f32.mrf.mxu1 }
 0x319   :  { %v1669_v34 = vadd.f32 %v1668_v18, %v1596_v0 }
 0x31a   :  { %v1670_v22 = vpop.f32.mrf.mxu0 }
 0x31b   :  { %v1671_v36 = vadd.f32 %v1670_v22, %v1598_v15  ;;  %v1707_v4 = vmax.f32 %v1669_v34, 0.0  ;;  %v1616_v15 = vadd.f32 %v1615_v3, %v1543_v62 }
 0x31c   :  { %v1672_v7 = vpop.f32.mrf.mxu0 }
 0x31d   :  { %v1673_v42 = vadd.f32 %v1672_v7, %v1600_v40  ;;  %v1708_v41 = vmax.f32 %v1671_v36, 0.0  ;;  %v1627_v40 = vpop.f32.mrf.mxu1  ;;  %v7654_v7 = vld [vmem:[%s9206_s7 + $0x354] ss:$8 sps:$4 sm:$0xff]  }
 0x31e   :  { %v1674_v17 = vpop.f32.mrf.mxu0 }
 0x31f   :  { %v1709_v43 = vmax.f32 %v1673_v42, 0.0  ;;  %v1675_v45 = vadd.f32 %v1674_v17, %v1602_v11  ;;  %v1620_v11 = vadd.f32 %v1619_v44, %v1547_v13 }
 0x320   :  { %v1678_v24 = vpop.f32.mrf.mxu0 }
 0x321   :  { %v1710_v38 = vmax.f32 %v1675_v45, 0.0  ;;  %v1723_v23 = vmax.f32 %v1707_v4, %v1709_v43  ;;  %v1679_v52 = vadd.f32 %v1678_v24, %v1606_v46  ;;  %v1622_v43 = vadd.f32 %v1621_v50, %v1549_v58  ;;  %v7652_v4 = vld [vmem:[%s9206_s7 + $0x350] ss:$8 sps:$4 sm:$0xff]   ;;  %v1629_v24 = vpop.f32.mrf.mxu1 }
 0x322   :  { %v1680_v51 = vpop.f32.mrf.mxu0  ;;  %v1555_v50 = vadd.f32 %v8736_v48, %v8744_v35  ;;  %v7663_v48 = vld [vmem:[%s9206_s7 + $0x334] ss:$8 sps:$4 sm:$0xff]   ;;  %v7676_v58 = vld [vmem:[%s9206_s7 + $0x450] ss:$8 sps:$4 sm:$0xff]  }
 0x323   :  { %v1724_v29 = vmax.f32 %v1708_v41, %v1710_v38  ;;  %v1681_v8 = vadd.f32 %v1680_v51, %v1608_v25  ;;  %v1731_v56 = vpack.c.bf16 %v1723_v23, %v9237_v14  ;;  %v1711_v12 = vmax.f32 %v1679_v52, 0.0  ;;  %v7658_v25 = vld [vmem:[%s9206_s7 + $0x340] ss:$8 sps:$4 sm:$0xff]  }
 0x324   :  { %v1682_v55 = vpop.f32.mrf.mxu0  ;;  %v1553_v41 = vadd.f32 %v8728_v32, %v8739_v60  ;;  %v1557_v51 = vadd.f32 %v8741_v63, %v8739_v60  ;;  %v1559_v60 = vadd.f32 %v8746_v37, %v8744_v35  ;;  %v1628_v63 = vadd.f32 %v1627_v40, %v1555_v50  ;;  %v7669_v37 = vld [vmem:[%s9206_s7 + $0x324] ss:$8 sps:$4 sm:$0xff]   ;;  %v7678_v40 = vld [vmem:[%s9206_s7 + $0x454] ss:$8 sps:$4 sm:$0xff]   ;;  %v7703_v50 = vld [vmem:[%s9206_s7 + $0x3c0] ss:$8 sps:$4 sm:$0xff]  }
 0x325   :  { %v1683_v1 = vadd.f32 %v1682_v55, %v1610_v27  ;;  %v1732_v54 = vpack.c.bf16 %v1724_v29, %v9237_v14  ;;  %v1712_v0 = vmax.f32 %v1681_v8, 0.0 }
 0x326   :  { %v1684_v33 = vpop.f32.mrf.mxu0  ;;  %v1626_v27 = vadd.f32 %v1625_v47, %v1553_v41  ;;  %v1630_v55 = vadd.f32 %v1629_v24, %v1557_v51  ;;  %v7696_v24 = vld [vmem:[%s9206_s7 + $0x424] ss:$8 sps:$4 sm:$0xff]   ;;  %v7700_v41 = vld [vmem:[%s9206_s7 + $0x410] ss:$8 sps:$4 sm:$0xff]   ;;  %v7706_v51 = vld [vmem:[%s9206_s7 + $0x400] ss:$8 sps:$4 sm:$0xff]  }
 0x327   :  { %v1713_v28 = vmax.f32 %v1683_v1, 0.0  ;;  %v1685_v9 = vadd.f32 %v1684_v33, %v1612_v10  ;;  %2798 = vmatprep.mubr.bf16.mxu1 %v1732_v54  ;;  %v7661_v33 = vld [vmem:[%s9206_s7 + $0x330] ss:$8 sps:$4 sm:$0xff]  }
 0x328   :  { %v1688_v18 = vpop.f32.mrf.mxu0  ;;  %2799 = vmatmul.mubr.bf16.vlgmr.msra.gmra.mxu1 %v1731_v56 }
 0x329   :  { %v1714_v22 = vmax.f32 %v1685_v9, 0.0  ;;  %2873 = vmatpush1.bf16.msra.mxu1 %v7640_v57  ;;  %v1725_v34 = vmax.f32 %v1711_v12, %v1713_v28  ;;  %v1689_v42 = vadd.f32 %v1688_v18, %v1616_v15  ;;  %v7672_v12 = vld [vmem:[%s9206_s7 + $0x464] ss:$8 sps:$4 sm:$0xff]   ;;  %v7675_v15 = vld [vmem:[%s9206_s7 + $0x314] ss:$8 sps:$4 sm:$0xff]  }
 0x32a   :  { %v1690_v26 = vpop.f32.mrf.mxu0  ;;  %2874 = vmatprep.subr.bf16.mxu1 %v7648_v2  ;;  %v7664_v2 = vld [vmem:[%s9206_s7 + $0x470] ss:$8 sps:$4 sm:$0xff]  }
 0x32b   :  { %v1726_v36 = vmax.f32 %v1712_v0, %v1714_v22  ;;  %v1691_v45 = vadd.f32 %v1690_v26, %v1618_v61  ;;  %v1733_v39 = vpack.c.bf16 %v1725_v34, %v1723_v23  ;;  %v1715_v38 = vmax.f32 %v1689_v42, 0.0  ;;  %v7667_v0 = vld [vmem:[%s9206_s7 + $0x320] ss:$8 sps:$4 sm:$0xff]  }
 0x32c   :  { %v1692_v17 = vpop.f32.mrf.mxu0  ;;  %v7670_v22 = vld [vmem:[%s9206_s7 + $0x460] ss:$8 sps:$4 sm:$0xff]  }
 0x32d   :  { %v1693_v19 = vadd.f32 %v1692_v17, %v1620_v11  ;;  %2875 = vmatpush1.bf16.msra.mxu1 %v7646_v16  ;;  %v1734_v3 = vpack.c.bf16 %v1726_v36, %v1724_v29  ;;  %v1716_v23 = vmax.f32 %v1691_v45, 0.0  ;;  %v1631_v29 = vpop.f32.mrf.mxu1  ;;  %v7681_v11 = vld [vmem:[%s9206_s7 + $0x304] ss:$8 sps:$4 sm:$0xff]   ;;  %v7679_v42 = vld [vmem:[%s9206_s7 + $0x300] ss:$8 sps:$4 sm:$0xff]  }
 0x32e   :  { %v1694_v21 = vpop.f32.mrf.mxu0  ;;  %2876 = vmatprep.subr.bf16.mxu1 %v7654_v7  ;;  %v1632_v54 = vadd.f32 %v1631_v29, %v1559_v60  ;;  %v7673_v7 = vld [vmem:[%s9206_s7 + $0x310] ss:$8 sps:$4 sm:$0xff]   ;;  %v7682_v17 = vld [vmem:[%s9206_s7 + $0x440] ss:$8 sps:$4 sm:$0xff]   ;;  %v7690_v45 = vld [vmem:[%s9206_s7 + $0x434] ss:$8 sps:$4 sm:$0xff]  }
 0x32f   :  { %v1717_v31 = vmax.f32 %v1693_v19, 0.0  ;;  %v1695_v44 = vadd.f32 %v1694_v21, %v1622_v43  ;;  %2755 = vmatprep.mubr.bf16.mxu0 %v1734_v3  ;;  %v7687_v43 = vld [vmem:[%s9206_s7 + $0x3f4] ss:$8 sps:$4 sm:$0xff]   ;;  %v7685_v19 = vld [vmem:[%s9206_s7 + $0x3f0] ss:$8 sps:$4 sm:$0xff]  }
 0x330   :  { %v1698_v46 = vpop.f32.mrf.mxu0  ;;  %2756 = vmatmul.mubr.bf16.gmra.mxu0 %v1733_v39  ;;  %v7691_v21 = vld [vmem:[%s9206_s7 + $0x3e0] ss:$8 sps:$4 sm:$0xff]   ;;  %v7717_v29 = vld [vmem:[%s9206_s7 + $0x3a4] ss:$8 sps:$4 sm:$0xff]   ;;  %v7723_v60 = vld [vmem:[%s9206_s7 + $0x394] ss:$8 sps:$4 sm:$0xff]  }
 0x331   :  { %v1718_v53 = vmax.f32 %v1695_v44, 0.0  ;;  %2877 = vmatpush1.bf16.msra.mxu1 %v7652_v4  ;;  %2851 = vmatprep.mubr.bf16.mxu0 %v1734_v3  ;;  %v1727_v32 = vmax.f32 %v1715_v38, %v1717_v31  ;;  %v1699_v8 = vadd.f32 %v1698_v46, %v1626_v27  ;;  %v7688_v3 = vld [vmem:[%s9206_s7 + $0x430] ss:$8 sps:$4 sm:$0xff]   ;;  %v7693_v4 = vld [vmem:[%s9206_s7 + $0x3e4] ss:$8 sps:$4 sm:$0xff]  }
 0x332   :  { %v1700_v52 = vpop.f32.mrf.mxu0  ;;  %2878 = vmatprep.subr.bf16.mxu1 %v7660_v30  ;;  %v7699_v30 = vld [vmem:[%s9206_s7 + $0x3d4] ss:$8 sps:$4 sm:$0xff]   ;;  %v7697_v44 = vld [vmem:[%s9206_s7 + $0x3d0] ss:$8 sps:$4 sm:$0xff]   ;;  %v7705_v38 = vld [vmem:[%s9206_s7 + $0x3c4] ss:$8 sps:$4 sm:$0xff]  }
 0x333   :  { %v1728_v10 = vmax.f32 %v1716_v23, %v1718_v53  ;;  %v1701_v57 = vadd.f32 %v1700_v52, %v1628_v63  ;;  %v8804_v35 = vpack.c.bf16 %v1727_v32, %v1725_v34  ;;  %v1719_v18 = vmax.f32 %v1699_v8, 0.0  ;;  %v7702_v31 = vld [vmem:[%s9206_s7 + $0x414] ss:$8 sps:$4 sm:$0xff]   ;;  %v7708_v46 = vld [vmem:[%s9206_s7 + $0x404] ss:$8 sps:$4 sm:$0xff]  }
 0x334   :  { %v1702_v1 = vpop.f32.mrf.mxu0  ;;  %v7711_v23 = vld [vmem:[%s9206_s7 + $0x3b4] ss:$8 sps:$4 sm:$0xff]   ;;  %v7712_v27 = vld [vmem:[%s9206_s7 + $0x4f0] ss:$8 sps:$4 sm:$0xff]   ;;  %v7715_v52 = vld [vmem:[%s9206_s7 + $0x3a0] ss:$8 sps:$4 sm:$0xff]  }
 0x335   :  { %v1703_v56 = vadd.f32 %v1702_v1, %v1630_v55  ;;  %2879 = vmatpush1.bf16.msra.mxu1 %v7658_v25  ;;  %v1736_v47 = vpack.c.bf16 %v1728_v10, %v1726_v36  ;;  %v1720_v20 = vmax.f32 %v1701_v57, 0.0  ;;  %v7684_v36 = vld [vmem:[%s9206_s7 + $0x444] ss:$8 sps:$4 sm:$0xff]   ;;  %v7714_v53 = vld [vmem:[%s9206_s7 + $0x4f4] ss:$8 sps:$4 sm:$0xff]  }
 0x336   :  { %v1704_v28 = vpop.f32.mrf.mxu0  ;;  %2880 = vmatprep.subr.bf16.mxu1 %v7663_v48  ;;  %v7709_v25 = vld [vmem:[%s9206_s7 + $0x3b0] ss:$8 sps:$4 sm:$0xff]   ;;  %v7718_v48 = vld [vmem:[%s9206_s7 + $0x4e0] ss:$8 sps:$4 sm:$0xff]   ;;  %v7726_v63 = vld [vmem:[%s9206_s7 + $0x4d4] ss:$8 sps:$4 sm:$0xff]  }
 0x337   :  { %v1721_v9 = vmax.f32 %v1703_v56, 0.0  ;;  %v1705_v62 = vadd.f32 %v1704_v28, %v1632_v54  ;;  %2808 = vmatprep.mubr.bf16.mxu1 %v1736_v47  ;;  %v7721_v55 = vld [vmem:[%s9206_s7 + $0x390] ss:$8 sps:$4 sm:$0xff]   ;;  %v7729_v8 = vld [vmem:[%s9206_s7 + $0x384] ss:$8 sps:$4 sm:$0xff]  }
 0x338   :  { %2809 = vmatmul.mubr.bf16.gmra.mxu1 %v8804_v35  ;;  %2852 = vmatmul.mubr.bf16.vlgmr.msra.gmra.mxu0 %v1733_v39  ;;  %v7694_v39 = vld [vmem:[%s9206_s7 + $0x420] ss:$8 sps:$4 sm:$0xff]   ;;  %v7732_v1 = vld [vmem:[%s9206_s7 + $0x4c4] ss:$8 sps:$4 sm:$0xff]   ;;  %v7735_v56 = vld [vmem:[%s9206_s7 + $0x4b4] ss:$8 sps:$4 sm:$0xff]  }
 0x339   :  { %v1722_v13 = vmax.f32 %v1705_v62, 0.0  ;;  %2881 = vmatpush1.bf16.msra.mxu1 %v7661_v33  ;;  %2926 = vmatpush1.bf16.msra.mxu0 %v7664_v2  ;;  %v8819_v16 = vmax.f32 %v1719_v18, %v1721_v9  ;;  %v7727_v54 = vld [vmem:[%s9206_s7 + $0x380] ss:$8 sps:$4 sm:$0xff]   ;;  %v7738_v33 = vld [vmem:[%s9206_s7 + $0x4a4] ss:$8 sps:$4 sm:$0xff]  }
 0x33a   :  { %2904 = vmatprep.mubr.bf16.mxu1 %v1736_v47  ;;  %2882 = vmatprep.subr.bf16.mxu1 %v7669_v37  ;;  %v7730_v57 = vld [vmem:[%s9206_s7 + $0x4c0] ss:$8 sps:$4 sm:$0xff]   ;;  %v7733_v47 = vld [vmem:[%s9206_s7 + $0x4b0] ss:$8 sps:$4 sm:$0xff]   ;;  %v7741_v37 = vld [vmem:[%s9206_s7 + $0x494] ss:$8 sps:$4 sm:$0xff]  }
 0x33b   :  { %v8827_v34 = vmax.f32 %v1720_v20, %v1722_v13  ;;  %2927 = vmatprep.subr.bf16.mxu0 %v7672_v12  ;;  %v8837_v61 = vpack.c.bf16 %v8819_v16, %v1727_v32  ;;  %v7720_v32 = vld [vmem:[%s9206_s7 + $0x4e4] ss:$8 sps:$4 sm:$0xff]   ;;  %v7736_v28 = vld [vmem:[%s9206_s7 + $0x4a0] ss:$8 sps:$4 sm:$0xff]   ;;  %v7739_v9 = vld [vmem:[%s9206_s7 + $0x490] ss:$8 sps:$4 sm:$0xff]   ;;  %v1739_v62 = vpack.c.bf16 %v9237_v14, %v8819_v16 }
 0x33c   :  { %v7742_v12 = vld [vmem:[%s9206_s7 + $0x480] ss:$8 sps:$4 sm:$0xff]  }
 0x33d   :  { %2883 = vmatpush1.bf16.msra.mxu1 %v7667_v0  ;;  %2928 = vmatpush1.bf16.msra.mxu0 %v7670_v22  ;;  %v1738_v26 = vpack.c.bf16 %v8827_v34, %v1728_v10  ;;  %v7724_v10 = vld [vmem:[%s9206_s7 + $0x4d0] ss:$8 sps:$4 sm:$0xff]   ;;  %v1740_v2 = vpack.c.bf16 %v9237_v14, %v8827_v34  ;;  %v3046_v14 = vld [vmem:[#allocation7 + $0x1c0] sm:$0xff]  ;;  %v3047_v20 = vld [vmem:[#allocation7 + $0x1c8] sm:$0xff] }
 0x33e   :  { %2884 = vmatprep.subr.bf16.mxu1 %v7675_v15  ;;  %2929 = vmatprep.subr.bf16.mxu0 %v7678_v40  ;;  %v3050_v18 = vld [vmem:[#allocation7 + $0x1e0] sm:$0xff]  ;;  %v3051_v0 = vld [vmem:[#allocation7 + $0x1e8] sm:$0xff] }
 0x33f   :  { %2861 = vmatprep.mubr.bf16.mxu0 %v1738_v26  ;;  %v6657_v13 = vcombine.high %v3046_v14, %v3050_v18  ;;  %v6656_v22 = vcombine.low %v3046_v14, %v3050_v18  ;;  %v6658_v16 = vcombine.low %v3047_v20, %v3051_v0  ;;  %v6659_v15 = vcombine.high %v3047_v20, %v3051_v0  ;;  %v3038_v40 = vld [vmem:[#allocation7 + $0x180] sm:$0xff]  ;;  %v3115_v0 = vld [vmem:[#allocation7 + $0x3e8] sm:$0xff] }
 0x340   :  { %2862 = vmatmul.mubr.bf16.gmra.mxu0 %v8837_v61  ;;  %v3042_v34 = vld [vmem:[#allocation7 + $0x1a0] sm:$0xff] }
 0x341   :  { %2885 = vmatpush1.bf16.msra.mxu1 %v7673_v7  ;;  %2930 = vmatpush1.bf16.msra.mxu0 %v7676_v58  ;;  %v6648_v7 = vcombine.low %v3038_v40, %v3042_v34  ;;  %v6649_v58 = vcombine.high %v3038_v40, %v3042_v34  ;;  %v3110_v18 = vld [vmem:[#allocation7 + $0x3c0] sm:$0xff] }
 0x342   :  { %2957 = vmatprep.mubr.bf16.mxu0 %v1738_v26  ;;  %2886 = vmatprep.subr.bf16.mxu1 %v7681_v11  ;;  %v3039_v26 = vld [vmem:[#allocation7 + $0x188] sm:$0xff]  ;;  %v3030_v11 = vld [vmem:[#allocation7 + $0x140] sm:$0xff] }
 0x343   :  { %2931 = vmatprep.subr.bf16.mxu0 %v7684_v36  ;;  %v3114_v20 = vld [vmem:[#allocation7 + $0x3e0] sm:$0xff] }
 0x344   :  { %v6720_v34 = vcombine.low %v3110_v18, %v3114_v20 }
 0x345   :  { %2887 = vmatpush1.bf16.msra.mxu1 %v7679_v42  ;;  %2932 = vmatpush1.bf16.msra.mxu0 %v7682_v17 }
 0x346   :  { %2888 = vmatprep.subr.bf16.mxu1 %v7687_v43  ;;  %2933 = vmatprep.subr.bf16.mxu0 %v7690_v45  ;;  %v3031_v43 = vld [vmem:[#allocation7 + $0x148] sm:$0xff] }
 0x347   :  { %v3035_v45 = vld [vmem:[#allocation7 + $0x168] sm:$0xff] }
 0x349   :  { %2889 = vmatpush2.bf16.msra.mxu1 %v7685_v19  ;;  %2934 = vmatpush1.bf16.msra.mxu0 %v7688_v3  ;;  %v3022_v19 = vld [vmem:[#allocation7 + $0x100] sm:$0xff]  ;;  %v6643_v3 = vcombine.high %v3031_v43, %v3035_v45 }
 0x34a   :  { %2890 = vmatprep.subr.bf16.mxu1 %v7693_v4  ;;  %2935 = vmatprep.subr.bf16.mxu0 %v7696_v24  ;;  %v3026_v4 = vld [vmem:[#allocation7 + $0x120] sm:$0xff]  ;;  %v3023_v24 = vld [vmem:[#allocation7 + $0x108] sm:$0xff] }
 0x34d   :  { %2891 = vmatpush2.bf16.msra.mxu1 %v7691_v21  ;;  %2936 = vmatpush1.bf16.msra.mxu0 %v7694_v39  ;;  %v3027_v21 = vld [vmem:[#allocation7 + $0x128] sm:$0xff] }
 0x34e   :  { %2892 = vmatprep.subr.bf16.mxu1 %v7699_v30  ;;  %2937 = vmatprep.subr.bf16.mxu0 %v7702_v31  ;;  %v6642_v30 = vcombine.low %v3031_v43, %v3035_v45  ;;  %v6633_v31 = vcombine.high %v3022_v19, %v3026_v4  ;;  %v3094_v43 = vld [vmem:[#allocation7 + $0x340] sm:$0xff] }
 0x34f   :  { %v3098_v45 = vld [vmem:[#allocation7 + $0x360] sm:$0xff] }
 0x351   :  { %2893 = vmatpush2.bf16.msra.mxu1 %v7697_v44  ;;  %2938 = vmatpush1.bf16.msra.mxu0 %v7700_v41  ;;  %v6635_v44 = vcombine.high %v3023_v24, %v3027_v21  ;;  %v3014_v41 = vld [vmem:[#allocation7 + $0xc0] sm:$0xff] }
 0x352   :  { %2894 = vmatprep.subr.bf16.mxu1 %v7705_v38  ;;  %2939 = vmatprep.subr.bf16.mxu0 %v7708_v46  ;;  %v3018_v38 = vld [vmem:[#allocation7 + $0xe0] sm:$0xff]  ;;  %v3015_v46 = vld [vmem:[#allocation7 + $0xc8] sm:$0xff] }
 0x355   :  { %2895 = vmatpush2.bf16.msra.mxu1 %v7703_v50  ;;  %2940 = vmatpush1.bf16.msra.mxu0 %v7706_v51  ;;  %v3019_v50 = vld [vmem:[#allocation7 + $0xe8] sm:$0xff]  ;;  %v6632_v51 = vcombine.low %v3022_v19, %v3026_v4 }
 0x356   :  { %2896 = vmatprep.subr.bf16.mxu1 %v7711_v23  ;;  %2941 = vmatprep.subr.bf16.mxu0 %v7714_v53  ;;  %v6634_v23 = vcombine.low %v3023_v24, %v3027_v21  ;;  %v6625_v53 = vcombine.high %v3014_v41, %v3018_v38  ;;  %v3095_v19 = vld [vmem:[#allocation7 + $0x348] sm:$0xff]  ;;  %v6704_v24 = vcombine.low %v3094_v43, %v3098_v45 }
 0x357   :  { %v3099_v4 = vld [vmem:[#allocation7 + $0x368] sm:$0xff] }
 0x358   :  { %v6706_v21 = vcombine.low %v3095_v19, %v3099_v4 }
 0x359   :  { %2897 = vmatpush2.bf16.msra.mxu1 %v7709_v25  ;;  %2942 = vmatpush2.bf16.msra.mxu0 %v7712_v27  ;;  %v6627_v25 = vcombine.high %v3015_v46, %v3019_v50  ;;  %v3006_v27 = vld [vmem:[#allocation7 + $0x80] sm:$0xff] }
 0x35a   :  { %2898 = vmatprep.subr.bf16.mxu1 %v7717_v29  ;;  %2943 = vmatprep.subr.bf16.mxu0 %v7720_v32  ;;  %v3010_v29 = vld [vmem:[#allocation7 + $0xa0] sm:$0xff]  ;;  %v3007_v32 = vld [vmem:[#allocation7 + $0x88] sm:$0xff] }
 0x35d   :  { %2899 = vmatpush2.bf16.msra.mxu1 %v7715_v52  ;;  %2944 = vmatpush2.bf16.msra.mxu0 %v7718_v48  ;;  %v3011_v52 = vld [vmem:[#allocation7 + $0xa8] sm:$0xff]  ;;  %v6624_v48 = vcombine.low %v3014_v41, %v3018_v38 }
 0x35e   :  { %2900 = vmatprep.subr.bf16.mxu1 %v7723_v60  ;;  %2945 = vmatprep.subr.bf16.mxu0 %v7726_v63  ;;  %v6626_v60 = vcombine.low %v3015_v46, %v3019_v50  ;;  %v6617_v63 = vcombine.high %v3006_v27, %v3010_v29  ;;  %v3091_v38 = vld [vmem:[#allocation7 + $0x328] sm:$0xff] }
 0x361   :  { %2901 = vmatpush2.bf16.msra.mxu1 %v7721_v55  ;;  %2946 = vmatpush2.bf16.msra.mxu0 %v7724_v10  ;;  %v6619_v55 = vcombine.high %v3007_v32, %v3011_v52  ;;  %v2998_v10 = vld [vmem:[#allocation7 + $0x40] sm:$0xff] }
 0x362   :  { %2902 = vmatprep.subr.bf16.mxu1 %v7729_v8  ;;  %2947 = vmatprep.subr.bf16.mxu0 %v7732_v1  ;;  %v3002_v8 = vld [vmem:[#allocation7 + $0x60] sm:$0xff]  ;;  %v2999_v1 = vld [vmem:[#allocation7 + $0x48] sm:$0xff] }
 0x365   :  { %2903 = vmatpush2.bf16.msra.mxu1 %v7727_v54  ;;  %2948 = vmatpush2.bf16.msra.mxu0 %v7730_v57  ;;  %v3003_v54 = vld [vmem:[#allocation7 + $0x68] sm:$0xff]  ;;  %v6616_v57 = vcombine.low %v3006_v27, %v3010_v29 }
 0x366   :  { %2949 = vmatprep.subr.bf16.mxu0 %v7735_v56  ;;  %3800 = vmatprep.subr.bf16.mxu1 %v6657_v13  ;;  %v6618_v56 = vcombine.low %v3007_v32, %v3011_v52  ;;  %v3111_v13 = vld [vmem:[#allocation7 + $0x3c8] sm:$0xff] }
 0x367   :  { %v6723_v40 = vcombine.high %v3111_v13, %v3115_v0  ;;  %v3083_v29 = vld [vmem:[#allocation7 + $0x2e8] sm:$0xff] }
 0x368   :  { %2905 = vmatmul.mubr.bf16.vlgmr.msra.gmra.mxu1 %v8804_v35  ;;  %v7744_v35 = vld [vmem:[%s9206_s7 + $0x484] ss:$8 sps:$4 sm:$0xff]  }
 0x369   :  { %2914 = vmatprep.mubr.bf16.mxu1 %v1740_v2  ;;  %2950 = vmatpush2.bf16.msra.mxu0 %v7733_v47  ;;  %v6609_v47 = vcombine.high %v2998_v10, %v3002_v8  ;;  %v2990_v2 = vld [vmem:[#allocation7] sm:$0xff] }
 0x36a   :  { %2951 = vmatprep.subr.bf16.mxu0 %v7738_v33  ;;  %3801 = vmatpush1.bf16.msra.mxu1 %v6656_v22  ;;  %v6611_v33 = vcombine.high %v2999_v1, %v3003_v54 }
 0x36b   :  { %3802 = vmatprep.subr.bf16.mxu1 %v6649_v58  ;;  %v3106_v58 = vld [vmem:[#allocation7 + $0x3a0] sm:$0xff] }
 0x36d   :  { %2952 = vmatpush2.bf16.msra.mxu0 %v7736_v28  ;;  %v2994_v28 = vld [vmem:[#allocation7 + $0x20] sm:$0xff] }
 0x36e   :  { %2953 = vmatprep.subr.bf16.mxu0 %v7741_v37  ;;  %3803 = vmatpush1.bf16.msra.mxu1 %v6648_v7  ;;  %v2991_v37 = vld [vmem:[#allocation7 + $0x8] sm:$0xff]  ;;  %v6600_v22 = vcombine.low %v2990_v2, %v2994_v28  ;;  %v3102_v7 = vld [vmem:[#allocation7 + $0x380] sm:$0xff] }
 0x370   :  { %2915 = vmatmul.mubr.bf16.gmra.mxu1 %v1739_v62  ;;  %v6608_v62 = vcombine.low %v2998_v10, %v3002_v8  ;;  %v3075_v8 = vld [vmem:[#allocation7 + $0x2a8] sm:$0xff] }
 0x371   :  { %2954 = vmatpush2.bf16.msra.mxu0 %v7739_v9  ;;  %v2995_v9 = vld [vmem:[#allocation7 + $0x28] sm:$0xff] }
 0x372   :  { %2955 = vmatprep.subr.bf16.mxu0 %v7744_v35  ;;  %v6610_v35 = vcombine.low %v2999_v1, %v3003_v54  ;;  %v6603_v14 = vcombine.high %v2991_v37, %v2995_v9 }
 0x375   :  { %2956 = vmatpush2.bf16.msra.mxu0 %v7742_v12  ;;  %v6601_v12 = vcombine.high %v2990_v2, %v2994_v28  ;;  %v3067_v28 = vld [vmem:[#allocation7 + $0x268] sm:$0xff] }
 0x376   :  { %3853 = vmatprep.subr.bf16.mxu0 %v6659_v15  ;;  %v6721_v15 = vcombine.high %v3110_v18, %v3114_v20  ;;  %v3059_v20 = vld [vmem:[#allocation7 + $0x228] sm:$0xff] }
 0x378   :  { %2958 = vmatmul.mubr.bf16.vlgmr.msra.gmra.mxu0 %v8837_v61  ;;  %v3043_v61 = vld [vmem:[#allocation7 + $0x1a8] sm:$0xff] }
 0x379   :  { %2967 = vmatprep.mubr.bf16.mxu0 %v9238_v49  ;;  %3854 = vmatpush1.bf16.msra.mxu0 %v6658_v16  ;;  %v6650_v36 = vcombine.low %v3039_v26, %v3043_v61  ;;  %v6651_v42 = vcombine.high %v3039_v26, %v3043_v61  ;;  %v6602_v16 = vcombine.low %v2991_v37, %v2995_v9  ;;  %v3103_v61 = vld [vmem:[#allocation7 + $0x388] sm:$0xff] }
 0x37a   :  { %v6722_v26 = vcombine.low %v3111_v13, %v3115_v0 }
 0x37b   :  { %3855 = vmatprep.subr.bf16.mxu0 %v6651_v42 }
 0x37d   :  { %3856 = vmatpush1.bf16.msra.mxu0 %v6650_v36  ;;  %v6712_v36 = vcombine.low %v3102_v7, %v3106_v58 }
 0x37e   :  { %3857 = vmatprep.subr.bf16.mxu0 %v6643_v3  ;;  %v6705_v3 = vcombine.high %v3094_v43, %v3098_v45 }
 0x380   :  { %2968 = vmatmul.mubr.bf16.gmra.mxu0 %v9238_v49  ;;  %v3034_v49 = vld [vmem:[#allocation7 + $0x160] sm:$0xff] }
 0x381   :  { %v6641_v17 = vcombine.high %v3030_v11, %v3034_v49  ;;  %v6640_v39 = vcombine.low %v3030_v11, %v3034_v49  ;;  %3858 = vmatpush1.bf16.msra.mxu0 %v6642_v30  ;;  %v6713_v11 = vcombine.high %v3102_v7, %v3106_v58  ;;  %v3107_v49 = vld [vmem:[#allocation7 + $0x3a8] sm:$0xff]  ;;  %v3086_v30 = vld [vmem:[#allocation7 + $0x300] sm:$0xff] }
 0x382   :  { %3859 = vmatprep.subr.bf16.mxu0 %v6635_v44  ;;  %v6714_v42 = vcombine.low %v3103_v61, %v3107_v49  ;;  %v3087_v44 = vld [vmem:[#allocation7 + $0x308] sm:$0xff] }
 0x383   :  { %3804 = vmatprep.subr.bf16.mxu1 %v6641_v17  ;;  %v6715_v17 = vcombine.high %v3103_v61, %v3107_v49  ;;  %v6698_v50 = vcombine.low %v3087_v44, %v3091_v38 }
 0x384   :  { %3805 = vmatpush1.bf16.msra.mxu1 %v6640_v39  ;;  %v6707_v39 = vcombine.high %v3095_v19, %v3099_v4 }
 0x385   :  { %3806 = vmatprep.subr.bf16.mxu1 %v6633_v31  ;;  %3860 = vmatpush1.bf16.msra.mxu0 %v6634_v23  ;;  %v3090_v31 = vld [vmem:[#allocation7 + $0x320] sm:$0xff] }
 0x386   :  { %3861 = vmatprep.subr.bf16.mxu0 %v6627_v25  ;;  %v6697_v41 = vcombine.high %v3086_v30, %v3090_v31  ;;  %v6696_v46 = vcombine.low %v3086_v30, %v3090_v31  ;;  %v3078_v23 = vld [vmem:[#allocation7 + $0x2c0] sm:$0xff]  ;;  %v3079_v25 = vld [vmem:[#allocation7 + $0x2c8] sm:$0xff] }
 0x387   :  { %v6690_v52 = vcombine.low %v3079_v25, %v3083_v29 }
 0x388   :  { %3807 = vmatpush1.bf16.msra.mxu1 %v6632_v51  ;;  %v6699_v51 = vcombine.high %v3087_v44, %v3091_v38 }
 0x389   :  { %3808 = vmatprep.subr.bf16.mxu1 %v6625_v53  ;;  %3862 = vmatpush1.bf16.msra.mxu0 %v6626_v60  ;;  %v3082_v53 = vld [vmem:[#allocation7 + $0x2e0] sm:$0xff] }
 0x38a   :  { %3863 = vmatprep.subr.bf16.mxu0 %v6619_v55  ;;  %v6689_v27 = vcombine.high %v3078_v23, %v3082_v53  ;;  %v6688_v32 = vcombine.low %v3078_v23, %v3082_v53  ;;  %v3070_v60 = vld [vmem:[#allocation7 + $0x280] sm:$0xff]  ;;  %v3071_v55 = vld [vmem:[#allocation7 + $0x288] sm:$0xff] }
 0x38b   :  { %v6682_v54 = vcombine.low %v3071_v55, %v3075_v8 }
 0x38c   :  { %3809 = vmatpush1.bf16.msra.mxu1 %v6624_v48  ;;  %v6691_v48 = vcombine.high %v3079_v25, %v3083_v29  ;;  %v1901_v25 = vld [vmem:[%s9207_s8] sm:$0x3] }
 0x38d   :  { %3810 = vmatprep.subr.bf16.mxu1 %v6617_v63  ;;  %3864 = vmatpush1.bf16.msra.mxu0 %v6618_v56  ;;  %v3074_v63 = vld [vmem:[#allocation7 + $0x2a0] sm:$0xff] }
 0x38e   :  { %3865 = vmatprep.subr.bf16.mxu0 %v6611_v33  ;;  %v6681_v10 = vcombine.high %v3070_v60, %v3074_v63  ;;  %v6680_v1 = vcombine.low %v3070_v60, %v3074_v63  ;;  %v3062_v56 = vld [vmem:[#allocation7 + $0x240] sm:$0xff]  ;;  %v3063_v33 = vld [vmem:[#allocation7 + $0x248] sm:$0xff] }
 0x38f   :  { %v6674_v9 = vcombine.low %v3063_v33, %v3067_v28 }
 0x390   :  { %3811 = vmatpush1.bf16.msra.mxu1 %v6616_v57  ;;  %v6683_v57 = vcombine.high %v3071_v55, %v3075_v8 }
 0x391   :  { %3812 = vmatprep.subr.bf16.mxu1 %v6609_v47  ;;  %3866 = vmatpush1.bf16.msra.mxu0 %v6610_v35  ;;  %v3066_v47 = vld [vmem:[#allocation7 + $0x260] sm:$0xff] }
 0x392   :  { %3867 = vmatprep.subr.bf16.mxu0 %v6603_v14  ;;  %v6673_v2 = vcombine.high %v3062_v56, %v3066_v47  ;;  %v6672_v37 = vcombine.low %v3062_v56, %v3066_v47  ;;  %v3054_v35 = vld [vmem:[#allocation7 + $0x200] sm:$0xff]  ;;  %v3055_v14 = vld [vmem:[#allocation7 + $0x208] sm:$0xff] }
 0x393   :  { %v6666_v0 = vcombine.low %v3055_v14, %v3059_v20 }
 0x394   :  { %3813 = vmatpush1.bf16.msra.mxu1 %v6608_v62  ;;  %v6675_v62 = vcombine.high %v3063_v33, %v3067_v28 }
 0x395   :  { %3814 = vmatprep.subr.bf16.mxu1 %v6601_v12  ;;  %3868 = vmatpush1.bf16.msra.mxu0 %v6602_v16  ;;  %v3058_v12 = vld [vmem:[#allocation7 + $0x220] sm:$0xff]  ;;  %v8980_v16 = vld [vmem:[#allocation7 + $0x1d0] sm:$0xff] }
 0x396   :  { %3869 = vmatprep.subr.bf16.mxu0 %v6723_v40  ;;  %v6665_v18 = vcombine.high %v3054_v35, %v3058_v12  ;;  %v6664_v13 = vcombine.low %v3054_v35, %v3058_v12  ;;  %v8984_v40 = vld [vmem:[#allocation7 + $0x1d8] sm:$0xff] }
 0x398   :  { %3815 = vmatpush1.bf16.msra.mxu1 %v6600_v22  ;;  %v6667_v22 = vcombine.high %v3055_v14, %v3059_v20 }
 0x399   :  { %3816 = vmatprep.subr.bf16.mxu1 %v6721_v15  ;;  %3870 = vmatpush2.bf16.msra.mxu0 %v6722_v26  ;;  %v8982_v15 = vld [vmem:[#allocation7 + $0x1f0] sm:$0xff]  ;;  %v8988_v26 = vld [vmem:[#allocation7 + $0x1f8] sm:$0xff] }
 0x39a   :  { %3871 = vmatprep.subr.bf16.mxu0 %v6715_v17  ;;  %v6660_v7 = vcombine.low %v8980_v16, %v8982_v15  ;;  %v6662_v58 = vcombine.low %v8984_v40, %v8988_v26  ;;  %v6663_v61 = vcombine.high %v8984_v40, %v8988_v26 }
 0x39c   :  { %3817 = vmatpush2.bf16.msra.mxu1 %v6720_v34  ;;  %v6661_v34 = vcombine.high %v8980_v16, %v8982_v15  ;;  %v3025_v16 = vld [vmem:[#allocation7 + $0x118] sm:$0xff] }
 0x39d   :  { %3818 = vmatprep.subr.bf16.mxu1 %v6713_v11  ;;  %3872 = vmatpush2.bf16.msra.mxu0 %v6714_v42  ;;  %v2747_v11 = vpop.f32.mrf.mxu0  ;;  %v3029_v15 = vld [vmem:[#allocation7 + $0x138] sm:$0xff] }
 0x39e   :  { %3873 = vmatprep.subr.bf16.mxu0 %v6707_v39 }
 0x39f   :  { %v2749_v49 = vpop.f32.mrf.mxu0 }
 0x3a0   :  { %3819 = vmatpush2.bf16.msra.mxu1 %v6712_v36 }
 0x3a1   :  { %3820 = vmatprep.subr.bf16.mxu1 %v6705_v3  ;;  %3874 = vmatpush2.bf16.msra.mxu0 %v6706_v21  ;;  %v2751_v36 = vpop.f32.mrf.mxu0 }
 0x3a2   :  { %3875 = vmatprep.subr.bf16.mxu0 %v6699_v51 }
 0x3a3   :  { %v2753_v42 = vpop.f32.mrf.mxu0 }
 0x3a4   :  { %3821 = vmatpush2.bf16.msra.mxu1 %v6704_v24 }
 0x3a5   :  { %3822 = vmatprep.subr.bf16.mxu1 %v6697_v41  ;;  %3876 = vmatpush2.bf16.msra.mxu0 %v6698_v50 }
 0x3a6   :  { %3877 = vmatprep.subr.bf16.mxu0 %v6691_v48 }
 0x3a8   :  { %3823 = vmatpush2.bf16.msra.mxu1 %v6696_v46 }
 0x3a9   :  { %3824 = vmatprep.subr.bf16.mxu1 %v6689_v27  ;;  %3878 = vmatpush2.bf16.msra.mxu0 %v6690_v52  ;;  %v1910_v52 = vrot.slane %v1901_v25, %v8734_v59 }
 0x3aa   :  { %3879 = vmatprep.subr.bf16.mxu0 %v6683_v57 }
 0x3ab   :  { %v2750_v63 = vadd.f32 %v2749_v49, %v1910_v52 }
 0x3ac   :  { %3825 = vmatpush2.bf16.msra.mxu1 %v6688_v32  ;;  %v1906_v32 = vrot.slane %v1901_v25, %v8726_v5  ;;  %v3040_v25 = vld [vmem:[#allocation7 + $0x190] sm:$0xff] }
 0x3ad   :  { %3826 = vmatprep.subr.bf16.mxu1 %v6681_v10  ;;  %3880 = vmatpush2.bf16.msra.mxu0 %v6682_v54  ;;  %v2754_v54 = vadd.f32 %v2753_v42, %v1910_v52 }
 0x3ae   :  { %3881 = vmatprep.subr.bf16.mxu0 %v6675_v62  ;;  %v2752_v55 = vadd.f32 %v2751_v36, %v1906_v32  ;;  %v2748_v10 = vadd.f32 %v2747_v11, %v1906_v32 }
 0x3b0   :  { %3827 = vmatpush2.bf16.msra.mxu1 %v6680_v1 }
 0x3b1   :  { %3828 = vmatprep.subr.bf16.mxu1 %v6673_v2  ;;  %3882 = vmatpush2.bf16.msra.mxu0 %v6674_v9 }
 0x3b2   :  { %3883 = vmatprep.subr.bf16.mxu0 %v6667_v22 }
 0x3b4   :  { %3829 = vmatpush2.bf16.msra.mxu1 %v6672_v37 }
 0x3b5   :  { %3830 = vmatprep.subr.bf16.mxu1 %v6665_v18  ;;  %3884 = vmatpush2.bf16.msra.mxu0 %v6666_v0 }
 0x3b6   :  { %3959 = vmatprep.subr.bf16.mxu0 %v6663_v61 }
 0x3b8   :  { %3831 = vmatpush2.bf16.msra.mxu1 %v6664_v13 }
 0x3b9   :  { %3906 = vmatprep.subr.bf16.mxu1 %v6661_v34 }
 0x3e8   :  { %v2800_v43 = vpop.f32.mrf.mxu1 }
 0x3e9   :  { %v2801_v47 = vadd.f32 %v2800_v43, %v2748_v10 }
 0x3ea   :  { %v2802_v19 = vpop.f32.mrf.mxu1 }
 0x3eb   :  { %v2803_v57 = vadd.f32 %v2802_v19, %v2750_v63  ;;  %v3041_v63 = vld [vmem:[#allocation7 + $0x198] sm:$0xff] }
 0x3ec   :  { %v2804_v4 = vpop.f32.mrf.mxu1 }
 0x3ed   :  { %v2805_v56 = vadd.f32 %v2804_v4, %v2752_v55  ;;  %v3045_v55 = vld [vmem:[#allocation7 + $0x1b8] sm:$0xff] }
 0x3ee   :  { %v2806_v21 = vpop.f32.mrf.mxu1 }
 0x3ef   :  { %v2807_v2 = vadd.f32 %v2806_v21, %v2754_v54 }
 0x3f0   :  { %v2757_v17 = vpop.f32.mrf.mxu0 }
 0x3f1   :  { %v2758_v49 = vadd.f32 %v2757_v17, %v1906_v32 }
 0x3f2   :  { %v2759_v45 = vpop.f32.mrf.mxu0 }
 0x3f3   :  { %v2760_v20 = vadd.f32 %v2759_v45, %v1910_v52 }
 0x3f4   :  { %v2761_v3 = vpop.f32.mrf.mxu0 }
 0x3f5   :  { %v2762_v22 = vadd.f32 %v2761_v3, %v1906_v32 }
 0x3f6   :  { %v2763_v24 = vpop.f32.mrf.mxu0 }
 0x3f7   :  { %v2764_v36 = vadd.f32 %v2763_v24, %v1910_v52 }
 0x3f8   :  { %v2810_v39 = vpop.f32.mrf.mxu1  ;;  %v2853_v30 = vpop.f32.mrf.mxu0 }
 0x3f9   :  { %v2854_v9 = vadd.f32 %v2853_v30, %v2801_v47 }
 0x3fa   :  { %v2812_v31 = vpop.f32.mrf.mxu1  ;;  %v2855_v44 = vpop.f32.mrf.mxu0 }
 0x3fb   :  { %v2856_v28 = vadd.f32 %v2855_v44, %v2803_v57  ;;  %v2813_v4 = vadd.f32 %v2812_v31, %v2760_v20  ;;  %v2811_v44 = vadd.f32 %v2810_v39, %v2758_v49  ;;  %v6639_v49 = vcombine.high %v3025_v16, %v3029_v15 }
 0x3fc   :  { %v2814_v41 = vpop.f32.mrf.mxu1  ;;  %v2857_v38 = vpop.f32.mrf.mxu0 }
 0x3fd   :  { %v2858_v37 = vadd.f32 %v2857_v38, %v2805_v56  ;;  %v2815_v21 = vadd.f32 %v2814_v41, %v2762_v22 }
 0x3fe   :  { %v2816_v46 = vpop.f32.mrf.mxu1  ;;  %v2859_v50 = vpop.f32.mrf.mxu0 }
 0x3ff   :  { %v2860_v12 = vadd.f32 %v2859_v50, %v2807_v2  ;;  %v2817_v38 = vadd.f32 %v2816_v46, %v2764_v36  ;;  %v3020_v36 = vld [vmem:[#allocation7 + $0xf0] sm:$0xff] }
 0x400   :  { %v2863_v23 = vpop.f32.mrf.mxu0 }
 0x401   :  { %v2864_v17 = vadd.f32 %v2863_v23, %v2811_v44  ;;  %v3036_v23 = vld [vmem:[#allocation7 + $0x170] sm:$0xff] }
 0x402   :  { %v2865_v27 = vpop.f32.mrf.mxu0  ;;  %v3008_v44 = vld [vmem:[#allocation7 + $0x90] sm:$0xff] }
 0x403   :  { %v2866_v45 = vadd.f32 %v2865_v27, %v2813_v4  ;;  %v6655_v27 = vcombine.high %v3041_v63, %v3045_v55  ;;  %v6638_v4 = vcombine.low %v3025_v16, %v3029_v15  ;;  %v3097_v16 = vld [vmem:[#allocation7 + $0x358] sm:$0xff] }
 0x404   :  { %v2867_v48 = vpop.f32.mrf.mxu0  ;;  %v3101_v15 = vld [vmem:[#allocation7 + $0x378] sm:$0xff] }
 0x406   :  { %v2869_v8 = vpop.f32.mrf.mxu0 }
 0x407   :  { %v2870_v10 = vadd.f32 %v2869_v8, %v2817_v38  ;;  %v3012_v38 = vld [vmem:[#allocation7 + $0xb0] sm:$0xff] }
 0x428   :  { %v2906_v51 = vpop.f32.mrf.mxu1 }
 0x429   :  { %v2907_v13 = vadd.f32 %v2906_v51, %v2854_v9  ;;  %v2868_v51 = vadd.f32 %v2867_v48, %v2815_v21  ;;  %v3032_v48 = vld [vmem:[#allocation7 + $0x150] sm:$0xff] }
 0x42a   :  { %v2908_v53 = vpop.f32.mrf.mxu1  ;;  %v6644_v40 = vcombine.low %v3032_v48, %v3036_v23 }
 0x42b   :  { %v2909_v14 = vadd.f32 %v2908_v53, %v2856_v28  ;;  %v3033_v28 = vld [vmem:[#allocation7 + $0x158] sm:$0xff] }
 0x42c   :  { %v2910_v29 = vpop.f32.mrf.mxu1 }
 0x42d   :  { %v2911_v18 = vadd.f32 %v2910_v29, %v2858_v37  ;;  %v3037_v37 = vld [vmem:[#allocation7 + $0x178] sm:$0xff] }
 0x42e   :  { %v2912_v60 = vpop.f32.mrf.mxu1  ;;  %v6646_v26 = vcombine.low %v3033_v28, %v3037_v37 }
 0x42f   :  { %v2913_v34 = vadd.f32 %v2912_v60, %v2860_v12  ;;  %v3044_v60 = vld [vmem:[#allocation7 + $0x1b0] sm:$0xff] }
 0x430   :  { %v2916_v1 = vpop.f32.mrf.mxu1  ;;  %v6653_v56 = vcombine.high %v3040_v25, %v3044_v60 }
 0x431   :  { %v2917_v39 = vadd.f32 %v2916_v1, %v2864_v17  ;;  %v6620_v17 = vcombine.low %v3008_v44, %v3012_v38 }
 0x432   :  { %v2918_v62 = vpop.f32.mrf.mxu1 }
 0x433   :  { %v2919_v31 = vadd.f32 %v2918_v62, %v2866_v45  ;;  %v6652_v62 = vcombine.low %v3040_v25, %v3044_v60  ;;  %v3004_v60 = vld [vmem:[#allocation7 + $0x70] sm:$0xff] }
 0x434   :  { %v2920_v42 = vpop.f32.mrf.mxu1 }
 0x435   :  { %v2921_v41 = vadd.f32 %v2920_v42, %v2868_v51  ;;  %v3017_v42 = vld [vmem:[#allocation7 + $0xd8] sm:$0xff]  ;;  %v6621_v51 = vcombine.high %v3008_v44, %v3012_v38  ;;  %v3080_v44 = vld [vmem:[#allocation7 + $0x2d0] sm:$0xff] }
 0x436   :  { %v2922_v24 = vpop.f32.mrf.mxu1  ;;  %v3084_v38 = vld [vmem:[#allocation7 + $0x2f0] sm:$0xff] }
 0x437   :  { %v2923_v47 = vadd.f32 %v2922_v24, %v2870_v10  ;;  %v2992_v10 = vld [vmem:[#allocation7 + $0x10] sm:$0xff] }
 0x438   :  { %v2959_v33 = vpop.f32.mrf.mxu0 }
 0x439   :  { %v2960_v43 = vadd.f32 %v2959_v33, %v2907_v13 }
 0x43a   :  { %v2961_v35 = vpop.f32.mrf.mxu0 }
 0x43b   :  { %v2962_v61 = vadd.f32 %v2961_v35, %v2909_v14  ;;  %v2978_v32 = vmax.f32 %v2960_v43, 0.0  ;;  %v6654_v35 = vcombine.low %v3041_v63, %v3045_v55  ;;  %v6645_v14 = vcombine.high %v3032_v48, %v3036_v23  ;;  %v3021_v43 = vld [vmem:[#allocation7 + $0xf8] sm:$0xff]  ;;  %v3112_v48 = vld [vmem:[#allocation7 + $0x3d0] sm:$0xff] }
 0x43c   :  { %v2963_v0 = vpop.f32.mrf.mxu0  ;;  %v6630_v45 = vcombine.low %v3017_v42, %v3021_v43  ;;  %v3001_v63 = vld [vmem:[#allocation7 + $0x58] sm:$0xff] }
 0x43d   :  { %v2964_v11 = vadd.f32 %v2963_v0, %v2911_v18  ;;  %v2979_v29 = vmax.f32 %v2962_v61, 0.0  ;;  %v6647_v18 = vcombine.high %v3033_v28, %v3037_v37  ;;  %v3024_v0 = vld [vmem:[#allocation7 + $0x110] sm:$0xff]  ;;  %v3005_v55 = vld [vmem:[#allocation7 + $0x78] sm:$0xff] }
 0x43e   :  { %v2965_v19 = vpop.f32.mrf.mxu0  ;;  %v3016_v61 = vld [vmem:[#allocation7 + $0xd0] sm:$0xff] }
 0x43f   :  { %v2966_v30 = vadd.f32 %v2965_v19, %v2913_v34  ;;  %v2980_v50 = vmax.f32 %v2964_v11, 0.0  ;;  %v3028_v34 = vld [vmem:[#allocation7 + $0x130] sm:$0xff]  ;;  %v6629_v21 = vcombine.high %v3016_v61, %v3020_v36  ;;  %v6628_v25 = vcombine.low %v3016_v61, %v3020_v36 }
 0x440   :  { %v2969_v53 = vpop.f32.mrf.mxu0  ;;  %v6637_v11 = vcombine.high %v3024_v0, %v3028_v34  ;;  %v6636_v19 = vcombine.low %v3024_v0, %v3028_v34  ;;  %v3100_v34 = vld [vmem:[#allocation7 + $0x370] sm:$0xff] }
 0x441   :  { %v2981_v3 = vmax.f32 %v2966_v30, 0.0  ;;  %v9001_v46 = vpack.c.bf16 %v2980_v50, %v2978_v32  ;;  %v2970_v9 = vadd.f32 %v2969_v53, %v2917_v39  ;;  %v6631_v30 = vcombine.high %v3017_v42, %v3021_v43  ;;  %v3009_v50 = vld [vmem:[#allocation7 + $0x98] sm:$0xff]  ;;  %v3092_v36 = vld [vmem:[#allocation7 + $0x330] sm:$0xff] }
 0x442   :  { %v2971_v52 = vpop.f32.mrf.mxu0  ;;  %v3013_v53 = vld [vmem:[#allocation7 + $0xb8] sm:$0xff] }
 0x443   :  { %v2987_v54 = vpack.c.bf16 %v2981_v3, %v2979_v29  ;;  %v2972_v33 = vadd.f32 %v2971_v52, %v2919_v31  ;;  %v2982_v22 = vmax.f32 %v2970_v9, 0.0  ;;  %v6623_v29 = vcombine.high %v3009_v50, %v3013_v53  ;;  %v3000_v3 = vld [vmem:[#allocation7 + $0x50] sm:$0xff]  ;;  %v3089_v42 = vld [vmem:[#allocation7 + $0x318] sm:$0xff] }
 0x444   :  { %v2973_v57 = vpop.f32.mrf.mxu0  ;;  %v6622_v24 = vcombine.low %v3009_v50, %v3013_v53  ;;  %v6613_v32 = vcombine.high %v3000_v3, %v3004_v60  ;;  %v6615_v52 = vcombine.high %v3001_v63, %v3005_v55  ;;  %v2996_v31 = vld [vmem:[#allocation7 + $0x30] sm:$0xff]  ;;  %v6612_v39 = vcombine.low %v3000_v3, %v3004_v60  ;;  %v3093_v43 = vld [vmem:[#allocation7 + $0x338] sm:$0xff] }
 0x445   :  { %v2974_v2 = vadd.f32 %v2973_v57, %v2921_v41  ;;  %3832 = vmatprep.mubr.bf16.mxu1 %v2987_v54  ;;  %3885 = vmatprep.mubr.bf16.mxu0 %v2987_v54  ;;  %v2983_v20 = vmax.f32 %v2972_v33, 0.0  ;;  %v2993_v41 = vld [vmem:[#allocation7 + $0x18] sm:$0xff]  ;;  %v6614_v57 = vcombine.low %v3001_v63, %v3005_v55  ;;  %v6604_v23 = vcombine.low %v2992_v10, %v2996_v31  ;;  %v3072_v3 = vld [vmem:[#allocation7 + $0x290] sm:$0xff] }
 0x446   :  { %v2975_v8 = vpop.f32.mrf.mxu0  ;;  %3833 = vmatmul.mubr.bf16.vlgmr.msra.gmra.mxu1 %v9001_v46  ;;  %3886 = vmatmul.mubr.bf16.vlgmr.msra.gmra.mxu0 %v9001_v46  ;;  %v3113_v33 = vld [vmem:[#allocation7 + $0x3d8] sm:$0xff]  ;;  %v3076_v60 = vld [vmem:[#allocation7 + $0x2b0] sm:$0xff] }
 0x447   :  { %v2976_v1 = vadd.f32 %v2975_v8, %v2923_v47  ;;  %3907 = vmatpush1.bf16.msra.mxu1 %v6660_v7  ;;  %3960 = vmatpush1.bf16.msra.mxu0 %v6662_v58  ;;  %v9011_v12 = vmax.f32 %v2974_v2, 0.0  ;;  %v3116_v47 = vld [vmem:[#allocation7 + $0x3f0] sm:$0xff]  ;;  %v3117_v2 = vld [vmem:[#allocation7 + $0x3f8] sm:$0xff] }
 0x448   :  { %3908 = vmatprep.subr.bf16.mxu1 %v6653_v56  ;;  %3961 = vmatprep.subr.bf16.mxu0 %v6655_v27  ;;  %v6605_v56 = vcombine.high %v2992_v10, %v2996_v31  ;;  %v6725_v37 = vcombine.high %v3112_v48, %v3116_v47  ;;  %v6727_v9 = vcombine.high %v3113_v33, %v3117_v2  ;;  %v3104_v8 = vld [vmem:[#allocation7 + $0x390] sm:$0xff]  ;;  %v3081_v50 = vld [vmem:[#allocation7 + $0x2d8] sm:$0xff] }
 0x449   :  { %v9013_v13 = vmax.f32 %v2976_v1, 0.0  ;;  %v9019_v58 = vpack.c.bf16 %v9011_v12, %v2982_v22  ;;  %v3108_v1 = vld [vmem:[#allocation7 + $0x3b0] sm:$0xff]  ;;  %v3085_v53 = vld [vmem:[#allocation7 + $0x2f8] sm:$0xff] }
 0x44a   :  { %v3096_v22 = vld [vmem:[#allocation7 + $0x350] sm:$0xff]  ;;  %v3073_v63 = vld [vmem:[#allocation7 + $0x298] sm:$0xff] }
 0x44b   :  { %v9016_v7 = vpack.c.bf16 %v9013_v13, %v2983_v20  ;;  %3909 = vmatpush1.bf16.msra.mxu1 %v6652_v62  ;;  %3962 = vmatpush1.bf16.msra.mxu0 %v6654_v35  ;;  %v3105_v62 = vld [vmem:[#allocation7 + $0x398] sm:$0xff]  ;;  %v6717_v20 = vcombine.high %v3104_v8, %v3108_v1  ;;  %v6709_v61 = vcombine.high %v3096_v22, %v3100_v34  ;;  %v3064_v10 = vld [vmem:[#allocation7 + $0x250] sm:$0xff] }
 0x44c   :  { %3910 = vmatprep.subr.bf16.mxu1 %v6645_v14  ;;  %3963 = vmatprep.subr.bf16.mxu0 %v6647_v18  ;;  %v3109_v35 = vld [vmem:[#allocation7 + $0x3b8] sm:$0xff]  ;;  %v6724_v14 = vcombine.low %v3112_v48, %v3116_v47  ;;  %v6726_v18 = vcombine.low %v3113_v33, %v3117_v2  ;;  %v3068_v31 = vld [vmem:[#allocation7 + $0x270] sm:$0xff] }
 0x44d   :  { %3842 = vmatprep.mubr.bf16.mxu1 %v9016_v7  ;;  %3895 = vmatprep.mubr.bf16.mxu0 %v9016_v7  ;;  %v6719_v0 = vcombine.high %v3105_v62, %v3109_v35  ;;  %v3077_v55 = vld [vmem:[#allocation7 + $0x2b8] sm:$0xff]  ;;  %v3056_v48 = vld [vmem:[#allocation7 + $0x210] sm:$0xff] }
 0x44e   :  { %3843 = vmatmul.mubr.bf16.gmra.mxu1 %v9019_v58  ;;  %3896 = vmatmul.mubr.bf16.gmra.mxu0 %v9019_v58  ;;  %v3060_v47 = vld [vmem:[#allocation7 + $0x230] sm:$0xff]  ;;  %v3057_v33 = vld [vmem:[#allocation7 + $0x218] sm:$0xff] }
 0x44f   :  { %3911 = vmatpush1.bf16.msra.mxu1 %v6644_v40  ;;  %3964 = vmatpush1.bf16.msra.mxu0 %v6646_v26  ;;  %v6716_v40 = vcombine.low %v3104_v8, %v3108_v1  ;;  %v6718_v26 = vcombine.low %v3105_v62, %v3109_v35  ;;  %v3061_v2 = vld [vmem:[#allocation7 + $0x238] sm:$0xff]  ;;  %v4088_v8 = vld [vmem:[#allocation10 + $0x1c0] sm:$0xff]  ;;  %v4089_v62 = vld [vmem:[#allocation10 + $0x1d0] sm:$0xff] }
 0x450   :  { %3938 = vmatprep.mubr.bf16.mxu1 %v2987_v54  ;;  %3991 = vmatprep.mubr.bf16.mxu0 %v2987_v54  ;;  %v2997_v54 = vld [vmem:[#allocation7 + $0x38] sm:$0xff]  ;;  %v4091_v1 = vld [vmem:[#allocation10 + $0x1e0] sm:$0xff]  ;;  %v4092_v35 = vld [vmem:[#allocation10 + $0x1f0] sm:$0xff] }
 0x451   :  { %3912 = vmatprep.subr.bf16.mxu1 %v6637_v11  ;;  %3965 = vmatprep.subr.bf16.mxu0 %v6639_v49  ;;  %v6607_v27 = vcombine.high %v2993_v41, %v2997_v54  ;;  %v6606_v28 = vcombine.low %v2993_v41, %v2997_v54  ;;  %v6711_v11 = vcombine.high %v3097_v16, %v3101_v15  ;;  %v3088_v49 = vld [vmem:[#allocation7 + $0x310] sm:$0xff]  ;;  %v3065_v41 = vld [vmem:[#allocation7 + $0x258] sm:$0xff] }
 0x452   :  { %v3069_v54 = vld [vmem:[#allocation7 + $0x278] sm:$0xff] }
 0x453   :  { %3913 = vmatpush1.bf16.msra.mxu1 %v6636_v19  ;;  %3966 = vmatpush1.bf16.msra.mxu0 %v6638_v4  ;;  %v6708_v19 = vcombine.low %v3096_v22, %v3100_v34  ;;  %v6710_v4 = vcombine.low %v3097_v16, %v3101_v15  ;;  %v4082_v22 = vld [vmem:[#allocation10 + $0x180] sm:$0xff]  ;;  %v4083_v16 = vld [vmem:[#allocation10 + $0x190] sm:$0xff] }
 0x454   :  { %3914 = vmatprep.subr.bf16.mxu1 %v6629_v21  ;;  %3967 = vmatprep.subr.bf16.mxu0 %v6631_v30  ;;  %v6701_v21 = vcombine.high %v3088_v49, %v3092_v36  ;;  %v6703_v30 = vcombine.high %v3089_v42, %v3093_v43  ;;  %v4085_v34 = vld [vmem:[#allocation10 + $0x1a0] sm:$0xff]  ;;  %v4086_v15 = vld [vmem:[#allocation10 + $0x1b0] sm:$0xff] }
 0x457   :  { %3915 = vmatpush1.bf16.msra.mxu1 %v6628_v25  ;;  %3968 = vmatpush1.bf16.msra.mxu0 %v6630_v45  ;;  %v6700_v25 = vcombine.low %v3088_v49, %v3092_v36  ;;  %v6702_v45 = vcombine.low %v3089_v42, %v3093_v43  ;;  %v4076_v49 = vld [vmem:[#allocation10 + $0x140] sm:$0xff]  ;;  %v4077_v42 = vld [vmem:[#allocation10 + $0x150] sm:$0xff] }
 0x458   :  { %3916 = vmatprep.subr.bf16.mxu1 %v6621_v51  ;;  %3969 = vmatprep.subr.bf16.mxu0 %v6623_v29  ;;  %v6693_v51 = vcombine.high %v3080_v44, %v3084_v38  ;;  %v6695_v29 = vcombine.high %v3081_v50, %v3085_v53  ;;  %v4079_v36 = vld [vmem:[#allocation10 + $0x160] sm:$0xff]  ;;  %v4080_v43 = vld [vmem:[#allocation10 + $0x170] sm:$0xff] }
 0x45b   :  { %3917 = vmatpush1.bf16.msra.mxu1 %v6620_v17  ;;  %3970 = vmatpush1.bf16.msra.mxu0 %v6622_v24  ;;  %v6692_v17 = vcombine.low %v3080_v44, %v3084_v38  ;;  %v6694_v24 = vcombine.low %v3081_v50, %v3085_v53  ;;  %v4070_v44 = vld [vmem:[#allocation10 + $0x100] sm:$0xff]  ;;  %v4071_v50 = vld [vmem:[#allocation10 + $0x110] sm:$0xff] }
 0x45c   :  { %3918 = vmatprep.subr.bf16.mxu1 %v6613_v32  ;;  %3971 = vmatprep.subr.bf16.mxu0 %v6615_v52  ;;  %v6685_v32 = vcombine.high %v3072_v3, %v3076_v60  ;;  %v6687_v52 = vcombine.high %v3073_v63, %v3077_v55  ;;  %v4073_v38 = vld [vmem:[#allocation10 + $0x120] sm:$0xff]  ;;  %v4074_v53 = vld [vmem:[#allocation10 + $0x130] sm:$0xff] }
 0x45f   :  { %3919 = vmatpush1.bf16.msra.mxu1 %v6612_v39  ;;  %3972 = vmatpush1.bf16.msra.mxu0 %v6614_v57  ;;  %v6684_v39 = vcombine.low %v3072_v3, %v3076_v60  ;;  %v6686_v57 = vcombine.low %v3073_v63, %v3077_v55  ;;  %v4067_v3 = vld [vmem:[#allocation10 + $0xe0] sm:$0xff]  ;;  %v4065_v60 = vld [vmem:[#allocation10 + $0xd0] sm:$0xff]  ;;  %v6754_v55 = vcombine.low %v4071_v50, %v4074_v53 }
 0x460   :  { %3920 = vmatprep.subr.bf16.mxu1 %v6605_v56  ;;  %3973 = vmatprep.subr.bf16.mxu0 %v6607_v27  ;;  %v6677_v56 = vcombine.high %v3064_v10, %v3068_v31  ;;  %v6679_v27 = vcombine.high %v3065_v41, %v3069_v54  ;;  %v4068_v63 = vld [vmem:[#allocation10 + $0xf0] sm:$0xff] }
 0x463   :  { %3921 = vmatpush1.bf16.msra.mxu1 %v6604_v23  ;;  %3974 = vmatpush1.bf16.msra.mxu0 %v6606_v28  ;;  %v6676_v23 = vcombine.low %v3064_v10, %v3068_v31  ;;  %v6678_v28 = vcombine.low %v3065_v41, %v3069_v54  ;;  %v4059_v10 = vld [vmem:[#allocation10 + $0x90] sm:$0xff]  ;;  %v6748_v41 = vcombine.low %v4065_v60, %v4068_v63 }
 0x464   :  { %3922 = vmatprep.subr.bf16.mxu1 %v6725_v37  ;;  %3975 = vmatprep.subr.bf16.mxu0 %v6727_v9  ;;  %v6669_v37 = vcombine.high %v3056_v48, %v3060_v47  ;;  %v6671_v9 = vcombine.high %v3057_v33, %v3061_v2  ;;  %v4062_v31 = vld [vmem:[#allocation10 + $0xb0] sm:$0xff] }
 0x467   :  { %3923 = vmatpush2.bf16.msra.mxu1 %v6724_v14  ;;  %3976 = vmatpush2.bf16.msra.mxu0 %v6726_v18  ;;  %v6668_v14 = vcombine.low %v3056_v48, %v3060_v47  ;;  %v6670_v18 = vcombine.low %v3057_v33, %v3061_v2  ;;  %v4056_v48 = vld [vmem:[#allocation10 + $0x70] sm:$0xff]  ;;  %v6742_v33 = vcombine.low %v4059_v10, %v4062_v31 }
 0x468   :  { %3924 = vmatprep.subr.bf16.mxu1 %v6717_v20  ;;  %3977 = vmatprep.subr.bf16.mxu0 %v6719_v0  ;;  %v6771_v20 = vcombine.high %v4088_v8, %v4091_v1  ;;  %v6773_v0 = vcombine.high %v4089_v62, %v4092_v35 }
 0x46b   :  { %3925 = vmatpush2.bf16.msra.mxu1 %v6716_v40  ;;  %3978 = vmatpush2.bf16.msra.mxu0 %v6718_v26  ;;  %v6770_v40 = vcombine.low %v4088_v8, %v4091_v1  ;;  %v6772_v26 = vcombine.low %v4089_v62, %v4092_v35  ;;  %v4050_v8 = vld [vmem:[#allocation10 + $0x30] sm:$0xff] }
 0x46c   :  { %3926 = vmatprep.subr.bf16.mxu1 %v6709_v61  ;;  %3979 = vmatprep.subr.bf16.mxu0 %v6711_v11  ;;  %v6765_v61 = vcombine.high %v4082_v22, %v4085_v34  ;;  %v6767_v11 = vcombine.high %v4083_v16, %v4086_v15 }
 0x46f   :  { %3927 = vmatpush2.bf16.msra.mxu1 %v6708_v19  ;;  %3980 = vmatpush2.bf16.msra.mxu0 %v6710_v4  ;;  %v6764_v19 = vcombine.low %v4082_v22, %v4085_v34  ;;  %v6766_v4 = vcombine.low %v4083_v16, %v4086_v15  ;;  %v4140_v22 = vld [vmem:[#allocation10 + $0x3f0] sm:$0xff] }
 0x470   :  { %3928 = vmatprep.subr.bf16.mxu1 %v6701_v21  ;;  %3981 = vmatprep.subr.bf16.mxu0 %v6703_v30  ;;  %v6759_v21 = vcombine.high %v4076_v49, %v4079_v36  ;;  %v6761_v30 = vcombine.high %v4077_v42, %v4080_v43 }
 0x473   :  { %3929 = vmatpush2.bf16.msra.mxu1 %v6700_v25  ;;  %3982 = vmatpush2.bf16.msra.mxu0 %v6702_v45  ;;  %v6760_v25 = vcombine.low %v4077_v42, %v4080_v43  ;;  %v9031_v45 = vpack.c.bf16 %v9013_v13, %v9013_v13  ;;  %v6752_v13 = vcombine.low %v4070_v44, %v4073_v38 }
 0x474   :  { %3930 = vmatprep.subr.bf16.mxu1 %v6693_v51  ;;  %3983 = vmatprep.subr.bf16.mxu0 %v6695_v29  ;;  %v6755_v51 = vcombine.high %v4071_v50, %v4074_v53  ;;  %v4064_v29 = vld [vmem:[#allocation10 + $0xc0] sm:$0xff] }
 0x477   :  { %3931 = vmatpush2.bf16.msra.mxu1 %v6692_v17  ;;  %3984 = vmatpush2.bf16.msra.mxu0 %v6694_v24  ;;  %v6747_v17 = vcombine.high %v4064_v29, %v4067_v3  ;;  %v6749_v24 = vcombine.high %v4065_v60, %v4068_v63 }
 0x478   :  { %3932 = vmatprep.subr.bf16.mxu1 %v6685_v32  ;;  %3985 = vmatprep.subr.bf16.mxu0 %v6687_v52  ;;  %v4058_v32 = vld [vmem:[#allocation10 + $0x80] sm:$0xff] }
 0x479   :  { %v4061_v52 = vld [vmem:[#allocation10 + $0xa0] sm:$0xff] }
 0x47a   :  { %v6741_v54 = vcombine.high %v4058_v32, %v4061_v52  ;;  %v6740_v47 = vcombine.low %v4058_v32, %v4061_v52  ;;  %v4116_v32 = vld [vmem:[#allocation10 + $0x2f0] sm:$0xff] }
 0x47b   :  { %3933 = vmatpush2.bf16.msra.mxu1 %v6684_v39  ;;  %3986 = vmatpush2.bf16.msra.mxu0 %v6686_v57  ;;  %v6743_v39 = vcombine.high %v4059_v10, %v4062_v31  ;;  %v4052_v57 = vld [vmem:[#allocation10 + $0x40] sm:$0xff] }
 0x47c   :  { %3934 = vmatprep.subr.bf16.mxu1 %v6677_v56  ;;  %3987 = vmatprep.subr.bf16.mxu0 %v6679_v27  ;;  %v4055_v56 = vld [vmem:[#allocation10 + $0x60] sm:$0xff]  ;;  %v4053_v27 = vld [vmem:[#allocation10 + $0x50] sm:$0xff] }
 0x47d   :  { %v6735_v2 = vcombine.high %v4052_v57, %v4055_v56  ;;  %v6734_v1 = vcombine.low %v4052_v57, %v4055_v56  ;;  %v6736_v62 = vcombine.low %v4053_v27, %v4056_v48  ;;  %v4110_v57 = vld [vmem:[#allocation10 + $0x2b0] sm:$0xff] }
 0x47f   :  { %3935 = vmatpush2.bf16.msra.mxu1 %v6676_v23  ;;  %3988 = vmatpush2.bf16.msra.mxu0 %v6678_v28  ;;  %v6737_v23 = vcombine.high %v4053_v27, %v4056_v48  ;;  %v4046_v28 = vld [vmem:[#allocation10] sm:$0xff] }
 0x480   :  { %3936 = vmatprep.subr.bf16.mxu1 %v6669_v37  ;;  %3989 = vmatprep.subr.bf16.mxu0 %v6671_v9  ;;  %v4049_v37 = vld [vmem:[#allocation10 + $0x20] sm:$0xff]  ;;  %v4047_v9 = vld [vmem:[#allocation10 + $0x10] sm:$0xff] }
 0x481   :  { %v6729_v35 = vcombine.high %v4046_v28, %v4049_v37  ;;  %v6728_v34 = vcombine.low %v4046_v28, %v4049_v37  ;;  %v6730_v16 = vcombine.low %v4047_v9, %v4050_v8  ;;  %v4104_v28 = vld [vmem:[#allocation10 + $0x270] sm:$0xff] }
 0x483   :  { %3937 = vmatpush2.bf16.msra.mxu1 %v6668_v14  ;;  %3990 = vmatpush2.bf16.msra.mxu0 %v6670_v18  ;;  %v6731_v14 = vcombine.high %v4047_v9, %v4050_v8  ;;  %v4136_v18 = vld [vmem:[#allocation10 + $0x3c0] sm:$0xff] }
 0x484   :  { %4654 = vmatprep.subr.bf16.mxu1 %v6771_v20  ;;  %4695 = vmatprep.subr.bf16.mxu0 %v6773_v0  ;;  %v4139_v20 = vld [vmem:[#allocation10 + $0x3e0] sm:$0xff]  ;;  %v4137_v0 = vld [vmem:[#allocation10 + $0x3d0] sm:$0xff] }
 0x485   :  { %v6819_v15 = vcombine.high %v4136_v18, %v4139_v20  ;;  %v6820_v42 = vcombine.low %v4137_v0, %v4140_v22 }
 0x486   :  { %3939 = vmatmul.mubr.bf16.vlgmr.msra.gmra.mxu1 %v9001_v46  ;;  %3992 = vmatmul.mubr.bf16.vlgmr.msra.gmra.mxu0 %v9001_v46  ;;  %v6758_v46 = vcombine.low %v4076_v49, %v4079_v36  ;;  %v4134_v49 = vld [vmem:[#allocation10 + $0x3b0] sm:$0xff]  ;;  %v6818_v36 = vcombine.low %v4136_v18, %v4139_v20 }
 0x487   :  { %3948 = vmatprep.mubr.bf16.mxu1 %v9016_v7  ;;  %4001 = vmatprep.mubr.bf16.mxu0 %v9016_v7  ;;  %v6753_v7 = vcombine.high %v4070_v44, %v4073_v38  ;;  %v4128_v44 = vld [vmem:[#allocation10 + $0x370] sm:$0xff] }
 0x488   :  { %4655 = vmatpush1.bf16.msra.mxu1 %v6770_v40  ;;  %4696 = vmatpush1.bf16.msra.mxu0 %v6772_v26  ;;  %v6821_v40 = vcombine.high %v4137_v0, %v4140_v22  ;;  %v4130_v26 = vld [vmem:[#allocation10 + $0x380] sm:$0xff]  ;;  %v4098_v18 = vld [vmem:[#allocation10 + $0x230] sm:$0xff] }
 0x489   :  { %4656 = vmatprep.subr.bf16.mxu1 %v6765_v61  ;;  %4697 = vmatprep.subr.bf16.mxu0 %v6767_v11  ;;  %v4133_v61 = vld [vmem:[#allocation10 + $0x3a0] sm:$0xff]  ;;  %v4131_v11 = vld [vmem:[#allocation10 + $0x390] sm:$0xff] }
 0x48a   :  { %v6813_v43 = vcombine.high %v4130_v26, %v4133_v61  ;;  %v6812_v38 = vcombine.low %v4130_v26, %v4133_v61  ;;  %v6814_v50 = vcombine.low %v4131_v11, %v4134_v49 }
 0x48c   :  { %4657 = vmatpush1.bf16.msra.mxu1 %v6764_v19  ;;  %4698 = vmatpush1.bf16.msra.mxu0 %v6766_v4  ;;  %v6815_v19 = vcombine.high %v4131_v11, %v4134_v49  ;;  %v4124_v4 = vld [vmem:[#allocation10 + $0x340] sm:$0xff]  ;;  %v4084_v11 = vld [vmem:[#allocation10 + $0x198] sm:$0xff] }
 0x48d   :  { %4658 = vmatprep.subr.bf16.mxu1 %v6759_v21  ;;  %4699 = vmatprep.subr.bf16.mxu0 %v6761_v30  ;;  %v4127_v21 = vld [vmem:[#allocation10 + $0x360] sm:$0xff]  ;;  %v4125_v30 = vld [vmem:[#allocation10 + $0x350] sm:$0xff]  ;;  %v4087_v49 = vld [vmem:[#allocation10 + $0x1b8] sm:$0xff] }
 0x48e   :  { %3949 = vmatmul.mubr.bf16.gmra.mxu1 %v9019_v58  ;;  %4002 = vmatmul.mubr.bf16.gmra.mxu0 %v9019_v58  ;;  %v6746_v58 = vcombine.low %v4064_v29, %v4067_v3  ;;  %v6807_v53 = vcombine.high %v4124_v4, %v4127_v21  ;;  %v4122_v29 = vld [vmem:[#allocation10 + $0x330] sm:$0xff]  ;;  %v6806_v3 = vcombine.low %v4124_v4, %v4127_v21  ;;  %v4081_v4 = vld [vmem:[#allocation10 + $0x178] sm:$0xff] }
 0x48f   :  { %4686 = vmatprep.mubr.bf16.mxu1 %v9031_v45  ;;  %4727 = vmatprep.mubr.bf16.mxu0 %v9031_v45  ;;  %v6808_v60 = vcombine.low %v4125_v30, %v4128_v44  ;;  %v6768_v21 = vcombine.low %v4084_v11, %v4087_v49 }
 0x490   :  { %4659 = vmatpush1.bf16.msra.mxu1 %v6758_v46  ;;  %4700 = vmatpush1.bf16.msra.mxu0 %v6760_v25  ;;  %v6809_v46 = vcombine.high %v4125_v30, %v4128_v44  ;;  %v4118_v25 = vld [vmem:[#allocation10 + $0x300] sm:$0xff]  ;;  %v4072_v44 = vld [vmem:[#allocation10 + $0x118] sm:$0xff] }
 0x491   :  { %4660 = vmatprep.subr.bf16.mxu1 %v6753_v7  ;;  %4701 = vmatprep.subr.bf16.mxu0 %v6755_v51  ;;  %v4121_v7 = vld [vmem:[#allocation10 + $0x320] sm:$0xff]  ;;  %v4119_v51 = vld [vmem:[#allocation10 + $0x310] sm:$0xff] }
 0x492   :  { %v6801_v63 = vcombine.high %v4118_v25, %v4121_v7  ;;  %v6800_v52 = vcombine.low %v4118_v25, %v4121_v7  ;;  %v6802_v10 = vcombine.low %v4119_v51, %v4122_v29 }
 0x494   :  { %4661 = vmatpush1.bf16.msra.mxu1 %v6752_v13  ;;  %4702 = vmatpush1.bf16.msra.mxu0 %v6754_v55  ;;  %v6803_v13 = vcombine.high %v4119_v51, %v4122_v29  ;;  %v4112_v55 = vld [vmem:[#allocation10 + $0x2c0] sm:$0xff]  ;;  %v4060_v51 = vld [vmem:[#allocation10 + $0x98] sm:$0xff] }
 0x495   :  { %4662 = vmatprep.subr.bf16.mxu1 %v6747_v17  ;;  %4703 = vmatprep.subr.bf16.mxu0 %v6749_v24  ;;  %v4115_v17 = vld [vmem:[#allocation10 + $0x2e0] sm:$0xff]  ;;  %v4113_v24 = vld [vmem:[#allocation10 + $0x2d0] sm:$0xff]  ;;  %v4063_v29 = vld [vmem:[#allocation10 + $0xb8] sm:$0xff] }
 0x496   :  { %v6795_v31 = vcombine.high %v4112_v55, %v4115_v17  ;;  %v6794_v56 = vcombine.low %v4112_v55, %v4115_v17  ;;  %v6796_v27 = vcombine.low %v4113_v24, %v4116_v32  ;;  %v4048_v17 = vld [vmem:[#allocation10 + $0x18] sm:$0xff] }
 0x498   :  { %4663 = vmatpush1.bf16.msra.mxu1 %v6746_v58  ;;  %4704 = vmatpush1.bf16.msra.mxu0 %v6748_v41  ;;  %v6797_v58 = vcombine.high %v4113_v24, %v4116_v32  ;;  %v4106_v41 = vld [vmem:[#allocation10 + $0x280] sm:$0xff]  ;;  %v4051_v24 = vld [vmem:[#allocation10 + $0x38] sm:$0xff] }
 0x499   :  { %4664 = vmatprep.subr.bf16.mxu1 %v6741_v54  ;;  %4705 = vmatprep.subr.bf16.mxu0 %v6743_v39  ;;  %v4109_v54 = vld [vmem:[#allocation10 + $0x2a0] sm:$0xff]  ;;  %v4107_v39 = vld [vmem:[#allocation10 + $0x290] sm:$0xff] }
 0x49a   :  { %v6789_v48 = vcombine.high %v4106_v41, %v4109_v54  ;;  %v6788_v37 = vcombine.low %v4106_v41, %v4109_v54  ;;  %v6790_v9 = vcombine.low %v4107_v39, %v4110_v57  ;;  %v4132_v54 = vld [vmem:[#allocation10 + $0x398] sm:$0xff] }
 0x49c   :  { %4665 = vmatpush1.bf16.msra.mxu1 %v6740_v47  ;;  %4706 = vmatpush1.bf16.msra.mxu0 %v6742_v33  ;;  %v6791_v47 = vcombine.high %v4107_v39, %v4110_v57  ;;  %v4100_v33 = vld [vmem:[#allocation10 + $0x240] sm:$0xff]  ;;  %v4135_v39 = vld [vmem:[#allocation10 + $0x3b8] sm:$0xff] }
 0x49d   :  { %4666 = vmatprep.subr.bf16.mxu1 %v6735_v2  ;;  %4707 = vmatprep.subr.bf16.mxu0 %v6737_v23  ;;  %v4103_v2 = vld [vmem:[#allocation10 + $0x260] sm:$0xff]  ;;  %v4101_v23 = vld [vmem:[#allocation10 + $0x250] sm:$0xff] }
 0x49e   :  { %v6783_v8 = vcombine.high %v4100_v33, %v4103_v2  ;;  %v6782_v20 = vcombine.low %v4100_v33, %v4103_v2  ;;  %v6784_v0 = vcombine.low %v4101_v23, %v4104_v28  ;;  %v4120_v2 = vld [vmem:[#allocation10 + $0x318] sm:$0xff] }
 0x4a0   :  { %4667 = vmatpush1.bf16.msra.mxu1 %v6734_v1  ;;  %4708 = vmatpush1.bf16.msra.mxu0 %v6736_v62  ;;  %v6785_v1 = vcombine.high %v4101_v23, %v4104_v28  ;;  %v4094_v62 = vld [vmem:[#allocation10 + $0x200] sm:$0xff]  ;;  %v4123_v23 = vld [vmem:[#allocation10 + $0x338] sm:$0xff] }
 0x4a1   :  { %4668 = vmatprep.subr.bf16.mxu1 %v6729_v35  ;;  %4709 = vmatprep.subr.bf16.mxu0 %v6731_v14  ;;  %v4097_v35 = vld [vmem:[#allocation10 + $0x220] sm:$0xff]  ;;  %v4095_v14 = vld [vmem:[#allocation10 + $0x210] sm:$0xff] }
 0x4a2   :  { %v6777_v22 = vcombine.high %v4094_v62, %v4097_v35  ;;  %v6778_v26 = vcombine.low %v4095_v14, %v4098_v18 }
 0x4a4   :  { %4669 = vmatpush1.bf16.msra.mxu1 %v6728_v34  ;;  %4710 = vmatpush1.bf16.msra.mxu0 %v6730_v16  ;;  %v6779_v34 = vcombine.high %v4095_v14, %v4098_v18  ;;  %v4090_v16 = vld [vmem:[#allocation10 + $0x1d8] sm:$0xff] }
 0x4a5   :  { %4670 = vmatprep.subr.bf16.mxu1 %v6819_v15  ;;  %4711 = vmatprep.subr.bf16.mxu0 %v6821_v40  ;;  %v4093_v15 = vld [vmem:[#allocation10 + $0x1f8] sm:$0xff]  ;;  %v6776_v40 = vcombine.low %v4094_v62, %v4097_v35 }
 0x4a6   :  { %v6775_v61 = vcombine.high %v4090_v16, %v4093_v15  ;;  %v4108_v35 = vld [vmem:[#allocation10 + $0x298] sm:$0xff] }
 0x4a7   :  { %v4111_v14 = vld [vmem:[#allocation10 + $0x2b8] sm:$0xff] }
 0x4a8   :  { %4671 = vmatpush2.bf16.msra.mxu1 %v6818_v36  ;;  %4712 = vmatpush2.bf16.msra.mxu0 %v6820_v42  ;;  %v6774_v36 = vcombine.low %v4090_v16, %v4093_v15  ;;  %v9039_v42 = vpack.c.bf16 %v9011_v12, %v9011_v12  ;;  %v4096_v15 = vld [vmem:[#allocation10 + $0x218] sm:$0xff] }
 0x4a9   :  { %4672 = vmatprep.subr.bf16.mxu1 %v6813_v43  ;;  %4713 = vmatprep.subr.bf16.mxu0 %v6815_v19  ;;  %v6769_v43 = vcombine.high %v4084_v11, %v4087_v49  ;;  %v4078_v19 = vld [vmem:[#allocation10 + $0x158] sm:$0xff]  ;;  %v3130_v11 = vsub.s32 2, %v8719_v6 }
 0x4aa   :  { %v6763_v30 = vcombine.high %v4078_v19, %v4081_v4 }
 0x4ac   :  { %4673 = vmatpush2.bf16.msra.mxu1 %v6812_v38  ;;  %4714 = vmatpush2.bf16.msra.mxu0 %v6814_v50  ;;  %v4075_v38 = vld [vmem:[#allocation10 + $0x138] sm:$0xff]  ;;  %v6762_v50 = vcombine.low %v4078_v19, %v4081_v4 }
 0x4ad   :  { %4674 = vmatprep.subr.bf16.mxu1 %v6807_v53  ;;  %4715 = vmatprep.subr.bf16.mxu0 %v6809_v46  ;;  %v6757_v12 = vcombine.high %v4072_v44, %v4075_v38  ;;  %v4066_v53 = vld [vmem:[#allocation10 + $0xd8] sm:$0xff]  ;;  %v6756_v25 = vcombine.low %v4072_v44, %v4075_v38 }
 0x4ae   :  { %v4069_v46 = vld [vmem:[#allocation10 + $0xf8] sm:$0xff] }
 0x4af   :  { %v6751_v7 = vcombine.high %v4066_v53, %v4069_v46 }
 0x4b0   :  { %4675 = vmatpush2.bf16.msra.mxu1 %v6806_v3  ;;  %4716 = vmatpush2.bf16.msra.mxu0 %v6808_v60  ;;  %v6750_v3 = vcombine.low %v4066_v53, %v4069_v46  ;;  %v4054_v60 = vld [vmem:[#allocation10 + $0x58] sm:$0xff] }
 0x4b1   :  { %4676 = vmatprep.subr.bf16.mxu1 %v6801_v63  ;;  %4717 = vmatprep.subr.bf16.mxu0 %v6803_v13  ;;  %v4057_v63 = vld [vmem:[#allocation10 + $0x78] sm:$0xff]  ;;  %v6744_v13 = vcombine.low %v4060_v51, %v4063_v29 }
 0x4b2   :  { %v6739_v55 = vcombine.high %v4054_v60, %v4057_v63  ;;  %v6738_v32 = vcombine.low %v4054_v60, %v4057_v63 }
 0x4b4   :  { %4677 = vmatpush2.bf16.msra.mxu1 %v6800_v52  ;;  %4718 = vmatpush2.bf16.msra.mxu0 %v6802_v10  ;;  %v6733_v52 = vcombine.high %v4048_v17, %v4051_v24  ;;  %v4138_v10 = vld [vmem:[#allocation10 + $0x3d8] sm:$0xff] }
 0x4b5   :  { %4678 = vmatprep.subr.bf16.mxu1 %v6795_v31  ;;  %4719 = vmatprep.subr.bf16.mxu0 %v6797_v58  ;;  %v4141_v31 = vld [vmem:[#allocation10 + $0x3f8] sm:$0xff]  ;;  %v6732_v58 = vcombine.low %v4048_v17, %v4051_v24 }
 0x4b6   :  { %v6823_v41 = vcombine.high %v4138_v10, %v4141_v31  ;;  %v6822_v57 = vcombine.low %v4138_v10, %v4141_v31 }
 0x4b8   :  { %4679 = vmatpush2.bf16.msra.mxu1 %v6794_v56  ;;  %4720 = vmatpush2.bf16.msra.mxu0 %v6796_v27  ;;  %v6817_v56 = vcombine.high %v4132_v54, %v4135_v39  ;;  %v4126_v27 = vld [vmem:[#allocation10 + $0x358] sm:$0xff] }
 0x4b9   :  { %4680 = vmatprep.subr.bf16.mxu1 %v6789_v48  ;;  %4721 = vmatprep.subr.bf16.mxu0 %v6791_v47  ;;  %v4129_v48 = vld [vmem:[#allocation10 + $0x378] sm:$0xff]  ;;  %v6816_v47 = vcombine.low %v4132_v54, %v4135_v39 }
 0x4ba   :  { %v6811_v33 = vcombine.high %v4126_v27, %v4129_v48  ;;  %v6810_v28 = vcombine.low %v4126_v27, %v4129_v48 }
 0x4bc   :  { %4681 = vmatpush2.bf16.msra.mxu1 %v6788_v37  ;;  %4722 = vmatpush2.bf16.msra.mxu0 %v6790_v9  ;;  %v6805_v37 = vcombine.high %v4120_v2, %v4123_v23  ;;  %v4114_v9 = vld [vmem:[#allocation10 + $0x2d8] sm:$0xff] }
 0x4bd   :  { %4682 = vmatprep.subr.bf16.mxu1 %v6783_v8  ;;  %4723 = vmatprep.subr.bf16.mxu0 %v6785_v1  ;;  %v4117_v8 = vld [vmem:[#allocation10 + $0x2f8] sm:$0xff]  ;;  %v6804_v1 = vcombine.low %v4120_v2, %v4123_v23  ;;  %v3146_v2 = vsub.s32 6, %v8719_v6  ;;  %v3142_v23 = vsub.s32 5, %v8719_v6 }
 0x4be   :  { %v6799_v62 = vcombine.high %v4114_v9, %v4117_v8  ;;  %v6798_v18 = vcombine.low %v4114_v9, %v4117_v8 }
 0x4c0   :  { %4683 = vmatpush2.bf16.msra.mxu1 %v6782_v20  ;;  %4724 = vmatpush2.bf16.msra.mxu0 %v6784_v0  ;;  %v6793_v20 = vcombine.high %v4108_v35, %v4111_v14  ;;  %v4102_v0 = vld [vmem:[#allocation10 + $0x258] sm:$0xff] }
 0x4c1   :  { %4684 = vmatprep.subr.bf16.mxu1 %v6777_v22  ;;  %4725 = vmatprep.subr.bf16.mxu0 %v6779_v34  ;;  %v4105_v22 = vld [vmem:[#allocation10 + $0x278] sm:$0xff]  ;;  %v6792_v34 = vcombine.low %v4108_v35, %v4111_v14 }
 0x4c2   :  { %v6787_v16 = vcombine.high %v4102_v0, %v4105_v22 }
 0x4c4   :  { %4685 = vmatpush2.bf16.msra.mxu1 %v6776_v40  ;;  %4726 = vmatpush2.bf16.msra.mxu0 %v6778_v26  ;;  %v4099_v40 = vld [vmem:[#allocation10 + $0x238] sm:$0xff]  ;;  %v6786_v26 = vcombine.low %v4102_v0, %v4105_v22 }
 0x4c5   :  { %4736 = vmatprep.subr.bf16.mxu1 %v6775_v61  ;;  %v6781_v61 = vcombine.high %v4096_v15, %v4099_v40  ;;  %v6780_v49 = vcombine.low %v4096_v15, %v4099_v40 }
 0x4c7   :  { %4687 = vmatmul.mubr.bf16.vlgmr.msra.gmra.mxu1 %v9039_v42  ;;  %4728 = vmatmul.mubr.bf16.vlgmr.msra.gmra.mxu0 %v9039_v42 }
 0x4c8   :  { %4737 = vmatpush1.bf16.msra.mxu1 %v6774_v36  ;;  %4768 = vmatprep.mubr.bf16.mxu1 %v9031_v45  ;;  %v6745_v45 = vcombine.high %v4060_v51, %v4063_v29  ;;  %v9048_v36 = vld [vmem:[%s9210_s11] sm:$0xff] }
 0x4c9   :  { %4738 = vmatprep.subr.bf16.mxu1 %v6769_v43  ;;  %v3134_v43 = vsub.s32 3, %v8719_v6  ;;  %v3123_v19 = vrot.slane %v9048_v36, %v8726_v5  ;;  %v3131_v4 = vrot.slane %v9048_v36, %v3130_v11  ;;  %v3147_v9 = vrot.slane %v9048_v36, %v3146_v2 }
 0x4ca   :  { %v3143_v8 = vrot.slane %v9048_v36, %v3142_v23 }
 0x4cc   :  { %4739 = vmatpush1.bf16.msra.mxu1 %v6768_v21  ;;  %v3127_v21 = vrot.slane %v9048_v36, %v8734_v59 }
 0x4cd   :  { %4740 = vmatprep.subr.bf16.mxu1 %v6763_v30  ;;  %v3135_v30 = vrot.slane %v9048_v36, %v3134_v43 }
 0x4d0   :  { %4741 = vmatpush1.bf16.msra.mxu1 %v6762_v50 }
 0x4d1   :  { %4742 = vmatprep.subr.bf16.mxu1 %v6757_v12 }
 0x4d4   :  { %4743 = vmatpush1.bf16.msra.mxu1 %v6756_v25 }
 0x4d5   :  { %4744 = vmatprep.subr.bf16.mxu1 %v6751_v7 }
 0x4d8   :  { %4745 = vmatpush1.bf16.msra.mxu1 %v6750_v3 }
 0x4d9   :  { %4746 = vmatprep.subr.bf16.mxu1 %v6745_v45 }
 0x4dc   :  { %4747 = vmatpush1.bf16.msra.mxu1 %v6744_v13 }
 0x4dd   :  { %4748 = vmatprep.subr.bf16.mxu1 %v6739_v55 }
 0x4e0   :  { %4749 = vmatpush1.bf16.msra.mxu1 %v6738_v32 }
 0x4e1   :  { %4750 = vmatprep.subr.bf16.mxu1 %v6733_v52 }
 0x4e4   :  { %4751 = vmatpush1.bf16.msra.mxu1 %v6732_v58 }
 0x4e5   :  { %4752 = vmatprep.subr.bf16.mxu1 %v6823_v41 }
 0x4e8   :  { %4753 = vmatpush2.bf16.msra.mxu1 %v6822_v57 }
 0x4e9   :  { %4754 = vmatprep.subr.bf16.mxu1 %v6817_v56 }
 0x4ec   :  { %4755 = vmatpush2.bf16.msra.mxu1 %v6816_v47 }
 0x4ed   :  { %4756 = vmatprep.subr.bf16.mxu1 %v6811_v33  ;;  %v3138_v33 = vsub.s32 4, %v8719_v6 }
 0x4f0   :  { %4757 = vmatpush2.bf16.msra.mxu1 %v6810_v28  ;;  %v3150_v28 = vsub.s32 7, %v8719_v6 }
 0x4f1   :  { %4758 = vmatprep.subr.bf16.mxu1 %v6805_v37  ;;  %v3139_v37 = vrot.slane %v9048_v36, %v3138_v33 }
 0x4f4   :  { %4759 = vmatpush2.bf16.msra.mxu1 %v6804_v1  ;;  %v3151_v1 = vrot.slane %v9048_v36, %v3150_v28 }
 0x4f5   :  { %4760 = vmatprep.subr.bf16.mxu1 %v6799_v62 }
 0x4f8   :  { %4761 = vmatpush2.bf16.msra.mxu1 %v6798_v18 }
 0x4f9   :  { %4762 = vmatprep.subr.bf16.mxu1 %v6793_v20 }
 0x4fc   :  { %4763 = vmatpush2.bf16.msra.mxu1 %v6792_v34 }
 0x4fd   :  { %4764 = vmatprep.subr.bf16.mxu1 %v6787_v16 }
 0x500   :  { %4765 = vmatpush2.bf16.msra.mxu1 %v6786_v26 }
 0x501   :  { %4766 = vmatprep.subr.bf16.mxu1 %v6781_v61 }
 0x504   :  { %4767 = vmatpush2.bf16.msra.mxu1 %v6780_v49 }
 0x506   :  { %v3834_v44 = vpop.f32.mrf.mxu1  ;;  %v3887_v38 = vpop.f32.mrf.mxu0 }
 0x507   :  { %4769 = vmatmul.mubr.bf16.vlgmr.msra.gmra.mxu1 %v9039_v42  ;;  %v3835_v50 = vadd.f32 %v3834_v44, %v3123_v19  ;;  %v3888_v12 = vadd.f32 %v3887_v38, %v3131_v4 }
 0x508   :  { %v3836_v53 = vpop.f32.mrf.mxu1  ;;  %v3889_v46 = vpop.f32.mrf.mxu0 }
 0x509   :  { %4012 = vst [vmem:[#allocation2] sm:$0xff] %v3835_v50  ;;  %4014 = vst [vmem:[#allocation2 + $0x10] sm:$0xff] %v3888_v12  ;;  %v3837_v25 = vadd.f32 %v3836_v53, %v3127_v21  ;;  %v3890_v7 = vadd.f32 %v3889_v46, %v3135_v30 }
 0x50a   :  { %v3838_v51 = vpop.f32.mrf.mxu1  ;;  %v3891_v29 = vpop.f32.mrf.mxu0 }
 0x50b   :  { %4013 = vst [vmem:[#allocation2 + $0x8] sm:$0xff] %v3837_v25  ;;  %4015 = vst [vmem:[#allocation2 + $0x18] sm:$0xff] %v3890_v7  ;;  %v3839_v3 = vadd.f32 %v3838_v51, %v3123_v19  ;;  %v3892_v45 = vadd.f32 %v3891_v29, %v3131_v4 }
 0x50c   :  { %v3840_v60 = vpop.f32.mrf.mxu1  ;;  %v3893_v63 = vpop.f32.mrf.mxu0 }
 0x50d   :  { %4020 = vst [vmem:[#allocation2 + $0x40] sm:$0xff] %v3839_v3  ;;  %4022 = vst [vmem:[#allocation2 + $0x50] sm:$0xff] %v3892_v45  ;;  %v3841_v13 = vadd.f32 %v3840_v60, %v3127_v21  ;;  %v3894_v42 = vadd.f32 %v3893_v63, %v3135_v30  ;;  %v4142_v45 = vld [vmem:[%s9212_s13] sm:$0xff]  ;;  %s9095_s13 = smov 0  }
 0x50e   :  { %v3844_v55 = vpop.f32.mrf.mxu1  ;;  %v3897_v17 = vpop.f32.mrf.mxu0  ;;  %v4159_v60 = vrot.slane %v4142_v45, %v3142_v23 }
 0x50f   :  { %4021 = vst [vmem:[#allocation2 + $0x48] sm:$0xff] %v3841_v13  ;;  %4023 = vst [vmem:[#allocation2 + $0x58] sm:$0xff] %v3894_v42  ;;  %v3845_v24 = vadd.f32 %v3844_v55, %v3123_v19  ;;  %v3898_v32 = vadd.f32 %v3897_v17, %v3131_v4 }
 0x510   :  { %v3846_v52 = vpop.f32.mrf.mxu1  ;;  %v3899_v10 = vpop.f32.mrf.mxu0 }
 0x511   :  { %4028 = vst [vmem:[#allocation2 + $0x80] sm:$0xff] %v3845_v24  ;;  %4030 = vst [vmem:[#allocation2 + $0x90] sm:$0xff] %v3898_v32  ;;  %v3847_v31 = vadd.f32 %v3846_v52, %v3127_v21  ;;  %v3900_v58 = vadd.f32 %v3899_v10, %v3135_v30 }
 0x512   :  { %v3848_v41 = vpop.f32.mrf.mxu1  ;;  %v3901_v54 = vpop.f32.mrf.mxu0 }
 0x513   :  { %4029 = vst [vmem:[#allocation2 + $0x88] sm:$0xff] %v3847_v31  ;;  %4031 = vst [vmem:[#allocation2 + $0x98] sm:$0xff] %v3900_v58  ;;  %v3849_v39 = vadd.f32 %v3848_v41, %v3123_v19  ;;  %v3902_v57 = vadd.f32 %v3901_v54, %v3131_v4  ;;  %v4147_v31 = vrot.slane %v4142_v45, %v8726_v5 }
 0x514   :  { %v3850_v56 = vpop.f32.mrf.mxu1  ;;  %v3903_v27 = vpop.f32.mrf.mxu0  ;;  %v4151_v58 = vrot.slane %v4142_v45, %v8734_v59  ;;  %v4167_v5 = vrot.slane %v4142_v45, %v3150_v28 }
 0x515   :  { %4036 = vst [vmem:[#allocation2 + $0xc0] sm:$0xff] %v3849_v39  ;;  %4038 = vst [vmem:[#allocation2 + $0xd0] sm:$0xff] %v3902_v57  ;;  %v3851_v48 = vadd.f32 %v3850_v56, %v3127_v21  ;;  %v3904_v47 = vadd.f32 %v3903_v27, %v3135_v30  ;;  %v4155_v27 = vrot.slane %v4142_v45, %v3138_v33 }
 0x517   :  { %4037 = vst [vmem:[#allocation2 + $0xc8] sm:$0xff] %v3851_v48  ;;  %4039 = vst [vmem:[#allocation2 + $0xd8] sm:$0xff] %v3904_v47 }
 0x546   :  { %v3940_v62 = vpop.f32.mrf.mxu1  ;;  %v3993_v35 = vpop.f32.mrf.mxu0 }
 0x547   :  { %v3941_v14 = vadd.f32 %v3940_v62, %v3139_v37  ;;  %v3994_v18 = vadd.f32 %v3993_v35, %v3147_v9 }
 0x548   :  { %v3942_v20 = vpop.f32.mrf.mxu1  ;;  %v3995_v0 = vpop.f32.mrf.mxu0 }
 0x549   :  { %4016 = vst [vmem:[#allocation2 + $0x20] sm:$0xff] %v3941_v14  ;;  %4018 = vst [vmem:[#allocation2 + $0x30] sm:$0xff] %v3994_v18  ;;  %v3943_v22 = vadd.f32 %v3942_v20, %v3143_v8  ;;  %v3996_v34 = vadd.f32 %v3995_v0, %v3151_v1 }
 0x54a   :  { %v3944_v16 = vpop.f32.mrf.mxu1  ;;  %v3997_v15 = vpop.f32.mrf.mxu0 }
 0x54b   :  { %4017 = vst [vmem:[#allocation2 + $0x28] sm:$0xff] %v3943_v22  ;;  %4019 = vst [vmem:[#allocation2 + $0x38] sm:$0xff] %v3996_v34  ;;  %v3945_v40 = vadd.f32 %v3944_v16, %v3139_v37  ;;  %v3998_v26 = vadd.f32 %v3997_v15, %v3147_v9 }
 0x54c   :  { %v3946_v61 = vpop.f32.mrf.mxu1  ;;  %v3999_v11 = vpop.f32.mrf.mxu0 }
 0x54d   :  { %4024 = vst [vmem:[#allocation2 + $0x60] sm:$0xff] %v3945_v40  ;;  %4026 = vst [vmem:[#allocation2 + $0x70] sm:$0xff] %v3998_v26  ;;  %v3947_v49 = vadd.f32 %v3946_v61, %v3143_v8  ;;  %v4000_v36 = vadd.f32 %v3999_v11, %v3151_v1 }
 0x54e   :  { %v3950_v43 = vpop.f32.mrf.mxu1  ;;  %v4003_v19 = vpop.f32.mrf.mxu0 }
 0x54f   :  { %4025 = vst [vmem:[#allocation2 + $0x68] sm:$0xff] %v3947_v49  ;;  %4027 = vst [vmem:[#allocation2 + $0x78] sm:$0xff] %v4000_v36  ;;  %v3951_v4 = vadd.f32 %v3950_v43, %v3139_v37  ;;  %v4004_v21 = vadd.f32 %v4003_v19, %v3147_v9  ;;  %v9087_v19 = vmov 0.0  }
 0x550   :  { %v3952_v30 = vpop.f32.mrf.mxu1  ;;  %v4005_v44 = vpop.f32.mrf.mxu0 }
 0x551   :  { %4032 = vst [vmem:[#allocation2 + $0xa0] sm:$0xff] %v3951_v4  ;;  %4034 = vst [vmem:[#allocation2 + $0xb0] sm:$0xff] %v4004_v21  ;;  %v3953_v38 = vadd.f32 %v3952_v30, %v3143_v8  ;;  %v4006_v50 = vadd.f32 %v4005_v44, %v3151_v1  ;;  %v9089_v4 = vmov 0.0   ;;  %v9091_v21 = vmov 0.0  }
 0x552   :  { %v3954_v12 = vpop.f32.mrf.mxu1  ;;  %v4007_v53 = vpop.f32.mrf.mxu0  ;;  %v9093_v30 = vmov 0.0  }
 0x553   :  { %4033 = vst [vmem:[#allocation2 + $0xa8] sm:$0xff] %v3953_v38  ;;  %4035 = vst [vmem:[#allocation2 + $0xb8] sm:$0xff] %v4006_v50  ;;  %v3955_v46 = vadd.f32 %v3954_v12, %v3139_v37  ;;  %v4008_v25 = vadd.f32 %v4007_v53, %v3147_v9  ;;  %v4163_v37 = vrot.slane %v4142_v45, %v3146_v2 }
 0x554   :  { %v3956_v7 = vpop.f32.mrf.mxu1  ;;  %v4009_v51 = vpop.f32.mrf.mxu0 }
 0x555   :  { %4040 = vst [vmem:[#allocation2 + $0xe0] sm:$0xff] %v3955_v46  ;;  %4042 = vst [vmem:[#allocation2 + $0xf0] sm:$0xff] %v4008_v25  ;;  %v3957_v29 = vadd.f32 %v3956_v7, %v3143_v8  ;;  %v4010_v3 = vadd.f32 %v4009_v51, %v3151_v1 }
 0x557   :  { %4041 = vst [vmem:[#allocation2 + $0xe8] sm:$0xff] %v3957_v29  ;;  %4043 = vst [vmem:[#allocation2 + $0xf8] sm:$0xff] %v4010_v3 }
 0x587   :  { %v4688_v63 = vpop.f32.mrf.mxu1  ;;  %v4729_v13 = vpop.f32.mrf.mxu0 }
 0x588   :  { %v4689_v41 = vadd.f32 %v4688_v63, %v4147_v31  ;;  %v4730_v23 = vadd.f32 %v4729_v13, %v4155_v27 }
 0x589   :  { %v4690_v42 = vpop.f32.mrf.mxu1  ;;  %v4731_v55 = vpop.f32.mrf.mxu0 }
 0x58a   :  { %v4732_v17 = vadd.f32 %v4731_v55, %v4159_v60  ;;  %v4691_v54 = vadd.f32 %v4690_v42, %v4151_v58  ;;  %v6824_v39 = vmul.f32 -1.442695, %v4689_v41 }
 0x58b   :  { %v4692_v24 = vpop.f32.mrf.mxu1  ;;  %v4733_v32 = vpop.f32.mrf.mxu0 }
 0x58c   :  { %v6825_v57 = vmul.f32 -1.442695, %v4691_v54  ;;  %7745 = vpow2.f32 %v6824_v39 }
 0x58d   :  { %v4693_v52 = vpop.f32.mrf.mxu1  ;;  %v4734_v10 = vpop.f32.mrf.mxu0 }
 0x58e   :  { %7747 = vpow2.f32 %v6825_v57 }
 0x599   :  { %v7746_v56 = vpop.eup %7745 }
 0x59a   :  { %v4783_v47 = vadd.f32 1.0, %v7746_v56 }
 0x59b   :  { %v7748_v48 = vpop.eup %7747 }
 0x59c   :  { %v4784_v9 = vadd.f32 1.0, %v7748_v48  ;;  %7749 = vrcp.f32 %v4783_v47 }
 0x59d   :  { %7751 = vtanh.f32 %v4730_v23 }
 0x59e   :  { %7753 = vrcp.f32 %v4784_v9 }
 0x59f   :  { %7755 = vtanh.f32 %v4732_v17 }
 0x5a9   :  { %v7750_v20 = vpop.eup %7749 }
 0x5aa   :  { %v7752_v2 = vpop.eup %7751 }
 0x5ab   :  { %v7754_v0 = vpop.eup %7753  ;;  %v4803_v22 = vmul.f32 %v7752_v2, %v7750_v20 }
 0x5ac   :  { %v7756_v6 = vpop.eup %7755 }
 0x5ad   :  { %v4804_v34 = vmul.f32 %v7756_v6, %v7754_v0 }
 0x5c7   :  { %v4770_v59 = vpop.f32.mrf.mxu1 }
 0x5c8   :  { %v4771_v8 = vadd.f32 %v4770_v59, %v4163_v37 }
 0x5c9   :  { %v4772_v1 = vpop.f32.mrf.mxu1 }
 0x5ca   :  { %v6826_v62 = vmul.f32 -1.442695, %v4771_v8  ;;  %v4773_v35 = vadd.f32 %v4772_v1, %v4167_v5 }
 0x5cb   :  { %v4774_v33 = vpop.f32.mrf.mxu1 }
 0x5cc   :  { %7757 = vpow2.f32 %v6826_v62  ;;  %v6827_v14 = vmul.f32 -1.442695, %v4773_v35 }
 0x5cd   :  { %v4775_v18 = vpop.f32.mrf.mxu1 }
 0x5ce   :  { %7759 = vpow2.f32 %v6827_v14 }
 0x5cf   :  { %7761 = vtanh.f32 %v4803_v22 }
 0x5d9   :  { %v7758_v28 = vpop.eup %7757 }
 0x5da   :  { %v4797_v16 = vadd.f32 1.0, %v7758_v28 }
 0x5db   :  { %v7760_v15 = vpop.eup %7759 }
 0x5dc   :  { %7763 = vrcp.f32 %v4797_v16  ;;  %v4798_v40 = vadd.f32 1.0, %v7760_v15  ;;  %v7762_v26 = vpop.eup %7761 }
 0x5dd   :  { %7765 = vtanh.f32 %v4804_v34 }
 0x5de   :  { %7767 = vrcp.f32 %v4798_v40 }
 0x5e9   :  { %v7764_v61 = vpop.eup %7763 }
 0x5ea   :  { %v7766_v11 = vpop.eup %7765  ;;  %v9083_v49 = vmul.f32 %v7764_v61, %v7762_v26 }
 0x5eb   :  { %v7768_v36 = vpop.eup %7767 }
 0x5ec   :  { %v9085_v43 = vmul.f32 %v7768_v36, %v7766_v11 }
 0x5ed LB: > { %v4888_v44 = vld [vmem:[#allocation8 + $0x1c0] sm:$0xff]  ;;  %v4889_v50 = vld [vmem:[#allocation8 + $0x1c8] sm:$0xff]  ;;  %v9110_v24 = vpack.c.bf16 %v7999_v21, %v7999_v21  ;;  %s7006_s23 = sshll.u32 %s8007_s13, 6  ;;  %s4814_s13 = sadd.s32 1, %s8007_s13   ;;  %s8007_s13 = sphi %s9095_s13, %s4814_s13   ;;  %v8003_v30 = vphi %v9093_v30, %v9247_v30   ;;  %v7999_v21 = vphi %v9091_v21, %v9246_v21   ;;  %v7995_v4 = vphi %v9089_v4, %v5814_v4   ;;  %v7991_v19 = vphi %v9087_v19, %v5815_v19  }
 0x5ee   : > { %v4892_v38 = vld [vmem:[#allocation8 + $0x1e0] sm:$0xff]  ;;  %v4893_v53 = vld [vmem:[#allocation8 + $0x1e8] sm:$0xff]  ;;  %s9125_s3 = scalar_lea.vmem [#allocation2], %s7006_s23  ;;  %p4811_p2 = scmp.ge.s32.totalorder %s4814_s13, 4  }
 0x5ef   : > { %v6887_v12 = vcombine.high %v4888_v44, %v4892_v38  ;;  %v6886_v46 = vcombine.low %v4888_v44, %v4892_v38  ;;  %v4880_v25 = vld [vmem:[#allocation8 + $0x180] sm:$0xff]  ;;  %v6889_v51 = vcombine.high %v4889_v50, %v4893_v53  ;;  %v6888_v29 = vcombine.low %v4889_v50, %v4893_v53  ;;  %v4881_v45 = vld [vmem:[#allocation8 + $0x188] sm:$0xff]  ;;  %5632 = vmatprep.mubr.bf16.mxu0 %v9110_v24 }
 0x5f0   : > { %v4884_v7 = vld [vmem:[#allocation8 + $0x1a0] sm:$0xff]  ;;  %v4885_v60 = vld [vmem:[#allocation8 + $0x1a8] sm:$0xff]  ;;  %5673 = vmatprep.mubr.bf16.mxu1 %v9110_v24  ;;  %vm8024_vm2 = vmmov (%p4811_p2), 0  }
 0x5f1   : > { %v6879_v3 = vcombine.high %v4880_v25, %v4884_v7  ;;  %v4872_v63 = vld [vmem:[#allocation8 + $0x140] sm:$0xff]  ;;  %5600 = vmatprep.subr.bf16.mxu0 %v6887_v12  ;;  %v6881_v13 = vcombine.high %v4881_v45, %v4885_v60  ;;  %v4873_v55 = vld [vmem:[#allocation8 + $0x148] sm:$0xff]  ;;  %5641 = vmatprep.subr.bf16.mxu1 %v6889_v51  ;;  %v6878_v32 = vcombine.low %v4880_v25, %v4884_v7 }
 0x5f2   : > { %v4876_v42 = vld [vmem:[#allocation8 + $0x160] sm:$0xff]  ;;  %v4877_v17 = vld [vmem:[#allocation8 + $0x168] sm:$0xff]  ;;  %5601 = vmatpush1.bf16.msra.mxu0 %v6886_v46  ;;  %5642 = vmatpush1.bf16.msra.mxu1 %v6888_v29  ;;  %v6880_v52 = vcombine.low %v4881_v45, %v4885_v60 }
 0x5f3   : > { %5602 = vmatprep.subr.bf16.mxu0 %v6879_v3  ;;  %v6871_v10 = vcombine.high %v4872_v63, %v4876_v42  ;;  %5643 = vmatprep.subr.bf16.mxu1 %v6881_v13  ;;  %v6873_v31 = vcombine.high %v4873_v55, %v4877_v17  ;;  %v4864_v58 = vld [vmem:[#allocation8 + $0x100] sm:$0xff]  ;;  %v4865_v54 = vld [vmem:[#allocation8 + $0x108] sm:$0xff]  ;;  %v6870_v57 = vcombine.low %v4872_v63, %v4876_v42 }
 0x5f4   : > { %v4868_v41 = vld [vmem:[#allocation8 + $0x120] sm:$0xff]  ;;  %v4869_v39 = vld [vmem:[#allocation8 + $0x128] sm:$0xff]  ;;  %v6872_v56 = vcombine.low %v4873_v55, %v4877_v17 }
 0x5f5   : > { %v6863_v27 = vcombine.high %v4864_v58, %v4868_v41  ;;  %v6865_v48 = vcombine.high %v4865_v54, %v4869_v39  ;;  %v4856_v47 = vld [vmem:[#allocation8 + $0xc0] sm:$0xff]  ;;  %v4857_v37 = vld [vmem:[#allocation8 + $0xc8] sm:$0xff]  ;;  %v6862_v5 = vcombine.low %v4864_v58, %v4868_v41  ;;  %v6864_v59 = vcombine.low %v4865_v54, %v4869_v39 }
 0x5f6   : > { %5603 = vmatpush1.bf16.msra.mxu0 %v6878_v32  ;;  %5644 = vmatpush1.bf16.msra.mxu1 %v6880_v52  ;;  %v4860_v23 = vld [vmem:[#allocation8 + $0xe0] sm:$0xff]  ;;  %v4861_v9 = vld [vmem:[#allocation8 + $0xe8] sm:$0xff] }
 0x5f7   : > { %5604 = vmatprep.subr.bf16.mxu0 %v6871_v10  ;;  %5645 = vmatprep.subr.bf16.mxu1 %v6873_v31  ;;  %v6855_v8 = vcombine.high %v4856_v47, %v4860_v23  ;;  %v6857_v1 = vcombine.high %v4857_v37, %v4861_v9  ;;  %v4848_v62 = vld [vmem:[#allocation8 + $0x80] sm:$0xff]  ;;  %v4849_v33 = vld [vmem:[#allocation8 + $0x88] sm:$0xff]  ;;  %v6854_v18 = vcombine.low %v4856_v47, %v4860_v23 }
 0x5f8   : > { %v4852_v35 = vld [vmem:[#allocation8 + $0xa0] sm:$0xff]  ;;  %v4853_v14 = vld [vmem:[#allocation8 + $0xa8] sm:$0xff]  ;;  %v6856_v20 = vcombine.low %v4857_v37, %v4861_v9 }
 0x5f9   : > { %v6847_v2 = vcombine.high %v4848_v62, %v4852_v35  ;;  %v6849_v0 = vcombine.high %v4849_v33, %v4853_v14  ;;  %v4840_v22 = vld [vmem:[#allocation8 + $0x40] sm:$0xff]  ;;  %v4841_v28 = vld [vmem:[#allocation8 + $0x48] sm:$0xff]  ;;  %v6846_v16 = vcombine.low %v4848_v62, %v4852_v35  ;;  %v6848_v15 = vcombine.low %v4849_v33, %v4853_v14 }
 0x5fa   : > { %5605 = vmatpush1.bf16.msra.mxu0 %v6870_v57  ;;  %5646 = vmatpush1.bf16.msra.mxu1 %v6872_v56  ;;  %v4844_v6 = vld [vmem:[#allocation8 + $0x60] sm:$0xff]  ;;  %v4845_v34 = vld [vmem:[#allocation8 + $0x68] sm:$0xff] }
 0x5fb   : > { %5606 = vmatprep.subr.bf16.mxu0 %v6863_v27  ;;  %5647 = vmatprep.subr.bf16.mxu1 %v6865_v48  ;;  %v6839_v40 = vcombine.high %v4840_v22, %v4844_v6  ;;  %v6841_v26 = vcombine.high %v4841_v28, %v4845_v34  ;;  %v4832_v61 = vld [vmem:[#allocation8] sm:$0xff]  ;;  %v4833_v36 = vld [vmem:[#allocation8 + $0x8] sm:$0xff]  ;;  %v6838_v44 = vcombine.low %v4840_v22, %v4844_v6 }
 0x5fc   : > { %v4836_v11 = vld [vmem:[#allocation8 + $0x20] sm:$0xff]  ;;  %v4837_v21 = vld [vmem:[#allocation8 + $0x28] sm:$0xff]  ;;  %v6840_v38 = vcombine.low %v4841_v28, %v4845_v34 }
 0x5fd   : > { %v6831_v50 = vcombine.high %v4832_v61, %v4836_v11  ;;  %v6833_v12 = vcombine.high %v4833_v36, %v4837_v21  ;;  %v4952_v53 = vld [vmem:[#allocation8 + $0x3c0] sm:$0xff]  ;;  %v4953_v25 = vld [vmem:[#allocation8 + $0x3c8] sm:$0xff]  ;;  %v6830_v51 = vcombine.low %v4832_v61, %v4836_v11  ;;  %v6832_v29 = vcombine.low %v4833_v36, %v4837_v21 }
 0x5fe   : > { %5607 = vmatpush1.bf16.msra.mxu0 %v6862_v5  ;;  %5648 = vmatpush1.bf16.msra.mxu1 %v6864_v59  ;;  %v4956_v46 = vld [vmem:[#allocation8 + $0x3e0] sm:$0xff]  ;;  %v4957_v7 = vld [vmem:[#allocation8 + $0x3e8] sm:$0xff] }
 0x5ff   : > { %5608 = vmatprep.subr.bf16.mxu0 %v6855_v8  ;;  %5649 = vmatprep.subr.bf16.mxu1 %v6857_v1  ;;  %v6951_v3 = vcombine.high %v4952_v53, %v4956_v46  ;;  %v6953_v45 = vcombine.high %v4953_v25, %v4957_v7  ;;  %v4944_v60 = vld [vmem:[#allocation8 + $0x380] sm:$0xff]  ;;  %v4945_v13 = vld [vmem:[#allocation8 + $0x388] sm:$0xff]  ;;  %v6950_v55 = vcombine.low %v4952_v53, %v4956_v46 }
 0x600   : > { %v4948_v63 = vld [vmem:[#allocation8 + $0x3a0] sm:$0xff]  ;;  %v4949_v42 = vld [vmem:[#allocation8 + $0x3a8] sm:$0xff]  ;;  %v6952_v17 = vcombine.low %v4953_v25, %v4957_v7 }
 0x601   : > { %v6943_v32 = vcombine.high %v4944_v60, %v4948_v63  ;;  %v6945_v52 = vcombine.high %v4945_v13, %v4949_v42  ;;  %v4936_v10 = vld [vmem:[#allocation8 + $0x340] sm:$0xff]  ;;  %v4937_v58 = vld [vmem:[#allocation8 + $0x348] sm:$0xff]  ;;  %v6942_v54 = vcombine.low %v4944_v60, %v4948_v63  ;;  %v6944_v39 = vcombine.low %v4945_v13, %v4949_v42  ;;  %v4891_v60 = vld [vmem:[#allocation8 + $0x1d8] sm:$0xff] }
 0x602   : > { %5609 = vmatpush1.bf16.msra.mxu0 %v6854_v18  ;;  %5650 = vmatpush1.bf16.msra.mxu1 %v6856_v20  ;;  %v4940_v31 = vld [vmem:[#allocation8 + $0x360] sm:$0xff]  ;;  %v4941_v41 = vld [vmem:[#allocation8 + $0x368] sm:$0xff]  ;;  %v4895_v63 = vld [vmem:[#allocation8 + $0x1f8] sm:$0xff] }
 0x603   : > { %5610 = vmatprep.subr.bf16.mxu0 %v6847_v2  ;;  %5651 = vmatprep.subr.bf16.mxu1 %v6849_v0  ;;  %v6935_v57 = vcombine.high %v4936_v10, %v4940_v31  ;;  %v6937_v56 = vcombine.high %v4937_v58, %v4941_v41  ;;  %v4928_v27 = vld [vmem:[#allocation8 + $0x300] sm:$0xff]  ;;  %v4929_v47 = vld [vmem:[#allocation8 + $0x308] sm:$0xff]  ;;  %v6934_v37 = vcombine.low %v4936_v10, %v4940_v31  ;;  %v4883_v31 = vld [vmem:[#allocation8 + $0x198] sm:$0xff] }
 0x604   : > { %v4932_v48 = vld [vmem:[#allocation8 + $0x320] sm:$0xff]  ;;  %v4933_v23 = vld [vmem:[#allocation8 + $0x328] sm:$0xff]  ;;  %v6936_v9 = vcombine.low %v4937_v58, %v4941_v41  ;;  %v9116_v10 = vpack.c.bf16 %v8003_v30, %v8003_v30  ;;  %v4887_v58 = vld [vmem:[#allocation8 + $0x1b8] sm:$0xff] }
 0x605   : > { %v6927_v5 = vcombine.high %v4928_v27, %v4932_v48  ;;  %v6929_v59 = vcombine.high %v4929_v47, %v4933_v23  ;;  %v4920_v8 = vld [vmem:[#allocation8 + $0x2c0] sm:$0xff]  ;;  %v4921_v62 = vld [vmem:[#allocation8 + $0x2c8] sm:$0xff]  ;;  %v6926_v33 = vcombine.low %v4928_v27, %v4932_v48  ;;  %v6928_v14 = vcombine.low %v4929_v47, %v4933_v23  ;;  %v4878_v27 = vld [vmem:[#allocation8 + $0x170] sm:$0xff] }
 0x606   : > { %5611 = vmatpush1.bf16.msra.mxu0 %v6846_v16  ;;  %5652 = vmatpush1.bf16.msra.mxu1 %v6848_v15  ;;  %v4924_v1 = vld [vmem:[#allocation8 + $0x2e0] sm:$0xff]  ;;  %v4925_v35 = vld [vmem:[#allocation8 + $0x2e8] sm:$0xff]  ;;  %v4875_v48 = vld [vmem:[#allocation8 + $0x158] sm:$0xff]  ;;  %v6884_v23 = vcombine.low %v4883_v31, %v4887_v58 }
 0x607   : > { %5612 = vmatprep.subr.bf16.mxu0 %v6839_v40  ;;  %5653 = vmatprep.subr.bf16.mxu1 %v6841_v26  ;;  %v6919_v18 = vcombine.high %v4920_v8, %v4924_v1  ;;  %v6921_v20 = vcombine.high %v4921_v62, %v4925_v35  ;;  %v4912_v2 = vld [vmem:[#allocation8 + $0x280] sm:$0xff]  ;;  %v4913_v22 = vld [vmem:[#allocation8 + $0x288] sm:$0xff]  ;;  %v6918_v28 = vcombine.low %v4920_v8, %v4924_v1  ;;  %v4879_v47 = vld [vmem:[#allocation8 + $0x178] sm:$0xff] }
 0x608   : > { %v4916_v0 = vld [vmem:[#allocation8 + $0x2a0] sm:$0xff]  ;;  %v4917_v6 = vld [vmem:[#allocation8 + $0x2a8] sm:$0xff]  ;;  %v6920_v34 = vcombine.low %v4921_v62, %v4925_v35  ;;  %v4867_v8 = vld [vmem:[#allocation8 + $0x118] sm:$0xff]  ;;  %v6876_v35 = vcombine.low %v4875_v48, %v4879_v47 }
 0x609   : > { %v6911_v16 = vcombine.high %v4912_v2, %v4916_v0  ;;  %v6913_v15 = vcombine.high %v4913_v22, %v4917_v6  ;;  %v4904_v40 = vld [vmem:[#allocation8 + $0x240] sm:$0xff]  ;;  %v4905_v61 = vld [vmem:[#allocation8 + $0x248] sm:$0xff]  ;;  %v6910_v36 = vcombine.low %v4912_v2, %v4916_v0  ;;  %v6912_v21 = vcombine.low %v4913_v22, %v4917_v6  ;;  %v4871_v1 = vld [vmem:[#allocation8 + $0x138] sm:$0xff] }
 0x60a   : > { %5613 = vmatpush1.bf16.msra.mxu0 %v6838_v44  ;;  %5654 = vmatpush1.bf16.msra.mxu1 %v6840_v38  ;;  %v4908_v26 = vld [vmem:[#allocation8 + $0x260] sm:$0xff]  ;;  %v4909_v11 = vld [vmem:[#allocation8 + $0x268] sm:$0xff]  ;;  %v4859_v2 = vld [vmem:[#allocation8 + $0xd8] sm:$0xff]  ;;  %v6868_v6 = vcombine.low %v4867_v8, %v4871_v1 }
 0x60b   : > { %5614 = vmatprep.subr.bf16.mxu0 %v6831_v50  ;;  %5655 = vmatprep.subr.bf16.mxu1 %v6833_v12  ;;  %v6903_v44 = vcombine.high %v4904_v40, %v4908_v26  ;;  %v6905_v38 = vcombine.high %v4905_v61, %v4909_v11  ;;  %v4896_v50 = vld [vmem:[#allocation8 + $0x200] sm:$0xff]  ;;  %v4897_v53 = vld [vmem:[#allocation8 + $0x208] sm:$0xff]  ;;  %v6902_v25 = vcombine.low %v4904_v40, %v4908_v26  ;;  %v4863_v0 = vld [vmem:[#allocation8 + $0xf8] sm:$0xff] }
 0x60c   : > { %v4900_v12 = vld [vmem:[#allocation8 + $0x220] sm:$0xff]  ;;  %v4901_v46 = vld [vmem:[#allocation8 + $0x228] sm:$0xff]  ;;  %v6904_v7 = vcombine.low %v4905_v61, %v4909_v11  ;;  %v4855_v40 = vld [vmem:[#allocation8 + $0xb8] sm:$0xff]  ;;  %v6860_v61 = vcombine.low %v4859_v2, %v4863_v0 }
 0x60d   : > { %v6894_v13 = vcombine.low %v4896_v50, %v4900_v12  ;;  %v6896_v42 = vcombine.low %v4897_v53, %v4901_v46 }
 0x60e   : > { %5615 = vmatpush1.bf16.msra.mxu0 %v6830_v51  ;;  %5656 = vmatpush1.bf16.msra.mxu1 %v6832_v29  ;;  %v6895_v51 = vcombine.high %v4896_v50, %v4900_v12  ;;  %v6897_v29 = vcombine.high %v4897_v53, %v4901_v46  ;;  %v4847_v50 = vld [vmem:[#allocation8 + $0x78] sm:$0xff] }
 0x60f   : > { %5616 = vmatprep.subr.bf16.mxu0 %v6951_v3  ;;  %5657 = vmatprep.subr.bf16.mxu1 %v6953_v45  ;;  %v4890_v3 = vld [vmem:[#allocation8 + $0x1d0] sm:$0xff] }
 0x610   : > { %v4894_v45 = vld [vmem:[#allocation8 + $0x1f0] sm:$0xff] }
 0x611   : > { %v6890_v41 = vcombine.low %v4890_v3, %v4894_v45 }
 0x612   : > { %5617 = vmatpush2.bf16.msra.mxu0 %v6950_v55  ;;  %5658 = vmatpush2.bf16.msra.mxu1 %v6952_v17  ;;  %v6891_v55 = vcombine.high %v4890_v3, %v4894_v45  ;;  %v6893_v17 = vcombine.high %v4891_v60, %v4895_v63  ;;  %v4839_v3 = vld [vmem:[#allocation8 + $0x38] sm:$0xff] }
 0x613   : > { %5618 = vmatprep.subr.bf16.mxu0 %v6943_v32  ;;  %5659 = vmatprep.subr.bf16.mxu1 %v6945_v52  ;;  %v4882_v32 = vld [vmem:[#allocation8 + $0x190] sm:$0xff] }
 0x614   : > { %v4886_v52 = vld [vmem:[#allocation8 + $0x1b0] sm:$0xff] }
 0x615   : > { %v6882_v30 = vcombine.low %v4882_v32, %v4886_v52 }
 0x616   : > { %5619 = vmatpush2.bf16.msra.mxu0 %v6942_v54  ;;  %5660 = vmatpush2.bf16.msra.mxu1 %v6944_v39  ;;  %v6892_v54 = vcombine.low %v4891_v60, %v4895_v63  ;;  %v6883_v39 = vcombine.high %v4882_v32, %v4886_v52  ;;  %v4959_v32 = vld [vmem:[#allocation8 + $0x3f8] sm:$0xff] }
 0x617   : > { %5620 = vmatprep.subr.bf16.mxu0 %v6935_v57  ;;  %5661 = vmatprep.subr.bf16.mxu1 %v6937_v56  ;;  %v6885_v57 = vcombine.high %v4883_v31, %v4887_v58  ;;  %v4874_v56 = vld [vmem:[#allocation8 + $0x150] sm:$0xff] }
 0x618   : > { %v6874_v62 = vcombine.low %v4874_v56, %v4878_v27 }
 0x61a   : > { %5621 = vmatpush2.bf16.msra.mxu0 %v6934_v37  ;;  %5662 = vmatpush2.bf16.msra.mxu1 %v6936_v9  ;;  %v6875_v37 = vcombine.high %v4874_v56, %v4878_v27  ;;  %v6877_v9 = vcombine.high %v4875_v48, %v4879_v47  ;;  %v4951_v56 = vld [vmem:[#allocation8 + $0x3b8] sm:$0xff] }
 0x61b   : > { %5622 = vmatprep.subr.bf16.mxu0 %v6927_v5  ;;  %5663 = vmatprep.subr.bf16.mxu1 %v6929_v59  ;;  %v4866_v5 = vld [vmem:[#allocation8 + $0x110] sm:$0xff] }
 0x61c   : > { %v4870_v59 = vld [vmem:[#allocation8 + $0x130] sm:$0xff] }
 0x61d   : > { %v6866_v22 = vcombine.low %v4866_v5, %v4870_v59 }
 0x61e   : > { %5623 = vmatpush2.bf16.msra.mxu0 %v6926_v33  ;;  %5664 = vmatpush2.bf16.msra.mxu1 %v6928_v14  ;;  %v6867_v33 = vcombine.high %v4866_v5, %v4870_v59  ;;  %v6869_v14 = vcombine.high %v4867_v8, %v4871_v1  ;;  %v4943_v5 = vld [vmem:[#allocation8 + $0x378] sm:$0xff] }
 0x61f   : > { %5624 = vmatprep.subr.bf16.mxu0 %v6919_v18  ;;  %5665 = vmatprep.subr.bf16.mxu1 %v6921_v20  ;;  %v4858_v18 = vld [vmem:[#allocation8 + $0xd0] sm:$0xff] }
 0x620   : > { %v4862_v20 = vld [vmem:[#allocation8 + $0xf0] sm:$0xff] }
 0x621   : > { %v6858_v26 = vcombine.low %v4858_v18, %v4862_v20 }
 0x622   : > { %5625 = vmatpush2.bf16.msra.mxu0 %v6918_v28  ;;  %5666 = vmatpush2.bf16.msra.mxu1 %v6920_v34  ;;  %v6859_v28 = vcombine.high %v4858_v18, %v4862_v20  ;;  %v4850_v34 = vld [vmem:[#allocation8 + $0x90] sm:$0xff]  ;;  %v4935_v18 = vld [vmem:[#allocation8 + $0x338] sm:$0xff] }
 0x623   : > { %5626 = vmatprep.subr.bf16.mxu0 %v6911_v16  ;;  %5667 = vmatprep.subr.bf16.mxu1 %v6913_v15  ;;  %v4854_v16 = vld [vmem:[#allocation8 + $0xb0] sm:$0xff]  ;;  %v4851_v15 = vld [vmem:[#allocation8 + $0x98] sm:$0xff] }
 0x624   : > { %v6851_v11 = vcombine.high %v4850_v34, %v4854_v16  ;;  %v6850_v12 = vcombine.low %v4850_v34, %v4854_v16  ;;  %v6852_v53 = vcombine.low %v4851_v15, %v4855_v40  ;;  %v4927_v34 = vld [vmem:[#allocation8 + $0x2f8] sm:$0xff] }
 0x626   : > { %5627 = vmatpush2.bf16.msra.mxu0 %v6910_v36  ;;  %5668 = vmatpush2.bf16.msra.mxu1 %v6912_v21  ;;  %v6853_v36 = vcombine.high %v4851_v15, %v4855_v40  ;;  %v4842_v21 = vld [vmem:[#allocation8 + $0x50] sm:$0xff] }
 0x627   : > { %5628 = vmatprep.subr.bf16.mxu0 %v6903_v44  ;;  %5669 = vmatprep.subr.bf16.mxu1 %v6905_v38  ;;  %v4846_v44 = vld [vmem:[#allocation8 + $0x70] sm:$0xff]  ;;  %v4843_v38 = vld [vmem:[#allocation8 + $0x58] sm:$0xff] }
 0x628   : > { %v6843_v46 = vcombine.high %v4842_v21, %v4846_v44  ;;  %v6842_v45 = vcombine.low %v4842_v21, %v4846_v44  ;;  %v6844_v60 = vcombine.low %v4843_v38, %v4847_v50  ;;  %v4919_v21 = vld [vmem:[#allocation8 + $0x2b8] sm:$0xff] }
 0x62a   : > { %5629 = vmatpush2.bf16.msra.mxu0 %v6902_v25  ;;  %5670 = vmatpush2.bf16.msra.mxu1 %v6904_v7  ;;  %v6845_v25 = vcombine.high %v4843_v38, %v4847_v50  ;;  %v4834_v7 = vld [vmem:[#allocation8 + $0x10] sm:$0xff] }
 0x62b   : > { %5630 = vmatprep.subr.bf16.mxu0 %v6895_v51  ;;  %5671 = vmatprep.subr.bf16.mxu1 %v6897_v29  ;;  %v4838_v51 = vld [vmem:[#allocation8 + $0x30] sm:$0xff]  ;;  %v4835_v29 = vld [vmem:[#allocation8 + $0x18] sm:$0xff] }
 0x62c   : > { %v6835_v63 = vcombine.high %v4834_v7, %v4838_v51  ;;  %v6834_v52 = vcombine.low %v4834_v7, %v4838_v51  ;;  %v6836_v31 = vcombine.low %v4835_v29, %v4839_v3  ;;  %v4911_v7 = vld [vmem:[#allocation8 + $0x278] sm:$0xff] }
 0x62e   : > { %5631 = vmatpush2.bf16.msra.mxu0 %v6894_v13  ;;  %5672 = vmatpush2.bf16.msra.mxu1 %v6896_v42  ;;  %v6837_v13 = vcombine.high %v4835_v29, %v4839_v3  ;;  %v4954_v42 = vld [vmem:[#allocation8 + $0x3d0] sm:$0xff] }
 0x62f   : > { %5682 = vmatprep.subr.bf16.mxu0 %v6891_v55  ;;  %5723 = vmatprep.subr.bf16.mxu1 %v6893_v17  ;;  %v4958_v55 = vld [vmem:[#allocation8 + $0x3f0] sm:$0xff]  ;;  %v4955_v17 = vld [vmem:[#allocation8 + $0x3d8] sm:$0xff] }
 0x630   : > { %v6955_v58 = vcombine.high %v4954_v42, %v4958_v55  ;;  %v6954_v27 = vcombine.low %v4954_v42, %v4958_v55  ;;  %v6956_v48 = vcombine.low %v4955_v17, %v4959_v32  ;;  %v4903_v42 = vld [vmem:[#allocation8 + $0x238] sm:$0xff] }
 0x631   : > { %5633 = vmatmul.mubr.bf16.vlgmr.msra.gmra.mxu0 %v9116_v10  ;;  %5674 = vmatmul.mubr.bf16.vlgmr.msra.gmra.mxu1 %v9116_v10 }
 0x632   : > { %5683 = vmatpush1.bf16.msra.mxu0 %v6890_v41  ;;  %5724 = vmatpush1.bf16.msra.mxu1 %v6892_v54  ;;  %v6957_v41 = vcombine.high %v4955_v17, %v4959_v32  ;;  %v4946_v54 = vld [vmem:[#allocation8 + $0x390] sm:$0xff] }
 0x633   : > { %5684 = vmatprep.subr.bf16.mxu0 %v6883_v39  ;;  %5725 = vmatprep.subr.bf16.mxu1 %v6885_v57  ;;  %v4950_v39 = vld [vmem:[#allocation8 + $0x3b0] sm:$0xff]  ;;  %v4947_v57 = vld [vmem:[#allocation8 + $0x398] sm:$0xff] }
 0x634   : > { %5714 = vmatprep.mubr.bf16.mxu0 %v9110_v24  ;;  %5755 = vmatprep.mubr.bf16.mxu1 %v9110_v24  ;;  %v6861_v24 = vcombine.high %v4859_v2, %v4863_v0  ;;  %v6947_v47 = vcombine.high %v4946_v54, %v4950_v39  ;;  %v6946_v59 = vcombine.low %v4946_v54, %v4950_v39 }
 0x635   : > { %v6948_v8 = vcombine.low %v4947_v57, %v4951_v56 }
 0x636   : > { %5685 = vmatpush1.bf16.msra.mxu0 %v6882_v30  ;;  %5726 = vmatpush1.bf16.msra.mxu1 %v6884_v23  ;;  %v6949_v30 = vcombine.high %v4947_v57, %v4951_v56  ;;  %v4938_v23 = vld [vmem:[#allocation8 + $0x350] sm:$0xff] }
 0x637   : > { %5686 = vmatprep.subr.bf16.mxu0 %v6875_v37  ;;  %5727 = vmatprep.subr.bf16.mxu1 %v6877_v9  ;;  %v4942_v37 = vld [vmem:[#allocation8 + $0x370] sm:$0xff]  ;;  %v4939_v9 = vld [vmem:[#allocation8 + $0x358] sm:$0xff] }
 0x638   : > { %v6939_v1 = vcombine.high %v4938_v23, %v4942_v37  ;;  %v6938_v20 = vcombine.low %v4938_v23, %v4942_v37  ;;  %v6940_v2 = vcombine.low %v4939_v9, %v4943_v5  ;;  %v4824_v23 = vld [vmem:[%s9125_s3 + $0x10] sm:$0xff]  ;;  %v4825_v37 = vld [vmem:[%s9125_s3 + $0x18] sm:$0xff] }
 0x63a   : > { %5687 = vmatpush1.bf16.msra.mxu0 %v6874_v62  ;;  %5728 = vmatpush1.bf16.msra.mxu1 %v6876_v35  ;;  %v6941_v62 = vcombine.high %v4939_v9, %v4943_v5  ;;  %v4930_v35 = vld [vmem:[#allocation8 + $0x310] sm:$0xff]  ;;  %v4823_v5 = vld [vmem:[%s9125_s3 + $0x8] sm:$0xff] }
 0x63b   : > { %5688 = vmatprep.subr.bf16.mxu0 %v6867_v33  ;;  %5729 = vmatprep.subr.bf16.mxu1 %v6869_v14  ;;  %v4934_v33 = vld [vmem:[#allocation8 + $0x330] sm:$0xff]  ;;  %v4931_v14 = vld [vmem:[#allocation8 + $0x318] sm:$0xff] }
 0x63c   : > { %v6931_v0 = vcombine.high %v4930_v35, %v4934_v33  ;;  %v6930_v16 = vcombine.low %v4930_v35, %v4934_v33  ;;  %v6932_v15 = vcombine.low %v4931_v14, %v4935_v18 }
 0x63e   : > { %5689 = vmatpush1.bf16.msra.mxu0 %v6866_v22  ;;  %5730 = vmatpush1.bf16.msra.mxu1 %v6868_v6  ;;  %v6933_v22 = vcombine.high %v4931_v14, %v4935_v18  ;;  %v4922_v6 = vld [vmem:[#allocation8 + $0x2d0] sm:$0xff] }
 0x63f   : > { %5690 = vmatprep.subr.bf16.mxu0 %v6859_v28  ;;  %5731 = vmatprep.subr.bf16.mxu1 %v6861_v24  ;;  %v4926_v28 = vld [vmem:[#allocation8 + $0x2f0] sm:$0xff]  ;;  %v4923_v24 = vld [vmem:[#allocation8 + $0x2d8] sm:$0xff] }
 0x640   : > { %v6923_v40 = vcombine.high %v4922_v6, %v4926_v28  ;;  %v6922_v44 = vcombine.low %v4922_v6, %v4926_v28  ;;  %v6924_v38 = vcombine.low %v4923_v24, %v4927_v34  ;;  %v4826_v28 = vld [vmem:[%s9125_s3 + $0x20] sm:$0xff] }
 0x642   : > { %5691 = vmatpush1.bf16.msra.mxu0 %v6858_v26  ;;  %5732 = vmatpush1.bf16.msra.mxu1 %v6860_v61  ;;  %v6925_v26 = vcombine.high %v4923_v24, %v4927_v34  ;;  %v4914_v61 = vld [vmem:[#allocation8 + $0x290] sm:$0xff] }
 0x643   : > { %5692 = vmatprep.subr.bf16.mxu0 %v6851_v11  ;;  %5733 = vmatprep.subr.bf16.mxu1 %v6853_v36  ;;  %v4918_v11 = vld [vmem:[#allocation8 + $0x2b0] sm:$0xff]  ;;  %v4915_v36 = vld [vmem:[#allocation8 + $0x298] sm:$0xff] }
 0x644   : > { %v6915_v50 = vcombine.high %v4914_v61, %v4918_v11  ;;  %v6914_v51 = vcombine.low %v4914_v61, %v4918_v11  ;;  %v6916_v29 = vcombine.low %v4915_v36, %v4919_v21  ;;  %v4828_v24 = vld [vmem:[%s9125_s3 + $0x30] sm:$0xff]  ;;  %v4829_v61 = vld [vmem:[%s9125_s3 + $0x38] sm:$0xff] }
 0x646   : > { %5693 = vmatpush1.bf16.msra.mxu0 %v6850_v12  ;;  %5734 = vmatpush1.bf16.msra.mxu1 %v6852_v53  ;;  %v6917_v12 = vcombine.high %v4915_v36, %v4919_v21  ;;  %v4906_v53 = vld [vmem:[#allocation8 + $0x250] sm:$0xff] }
 0x647   : > { %5694 = vmatprep.subr.bf16.mxu0 %v6843_v46  ;;  %5735 = vmatprep.subr.bf16.mxu1 %v6845_v25  ;;  %v4910_v46 = vld [vmem:[#allocation8 + $0x270] sm:$0xff]  ;;  %v4907_v25 = vld [vmem:[#allocation8 + $0x258] sm:$0xff] }
 0x648   : > { %v6907_v3 = vcombine.high %v4906_v53, %v4910_v46  ;;  %v6906_v55 = vcombine.low %v4906_v53, %v4910_v46  ;;  %v6908_v17 = vcombine.low %v4907_v25, %v4911_v7 }
 0x64a   : > { %5695 = vmatpush1.bf16.msra.mxu0 %v6842_v45  ;;  %5736 = vmatpush1.bf16.msra.mxu1 %v6844_v60  ;;  %v6909_v45 = vcombine.high %v4907_v25, %v4911_v7  ;;  %v4898_v60 = vld [vmem:[#allocation8 + $0x210] sm:$0xff] }
 0x64b   : > { %5696 = vmatprep.subr.bf16.mxu0 %v6835_v63  ;;  %5737 = vmatprep.subr.bf16.mxu1 %v6837_v13  ;;  %v4902_v63 = vld [vmem:[#allocation8 + $0x230] sm:$0xff]  ;;  %v4899_v13 = vld [vmem:[#allocation8 + $0x218] sm:$0xff] }
 0x64c   : > { %v6899_v32 = vcombine.high %v4898_v60, %v4902_v63 }
 0x64e   : > { %5697 = vmatpush1.bf16.msra.mxu0 %v6834_v52  ;;  %5738 = vmatpush1.bf16.msra.mxu1 %v6836_v31  ;;  %v6901_v52 = vcombine.high %v4899_v13, %v4903_v42  ;;  %v6898_v31 = vcombine.low %v4898_v60, %v4902_v63 }
 0x64f   : > { %5698 = vmatprep.subr.bf16.mxu0 %v6955_v58  ;;  %5739 = vmatprep.subr.bf16.mxu1 %v6957_v41  ;;  %v6900_v58 = vcombine.low %v4899_v13, %v4903_v42 }
 0x652   : > { %5699 = vmatpush2.bf16.msra.mxu0 %v6954_v27  ;;  %5740 = vmatpush2.bf16.msra.mxu1 %v6956_v48 }
 0x653   : > { %5700 = vmatprep.subr.bf16.mxu0 %v6947_v47  ;;  %5741 = vmatprep.subr.bf16.mxu1 %v6949_v30  ;;  %v4822_v30 = vld [vmem:[%s9125_s3] sm:$0xff] }
 0x656   : > { %5701 = vmatpush2.bf16.msra.mxu0 %v6946_v59  ;;  %5742 = vmatpush2.bf16.msra.mxu1 %v6948_v8 }
 0x657   : > { %5702 = vmatprep.subr.bf16.mxu0 %v6939_v1  ;;  %5743 = vmatprep.subr.bf16.mxu1 %v6941_v62 }
 0x65a   : > { %5703 = vmatpush2.bf16.msra.mxu0 %v6938_v20  ;;  %5744 = vmatpush2.bf16.msra.mxu1 %v6940_v2 }
 0x65b   : > { %5704 = vmatprep.subr.bf16.mxu0 %v6931_v0  ;;  %5745 = vmatprep.subr.bf16.mxu1 %v6933_v22 }
 0x65e   : > { %5705 = vmatpush2.bf16.msra.mxu0 %v6930_v16  ;;  %5746 = vmatpush2.bf16.msra.mxu1 %v6932_v15  ;;  %v4827_v15 = vld [vmem:[%s9125_s3 + $0x28] sm:$0xff] }
 0x65f   : > { %5706 = vmatprep.subr.bf16.mxu0 %v6923_v40  ;;  %5747 = vmatprep.subr.bf16.mxu1 %v6925_v26 }
 0x662   : > { %5707 = vmatpush2.bf16.msra.mxu0 %v6922_v44  ;;  %5748 = vmatpush2.bf16.msra.mxu1 %v6924_v38 }
 0x663   : > { %5708 = vmatprep.subr.bf16.mxu0 %v6915_v50  ;;  %5749 = vmatprep.subr.bf16.mxu1 %v6917_v12 }
 0x666   : > { %5709 = vmatpush2.bf16.msra.mxu0 %v6914_v51  ;;  %5750 = vmatpush2.bf16.msra.mxu1 %v6916_v29 }
 0x667   : > { %5710 = vmatprep.subr.bf16.mxu0 %v6907_v3  ;;  %5751 = vmatprep.subr.bf16.mxu1 %v6909_v45 }
 0x66a   : > { %5711 = vmatpush2.bf16.msra.mxu0 %v6906_v55  ;;  %5752 = vmatpush2.bf16.msra.mxu1 %v6908_v17 }
 0x66b   : > { %5712 = vmatprep.subr.bf16.mxu0 %v6899_v32  ;;  %5753 = vmatprep.subr.bf16.mxu1 %v6901_v52 }
 0x66e   : > { %5713 = vmatpush2.bf16.msra.mxu0 %v6898_v31  ;;  %5754 = vmatpush2.bf16.msra.mxu1 %v6900_v58 }
 0x671   : > { %5715 = vmatmul.mubr.bf16.vlgmr.msra.gmra.mxu0 %v9116_v10  ;;  %5756 = vmatmul.mubr.bf16.vlgmr.msra.gmra.mxu1 %v9116_v10 }
 0x6f1   : > { %v5634_v41 = vpop.f32.mrf.mxu0  ;;  %v5675_v54 = vpop.f32.mrf.mxu1 }
 0x6f2   : > { %v5764_v9 = vadd.f32 %v5634_v41, %v4822_v30  ;;  %v5766_v10 = vadd.f32 %v5675_v54, %v4824_v23  ;;  %v7802_v23 = vld [vmem:[#allocation11 + $0xf8] sm:$0xff] (%p4811_p2)  }
 0x6f3   : > { %v5636_v39 = vpop.f32.mrf.mxu0  ;;  %v5677_v57 = vpop.f32.mrf.mxu1  ;;  %7183 = vmatprep.subr.bf16.mxu1 (%p4811_p2), %v7802_v23 }
 0x6f4   : > { %v5767_v59 = vadd.f32 %v5677_v57, %v4825_v37  ;;  %v6958_v8 = vmul.f32 -1.442695, %v5764_v9  ;;  %v5765_v1 = vadd.f32 %v5636_v39, %v4823_v5  ;;  %v6960_v62 = vmul.f32 -1.442695, %v5766_v10  ;;  %v7803_v37 = vld [vmem:[#allocation11 + $0x38] sm:$0xff] (%p4811_p2)   ;;  %v7805_v10 = vld [vmem:[#allocation11 + $0x70] sm:$0xff] (%p4811_p2)  }
 0x6f5   : > { %v5638_v56 = vpop.f32.mrf.mxu0  ;;  %v5679_v27 = vpop.f32.mrf.mxu1  ;;  %v7804_v9 = vld [vmem:[#allocation11 + $0xb8] sm:$0xff] (%p4811_p2)   ;;  %v7806_v5 = vld [vmem:[#allocation11 + $0xf0] sm:$0xff] (%p4811_p2)  }
 0x6f6   : > { %v6961_v35 = vmul.f32 -1.442695, %v5767_v59  ;;  %7769 = vpow2.f32 %v6958_v8  ;;  %v6959_v33 = vmul.f32 -1.442695, %v5765_v1  ;;  %7184 = vmatpush3.bf16.msra.mxu1 (%p4811_p2), %v7804_v9  ;;  %v7807_v59 = vld [vmem:[#allocation11 + $0x30] sm:$0xff] (%p4811_p2)   ;;  %v7812_v1 = vld [vmem:[#allocation11 + $0xa8] sm:$0xff] (%p4811_p2)  }
 0x6f7   : > { %v5639_v48 = vpop.f32.mrf.mxu0  ;;  %v5680_v47 = vpop.f32.mrf.mxu1  ;;  %7771 = vpow2.f32 %v6960_v62  ;;  %7185 = vmatprep.subr.bf16.mxu1 (%p4811_p2), %v7806_v5  ;;  %v7808_v8 = vld [vmem:[#allocation11 + $0xb0] sm:$0xff] (%p4811_p2)   ;;  %v7813_v62 = vld [vmem:[#allocation11 + $0x60] sm:$0xff] (%p4811_p2)  }
 0x6f8   : > { %7773 = vpow2.f32 %v6961_v35  ;;  %v7801_v48 = vld [vmem:[#allocation11 + $0x78] sm:$0xff] (%p4811_p2)   ;;  %v7814_v35 = vld [vmem:[#allocation11 + $0xe0] sm:$0xff] (%p4811_p2)  }
 0x6f9   : > { %7775 = vpow2.f32 %v6959_v33  ;;  %7161 = vmatprep.subr.bf16.mxu0 (%p4811_p2), %v7801_v48  ;;  %v7815_v33 = vld [vmem:[#allocation11 + $0x20] sm:$0xff] (%p4811_p2)  }
 0x6fa   :  { %7162 = vmatpush3.bf16.msra.mxu0 (%p4811_p2), %v7803_v37  ;;  %7186 = vmatpush3.bf16.msra.mxu1 (%p4811_p2), %v7808_v8 }
 0x6fb   :  { %7163 = vmatprep.subr.bf16.mxu0 (%p4811_p2), %v7805_v10 }
 0x6fe   :  { %7164 = vmatpush3.bf16.msra.mxu0 (%p4811_p2), %v7807_v59 }
 0x703   : > { %v7770_v14 = vpop.eup %7769 }
 0x704   : > { %v7772_v18 = vpop.eup %7771  ;;  %v5778_v2 = vadd.f32 1.0, %v7770_v14  ;;  %v7816_v14 = vld [vmem:[#allocation11 + $0xa0] sm:$0xff] (%p4811_p2)  }
 0x705   : > { %v7774_v20 = vpop.eup %7773  ;;  %v5790_v22 = vadd.f32 1.0, %v7772_v18  ;;  %v7817_v18 = vld [vmem:[#allocation11 + $0x58] sm:$0xff] (%p4811_p2)  }
 0x706   : > { %v7776_v0 = vpop.eup %7775  ;;  %v5791_v6 = vadd.f32 1.0, %v7774_v20  ;;  %7777 = vrcp.f32 %v5778_v2  ;;  %v7818_v20 = vld [vmem:[#allocation11 + $0xd8] sm:$0xff] (%p4811_p2)  }
 0x707   : > { %v5779_v34 = vadd.f32 1.0, %v7776_v0  ;;  %7779 = vrcp.f32 %v5790_v22  ;;  %v7819_v2 = vld [vmem:[#allocation11 + $0x18] sm:$0xff] (%p4811_p2)   ;;  %v7821_v22 = vld [vmem:[#allocation11 + $0x50] sm:$0xff] (%p4811_p2)  }
 0x708   : > { %7781 = vrcp.f32 %v5791_v6  ;;  %v7820_v0 = vld [vmem:[#allocation11 + $0x98] sm:$0xff] (%p4811_p2)   ;;  %v7822_v6 = vld [vmem:[#allocation11 + $0xd0] sm:$0xff] (%p4811_p2)  }
 0x713   : > { %v7778_v51 = vpop.eup %7777 }
 0x714   : > { %v7780_v29 = vpop.eup %7779 }
 0x715   : > { %v7782_v3 = vpop.eup %7781  ;;  %v5810_v63 = vmul.f32 %v7995_v4, %v7780_v29 }
 0x716   : > { %v5811_v17 = vmul.f32 %v7991_v19, %v7782_v3 }
 0x731   : > { %v5716_v16 = vpop.f32.mrf.mxu0  ;;  %v5757_v26 = vpop.f32.mrf.mxu1 }
 0x732   : > { %v5768_v40 = vadd.f32 %v5716_v16, %v4826_v28  ;;  %v5770_v11 = vadd.f32 %v5757_v26, %v4828_v24  ;;  %v7823_v28 = vld [vmem:[#allocation11 + $0x10] sm:$0xff] (%p4811_p2)   ;;  %v7826_v16 = vld [vmem:[#allocation11 + $0xc8] sm:$0xff] (%p4811_p2)   ;;  %v7829_v26 = vld [vmem:[#allocation11 + $0x40] sm:$0xff] (%p4811_p2)  }
 0x733   : > { %v5718_v36 = vpop.f32.mrf.mxu0  ;;  %v5759_v44 = vpop.f32.mrf.mxu1  ;;  %v7824_v24 = vld [vmem:[#allocation11 + $0x90] sm:$0xff] (%p4811_p2)  }
 0x734   : > { %7783 = vtanh.f32 %v5768_v40  ;;  %v5769_v21 = vadd.f32 %v5718_v36, %v4827_v15  ;;  %v6962_v38 = vmul.f32 -1.442695, %v5770_v11  ;;  %v5771_v50 = vadd.f32 %v5759_v44, %v4829_v61  ;;  %v7827_v15 = vld [vmem:[#allocation11 + $0x8] sm:$0xff] (%p4811_p2)   ;;  %v7830_v61 = vld [vmem:[#allocation11 + $0xc0] sm:$0xff] (%p4811_p2)  }
 0x735   : > { %7785 = vrcp.f32 %v5779_v34  ;;  %v5720_v12 = vpop.f32.mrf.mxu0  ;;  %v5761_v53 = vpop.f32.mrf.mxu1  ;;  %v7825_v34 = vld [vmem:[#allocation11 + $0x48] sm:$0xff] (%p4811_p2)   ;;  %v7831_v11 = vld [vmem:[#allocation11] sm:$0xff] (%p4811_p2)   ;;  %v5822_v44 = vpack.c.bf16 (%p4811_p2), %v9083_v49, %v9083_v49 }
 0x736   : > { %7787 = vtanh.f32 %v5769_v21  ;;  %v6963_v46 = vmul.f32 -1.442695, %v5771_v50  ;;  %v7828_v40 = vld [vmem:[#allocation11 + $0x88] sm:$0xff] (%p4811_p2)   ;;  %v7832_v36 = vld [vmem:[#allocation11 + $0x80] sm:$0xff] (%p4811_p2)   ;;  %v9248_v50 = vmov (%p4811_p2), 0.0   ;;  %v7834_v12 = vld [vmem:[%s9215_s16 + $0x30] sm:$0xff] (%p4811_p2)  }
 0x737   : > { %7789 = vpow2.f32 %v6962_v38  ;;  %v5721_v25 = vpop.f32.mrf.mxu0  ;;  %v5762_v7 = vpop.f32.mrf.mxu1  ;;  %v7833_v38 = vld [vmem:[%s9215_s16 + $0x38] sm:$0xff] (%p4811_p2)   ;;  %v7835_v49 = vld [vmem:[%s9215_s16 + $0x28] sm:$0xff] (%p4811_p2)   ;;  %v7836_v53 = vld [vmem:[%s9215_s16 + $0x20] sm:$0xff] (%p4811_p2)  }
 0x738   : > { %7791 = vpow2.f32 %v6963_v46  ;;  %v7837_v46 = vld [vmem:[%s9215_s16 + $0x18] sm:$0xff] (%p4811_p2)   ;;  %v7838_v25 = vld [vmem:[%s9215_s16 + $0x10] sm:$0xff] (%p4811_p2)   ;;  %v7839_v7 = vld [vmem:[%s9215_s16 + $0x8] sm:$0xff] (%p4811_p2)  }
 0x741   : > { %v7784_v45 = vpop.eup %7783 }
 0x742   : > { %v7786_v60 = vpop.eup %7785  ;;  %v5812_v13 = vmul.f32 %v7784_v45, %v7778_v51  ;;  %v7840_v51 = vld [vmem:[%s9215_s16] sm:$0xff] (%p4811_p2)  }
 0x743   : > { %v7788_v42 = vpop.eup %7787  ;;  %v6964_v45 = vld [vmem:[%s9214_s15] ss:$0 sm:$0xff] (%p4811_p2) }
 0x744   : > { %v7790_v55 = vpop.eup %7789  ;;  %v5814_v4 = vadd.f32 %v5812_v13, %v5810_v63   ;;  %v5813_v32 = vmul.f32 %v7788_v42, %v7786_v60 }
 0x745   : > { %v5804_v52 = vadd.f32 1.0, %v7790_v55  ;;  %v7792_v31 = vpop.eup %7791 }
 0x746   : > { %7793 = vtanh.f32 %v5814_v4  ;;  %v5815_v19 = vadd.f32 %v5813_v32, %v5811_v17   ;;  %v5805_v58 = vadd.f32 1.0, %v7792_v31  ;;  %v7810_v4 = vld [vmem:[#allocation11 + $0xe8] sm:$0xff] (%p4811_p2)  }
 0x747   : > { %7795 = vrcp.f32 %v5804_v52  ;;  %7187 = vmatprep.subr.bf16.mxu1 (%p4811_p2), %v7810_v4 }
 0x748   : > { %7797 = vtanh.f32 %v5815_v19  ;;  %v7809_v19 = vld [vmem:[#allocation11 + $0x68] sm:$0xff] (%p4811_p2)   ;;  %7188 = vmatpush3.bf16.msra.mxu1 (%p4811_p2), %v7812_v1 }
 0x749   : > { %7799 = vrcp.f32 %v5805_v58  ;;  %7165 = vmatprep.subr.bf16.mxu0 (%p4811_p2), %v7809_v19  ;;  %7189 = vmatprep.subr.bf16.mxu1 (%p4811_p2), %v7814_v35 }
 0x74c   :  { %7190 = vmatpush3.bf16.msra.mxu1 (%p4811_p2), %v7816_v14 }
 0x74d   :  { %7191 = vmatprep.subr.bf16.mxu1 (%p4811_p2), %v7818_v20 }
 0x750   :  { %7192 = vmatpush3.bf16.msra.mxu1 (%p4811_p2), %v7820_v0 }
 0x751   :  { %7193 = vmatprep.subr.bf16.mxu1 (%p4811_p2), %v7822_v6 }
 0x753   : > { %v7794_v41 = vpop.eup %7793 }
 0x754   : > { %v7796_v54 = vpop.eup %7795  ;;  %7194 = vmatpush3.bf16.msra.mxu1 (%p4811_p2), %v7824_v24 }
 0x755   : > { %v7798_v39 = vpop.eup %7797  ;;  %v9137_v30 = vmul.f32 %v7796_v54, %v7794_v41   ;;  %4813 = sbr.rel (!%p4811_p2) target bundleno = 1517 (0x5ed), region = 124  ;;  %7195 = vmatprep.subr.bf16.mxu1 (%p4811_p2), %v7826_v16 }
 0x756   : > { %v7800_v56 = vpop.eup %7799 }
 0x757   : > { %v9245_v57 = vmov %v9137_v30  ;;  %v5819_v27 = vmul.f32 %v7800_v56, %v7798_v39   ;;  %v6997_v39 = vld [vmem:[%s9216_s17] ss:$0 sm:$0xff] (%p4811_p2) }
 0x758   : > { %v9247_v30 = vmov %v9245_v57  ;;  %7196 = vmatpush3.bf16.msra.mxu1 (%p4811_p2), %v7828_v40 }
 0x759   : > { %v9246_v21 = vmov %v5819_v27  ;;  %v5821_v47 = vpack.c.bf16 (%p4811_p2), %v5819_v27, %v5819_v27  ;;  %v5823_v30 = vpack.c.bf16 (%p4811_p2), %v9085_v43, %v9085_v43  ;;  %v7811_v43 = vld [vmem:[#allocation11 + $0x28] sm:$0xff] (%p4811_p2)   ;;  %7197 = vmatprep.subr.bf16.mxu1 (%p4811_p2), %v7830_v61 }
 0x75a   :  { %7166 = vmatpush3.bf16.msra.mxu0 %v7811_v43  ;;  %v5820_v21 = vpack.c.bf16 %v9245_v57, %v9245_v57 }
 0x75b   :  { %6119 = vmatprep.mubr.bf16.mxu0 %v5821_v47  ;;  %6159 = vmatprep.mubr.bf16.mxu1 %v5823_v30 }
 0x75c   :  { %7167 = vmatprep.subr.bf16.mxu0 %v7813_v62  ;;  %7198 = vmatpush3.bf16.msra.mxu1 %v7832_v36 }
 0x75e   :  { %7168 = vmatpush3.bf16.msra.mxu0 %v7815_v33 }
 0x75f   :  { %7169 = vmatprep.subr.bf16.mxu0 %v7817_v18  ;;  %6160 = vmatmul.mubr.bf16.vlgmr.msra.gmra.mxu1 %v5822_v44 }
 0x762   :  { %7170 = vmatpush3.bf16.msra.mxu0 %v7819_v2 }
 0x763   :  { %7171 = vmatprep.subr.bf16.mxu0 %v7821_v22 }
 0x766   :  { %7172 = vmatpush3.bf16.msra.mxu0 %v7823_v28 }
 0x767   :  { %7173 = vmatprep.subr.bf16.mxu0 %v7825_v34 }
 0x76a   :  { %7174 = vmatpush3.bf16.msra.mxu0 %v7827_v15 }
 0x76b   :  { %7175 = vmatprep.subr.bf16.mxu0 %v7829_v26 }
 0x76e   :  { %7176 = vmatpush3.bf16.msra.mxu0 %v7831_v11 }
 0x76f   :  { %7266 = vmatprep.subr.bf16.mxu0 %v9248_v50 }
 0x771   :  { %6120 = vmatmul.mubr.bf16.vlgmr.msra.gmra.mxu0 %v5820_v21 }
 0x772   :  { %7267 = vmatpush3.bf16.msra.mxu0 %v7833_v38  ;;  %7282 = vmatprep.mubr.msk.bf16.mxu0 %vm8024_vm2, %v9248_v50 }
 0x773   :  { %7268 = vmatprep.subr.bf16.mxu0 %v9248_v50 }
 0x776   :  { %7269 = vmatpush3.bf16.msra.mxu0 %v7834_v12 }
 0x777   :  { %7270 = vmatprep.subr.bf16.mxu0 %v9248_v50 }
 0x77a   :  { %7271 = vmatpush3.bf16.msra.mxu0 %v7835_v49 }
 0x77b   :  { %7272 = vmatprep.subr.bf16.mxu0 %v9248_v50 }
 0x77e   :  { %7273 = vmatpush3.bf16.msra.mxu0 %v7836_v53 }
 0x77f   :  { %7274 = vmatprep.subr.bf16.mxu0 %v9248_v50 }
 0x782   :  { %7275 = vmatpush3.bf16.msra.mxu0 %v7837_v46 }
 0x783   :  { %7276 = vmatprep.subr.bf16.mxu0 %v9248_v50 }
 0x786   :  { %7277 = vmatpush3.bf16.msra.mxu0 %v7838_v25 }
 0x787   :  { %7278 = vmatprep.subr.bf16.mxu0 %v9248_v50 }
 0x78a   :  { %7279 = vmatpush3.bf16.msra.mxu0 %v7839_v7 }
 0x78b   :  { %7280 = vmatprep.subr.bf16.mxu0 %v9248_v50 }
 0x78e   :  { %7281 = vmatpush3.bf16.msra.mxu0 %v7840_v51 }
 0x81f   :  { %v7199_v3 = vpop.f32.mrf.mxu1 }
 0x821   :  { %v7200_v13 = vpop.f32.mrf.mxu1 }
 0x822   :  { %v7201_v17 = vadd.f32 %v7200_v13, %v7199_v3 }
 0x823   :  { %v7202_v32 = vpop.f32.mrf.mxu1 }
 0x825   :  { %v7203_v58 = vpop.f32.mrf.mxu1 }
 0x831   :  { %v7177_v29 = vpop.f32.mrf.mxu0 }
 0x833   :  { %v7178_v60 = vpop.f32.mrf.mxu0 }
 0x834   :  { %v7179_v63 = vadd.f32 %v7178_v60, %v7177_v29 }
 0x835   :  { %v7180_v42 = vpop.f32.mrf.mxu0 }
 0x836   :  { %v6122_v55 = vadd.f32 %v7179_v63, %v6964_v45 }
 0x837   :  { %v7181_v52 = vpop.f32.mrf.mxu0 }
 0x838   :  { %v6162_v31 = vadd.f32 %v7201_v17, %v6122_v55 }
 0x83a   :  { %v6167_v41 = vmax.f32 %v6162_v31, 0.0 }
 0x83c   :  { %v6168_v54 = vpack.c.bf16 %v6167_v41, %v6167_v41 }
 0x83e   :  { %7283 = vmatmul.mubr.bf16.vlgmr.msra.gmra.mxu0 %v6168_v54 }
 0x8fe   :  { %v6274_v57 = vpop.f32.mrf.mxu0 }
 0x8ff   :  { %v6275_v56 = vadd.f32 %v6997_v39, %v6274_v57 }
 0x900   :  { %v7284_v27 = vpop.f32.mrf.mxu0 }
 0x901   :  { %6280 = vst [vmem:[%s9217_s18] sm:$0xff] %v6275_v56 }
 0x902   :  { %v6277_v48 = vpop.f32.mrf.mxu0 }
 0x904   :  { %v7285_v47 = vpop.f32.mrf.mxu0 }
 0x905   :  { %6285 = vsyncpa [#allocation4], 1 }
 0x906   :  { %6286 = vsyncpa [#allocation6], 1 }
 0x907   :  { %6287 = vsyncpa [#allocation9], 1 }
 0x908   :  { %6288 = vsyncpa [#allocation12], 1 }

</bundles_post_ra>
